<compile_context>
chip_gen: v7x
topology: tpu7x:2x2x1
jax: 0.10.0
libtpu: 0.0.40
codegen_flags: <defaults>
</compile_context>

<pallas_src>
import math
import jax
import jax.numpy as jnp
from jax.experimental import pallas as pl
from jax.experimental.pallas import tpu as pltpu


# ----------------------------------------------------------------------------
# Parameter bookkeeping (same layout as the PyTorch module)
# ----------------------------------------------------------------------------
def param_shapes(F, Hd, Hn, Dh):
    Hd2 = Hd // 2
    HnDh = Hn * Dh
    return {
        "ln1_g": (1, F), "ln1_b": (1, F),
        "wq": (F, HnDh), "bq": (1, HnDh),
        "wk": (F, HnDh), "bk": (1, HnDh),
        "wv": (F, HnDh), "bv": (1, HnDh),
        "wout": (HnDh, F), "bout": (1, F),
        "pos_w1": (1, Hd2), "pos_b1": (1, Hd2),
        "pos_w2": (Hd2, Hn), "pos_b2": (1, Hn),
        "edge_w1": (2 * F + 1, Hd), "edge_b1": (1, Hd),
        "edge_w2": (Hd, Hd), "edge_b2": (1, Hd),
        "ew_w": (Hd, Hn), "ew_b": (1, Hn),
        "msg_w1": (Hd + 1 + 3, Hd), "msg_b1": (1, Hd),
        "msg_w2": (Hd, Hd), "msg_b2": (1, Hd),
        "gate_w": (Hd, Hn), "gate_b": (1, Hn),
        "coord_w1": (Hd, Hd), "coord_b1": (1, Hd),
        "coord_w2": (Hd, Hn), "coord_b2": (1, Hn),
        "coord_wts": (1, Hn),
        "cross_w1": (Hd, Hd), "cross_b1": (1, Hd),
        "cross_w2": (Hd, Hn), "cross_b2": (1, Hn),
        "ffln_g": (1, F), "ffln_b": (1, F),
        "ff_w1": (F, 2 * Hd), "ff_b1": (1, 2 * Hd),
        "ff_w2": (2 * Hd, F), "ff_b2": (1, F),
    }


def init_params(key, F, Hd, Hn, Dh):
    shapes = param_shapes(F, Hd, Hn, Dh)
    p = {}
    keys = jax.random.split(key, len(shapes))
    for kk, (name, shp) in zip(keys, shapes.items()):
        if name in ("ln1_g", "ffln_g", "coord_wts"):
            p[name] = jnp.ones(shp, jnp.float32)
        elif name in ("ln1_b", "ffln_b"):
            p[name] = jnp.zeros(shp, jnp.float32)
        else:
            p[name] = 0.1 * jax.random.normal(kk, shp, jnp.float32)
    return p


# ----------------------------------------------------------------------------
# Slab layouts (shared between wrapper and kernel)
# ----------------------------------------------------------------------------
def _rup(x, m=128):
    return ((x + m - 1) // m) * m


# Vector-slab row indices (one [1, .] parameter per row, lane offset 0)
(R_LN1G, R_LN1B, R_BNODE, R_POSW1, R_POSB1, R_POSB2, R_EW1D, R_EB2, R_EWB,
 R_MW1A, R_MB1, R_MB2, R_GATEB, R_CB1, R_XB1, R_CB2S, R_XB2S, R_BOUT,
 R_FFLNG, R_FFLNB, R_FFB1, R_FFB2, R_MW1P) = range(23)
NUM_VEC_ROWS = R_MW1P + 3          # msg_w1_p occupies 3 rows


def _layout(F, Hd, Hn, Dh):
    HnDh = Hn * Dh
    L = {}
    L["Wn"] = 3 * HnDh + 2 * Hd                  # q | k | v | W_r h | W_c h
    L["Wn_pad"] = _rup(L["Wn"])
    # WmatF (row dim F): [ w_node | ff_w1 ], 128-aligned blocks
    L["F_node"] = 0
    L["F_ff1"] = L["Wn_pad"]
    L["WmatF_w"] = L["F_ff1"] + _rup(2 * Hd)
    # WmatH (row dim Hd): every weight starts on a 128-lane block
    o = 0
    L["H_edge2"] = o; o += _rup(Hd)
    L["H_msg1e"] = o; o += _rup(Hd)
    L["H_eww"] = o;   o += _rup(Hn)
    L["H_msg2"] = o;  o += _rup(Hd)
    L["H_gate"] = o;  o += _rup(Hn)
    L["H_cw1"] = o;   o += _rup(Hd)
    L["H_xw1"] = o;   o += _rup(Hd)
    L["H_cw2"] = o;   o += _rup(Hn)
    L["H_xw2"] = o;   o += _rup(Hn)
    L["H_pos2"] = o;  o += _rup(Hn)
    L["WmatH_w"] = o
    L["VEC_W"] = max(L["Wn_pad"], _rup(2 * Hd), 128)
    L["OUT_W"] = max(128, _rup(F + 3))
    return L


# ----------------------------------------------------------------------------
# Pallas kernel (single program, whole graph resident in VMEM)
# ----------------------------------------------------------------------------
def make_kernel(N, F, Hd, Hn, Dh):
    HnDh = Hn * Dh
    scale = 1.0 / math.sqrt(Dh)
    f32 = jnp.float32
    L = _layout(F, Hd, Hn, Dh)
    TN = (((0,), (0,)), ((), ()))   # contract edge axes (segment-sum over `row`)
    NT = (((1,), (1,)), ((), ()))   # contract head axes (head-repeat)

    def kernel(h_ref, x_ref, grow_ref, gcol_ref, droll_ref, maskb_ref, s_ref,
               wf_ref, wh_ref, wout_ref, ffw2_ref, vecs_ref, out_ref):

        def silu(t):
            return t * jax.nn.sigmoid(t)

        def mm(a, b):
            return jnp.dot(a, b, preferred_element_type=f32)

        def layernorm(t, g, b):
            mu = jnp.mean(t, axis=-1, keepdims=True)
            var = jnp.mean((t - mu) ** 2, axis=-1, keepdims=True)
            return (t - mu) * jax.lax.rsqrt(var + 1e-5) * g + b

        V = vecs_ref[...]
        vrow = lambda r, w: V[r:r + 1, :w]

        h = h_ref[...]
        x = x_ref[...]
        Grow = grow_ref[...]                    # [E, N] f32 (0/1)
        Gcol = gcol_ref[...]                    # [E, N] f32 (0/1)
        S = s_ref[...]                          # [HnDh, Hn] head-sum matrix

        def seg_sum(X):                         # scatter_add over `row`: [E,C]->[N,C]
            return jax.lax.dot_general(Grow, X, TN, preferred_element_type=f32)

        # ---- norm1 + node-side fused projection (q|k|v|edge-row|edge-col) ----
        h_norm = layernorm(h, vrow(R_LN1G, F), vrow(R_LN1B, F))
        node_slab = mm(h_norm, wf_ref[:, L["F_node"]:L["F_node"] + L["Wn_pad"]]) \
            + V[R_BNODE:R_BNODE + 1, :L["Wn_pad"]]

        # ---- per-edge gathers: two incidence matmuls, zero lane concats ----
        row_g = mm(Grow, node_slab)             # [E, Wn_pad]
        col_g = mm(Gcol, node_slab)             # [E, Wn_pad]
        q_i = row_g[:, 0:HnDh]
        eR = row_g[:, 3 * HnDh:3 * HnDh + Hd]   # edge_w1_r @ h[row] + edge_b1
        k_j = col_g[:, HnDh:2 * HnDh]
        v_j = col_g[:, 2 * HnDh:3 * HnDh]
        eC = col_g[:, 3 * HnDh + Hd:3 * HnDh + 2 * Hd]   # edge_w1_c @ h[col]

        # ---- relative geometry via incidence-difference matmuls ----
        rel_pos = mm(Grow - Gcol, x)            # [E,3] == x[row] - x[col]
        rel_roll = mm(droll_ref[...], x)        # [E,3] == roll(rel_pos, 1, axis=0)
        rel_dist = jnp.sum(rel_pos * rel_pos, axis=-1, keepdims=True)

        # ---- positional MLP (hidden padded to Hd lanes; pad lanes exact 0) ----
        pos_h = silu(rel_dist * vrow(R_POSW1, Hd) + vrow(R_POSB1, Hd))
        pos_enc = mm(pos_h, wh_ref[:, L["H_pos2"]:L["H_pos2"] + Hn]) + vrow(R_POSB2, Hn)

        # ---- edge MLP (first layer fully pushed to the node side) ----
        e1 = silu(eR + eC + rel_dist * vrow(R_EW1D, Hd))
        edge_features = mm(e1, wh_ref[:, L["H_edge2"]:L["H_edge2"] + Hd]) + vrow(R_EB2, Hd)
        # fused [msg_w1_e | ew_w] matmul, block-aligned output slices
        ef = mm(edge_features, wh_ref[:, L["H_msg1e"]:L["H_msg2"]])
        m1_e = ef[:, :Hd]
        off_ew = L["H_eww"] - L["H_msg1e"]
        edge_weights = ef[:, off_ew:off_ew + Hn] + vrow(R_EWB, Hn)

        # ---- attention logits (Dh head-sum in f32 on the MXU) ----
        attn = mm(q_i * k_j, S) * scale + pos_enc + edge_weights + maskb_ref[...]
        # Global per-head max as the softmax shift: an upper bound on every
        # per-node max; it cancels exactly after normalization.  NOTE: a node
        # whose edges are ALL masked gets zero attention here (reference gives
        # a degenerate uniform 1/deg); every node keeps valid edges in practice.
        attn_max = jnp.max(attn, axis=0, keepdims=True)
        p_exp = jnp.exp(attn - attn_max)
        attn_sum = seg_sum(p_exp)               # [N, Hn] f32
        gathered_sum = mm(Grow, attn_sum)       # [E, Hn] f32
        attn_n = p_exp * pl.reciprocal(gathered_sum + 1e-8, approx=True)

        # ---- message MLP (first layer split over row blocks, no concat) ----
        attn_mean = jnp.mean(attn_n, axis=-1, keepdims=True)
        m1 = silu(m1_e + attn_mean * vrow(R_MW1A, Hd)
                  + mm(rel_pos, V[R_MW1P:R_MW1P + 3, :Hd]) + vrow(R_MB1, Hd))
        messages = mm(m1, wh_ref[:, L["H_msg2"]:L["H_msg2"] + Hd]) + vrow(R_MB2, Hd)

        # ---- fused gate / coord / cross hidden projections (block-aligned) ----
        mp = mm(messages, wh_ref[:, L["H_gate"]:L["H_cw2"]])
        gates = jax.nn.sigmoid(mp[:, :Hn] + vrow(R_GATEB, Hn))
        oc = L["H_cw1"] - L["H_gate"]
        ox = L["H_xw1"] - L["H_gate"]
        c_hid = silu(mp[:, oc:oc + Hd] + vrow(R_CB1, Hd))
        x_hid = silu(mp[:, ox:ox + Hd] + vrow(R_XB1, Hd))
        # coord_w2 / cross_w2 already carry coord_weights and 1/(n_nodes-1)
        cwf = mm(c_hid, wh_ref[:, L["H_cw2"]:L["H_cw2"] + Hn]) + vrow(R_CB2S, Hn)
        cg = mm(x_hid, wh_ref[:, L["H_xw2"]:L["H_xw2"] + Hn]) + vrow(R_XB2S, Hn)

        head_w = jnp.sum(gates * cwf, axis=-1, keepdims=True)
        cg_sum = jnp.sum(cg, axis=-1, keepdims=True)

        ax, ay, az = rel_pos[:, 0:1], rel_pos[:, 1:2], rel_pos[:, 2:3]
        bx, by, bz = rel_roll[:, 0:1], rel_roll[:, 1:2], rel_roll[:, 2:3]
        cross = jnp.concatenate([ay * bz - az * by,
                                 az * bx - ax * bz,
                                 ax * by - ay * bx], axis=-1)
        coord_edge = head_w * rel_pos + cg_sum * cross          # [E,3]

        # ---- value aggregation + coordinate scatter (f32 accumulation) ----
        attn_rep = jax.lax.dot_general(attn_n, S, NT, preferred_element_type=f32)
        weighted_values = seg_sum(attn_rep * v_j)               # [N, HnDh]
        coord_update = seg_sum(coord_edge)                      # [N, 3]

        out_feat = mm(weighted_values, wout_ref[...]) + vrow(R_BOUT, F)

        # ---- residuals + feed-forward (proj = Identity, dropout = identity) ----
        h_new = h + out_feat
        x_new = x + coord_update
        h_ln = layernorm(h_new, vrow(R_FFLNG, F), vrow(R_FFLNB, F))
        ffh = silu(mm(h_ln, wf_ref[:, L["F_ff1"]:L["F_ff1"] + 2 * Hd]) + vrow(R_FFB1, 2 * Hd))
        h_new = h_new + mm(ffh, ffw2_ref[...]) + vrow(R_FFB2, F)

        # single lane-dense output slab: [ h (F) | x (3) | zero pad ]
        out_ref[...] = jnp.zeros_like(out_ref)
        out_ref[:, :F] = h_new
        out_ref[:, F:F + 3] = x_new

    return kernel


# ----------------------------------------------------------------------------
# Wrapper: builds incidence matrices and the packed weight / vector slabs
# ----------------------------------------------------------------------------
def en_transformer_layer(h, x, row, col, mask, params, *, Hn, Dh):
    N, F = h.shape
    E = row.shape[0]
    HnDh = Hn * Dh
    f32 = jnp.float32
    p = params
    Hd = p["edge_w2"].shape[0]
    Hd2 = Hd // 2
    inv_nm1 = 1.0 / (N - 1)
    L = _layout(F, Hd, Hn, Dh)

    # incidence matrices (0/1, exact in f32) + rolled difference for the cross term
    Grow = jax.nn.one_hot(row, N, dtype=f32)            # [E, N]
    Gcol = jax.nn.one_hot(col, N, dtype=f32)            # [E, N]
    Droll = jnp.roll(Grow - Gcol, 1, axis=0)             # rel_pos roll as a matmul
    mask_bias = jnp.where(mask, 0.0, -1e9).astype(f32)[:, None]   # additive mask

    # head-sum matrix S[d, h] = 1 iff d // Dh == h
    S = (jnp.arange(HnDh)[:, None] // Dh == jnp.arange(Hn)[None, :]).astype(f32)

    # ---- WmatF (row dim F): node-side fused projection + ff_w1 ----
    edge_w1_r = p["edge_w1"][:F]
    edge_w1_c = p["edge_w1"][F:2 * F]
    edge_w1_d = p["edge_w1"][2 * F:2 * F + 1]
    w_node = jnp.concatenate([p["wq"], p["wk"], p["wv"], edge_w1_r, edge_w1_c], axis=1)
    b_node = jnp.concatenate([p["bq"], p["bk"], p["bv"], p["edge_b1"],
                              jnp.zeros((1, Hd), f32)], axis=1)
    wmatF = jnp.zeros((F, L["WmatF_w"]), f32)
    wmatF = wmatF.at[:, L["F_node"]:L["F_node"] + L["Wn"]].set(w_node)
    wmatF = wmatF.at[:, L["F_ff1"]:L["F_ff1"] + 2 * Hd].set(p["ff_w1"])

    # ---- WmatH (row dim Hd): all edge-side weights, 128-block aligned ----
    pos_w2_pad = jnp.zeros((Hd, Hn), f32).at[:Hd2].set(p["pos_w2"])
    coord_w2_s = p["coord_w2"] * p["coord_wts"] * inv_nm1     # fold coord_weights & 1/(N-1)
    cross_w2_s = p["cross_w2"] * inv_nm1
    wmatH = jnp.zeros((Hd, L["WmatH_w"]), f32)
    wmatH = wmatH.at[:, L["H_edge2"]:L["H_edge2"] + Hd].set(p["edge_w2"])
    wmatH = wmatH.at[:, L["H_msg1e"]:L["H_msg1e"] + Hd].set(p["msg_w1"][:Hd])
    wmatH = wmatH.at[:, L["H_eww"]:L["H_eww"] + Hn].set(p["ew_w"])
    wmatH = wmatH.at[:, L["H_msg2"]:L["H_msg2"] + Hd].set(p["msg_w2"])
    wmatH = wmatH.at[:, L["H_gate"]:L["H_gate"] + Hn].set(p["gate_w"])
    wmatH = wmatH.at[:, L["H_cw1"]:L["H_cw1"] + Hd].set(p["coord_w1"])
    wmatH = wmatH.at[:, L["H_xw1"]:L["H_xw1"] + Hd].set(p["cross_w1"])
    wmatH = wmatH.at[:, L["H_cw2"]:L["H_cw2"] + Hn].set(coord_w2_s)
    wmatH = wmatH.at[:, L["H_xw2"]:L["H_xw2"] + Hn].set(cross_w2_s)
    wmatH = wmatH.at[:, L["H_pos2"]:L["H_pos2"] + Hn].set(pos_w2_pad)

    # ---- Vecs: every [1, .] parameter in its own row (lane offset 0) ----
    VR = _rup(NUM_VEC_ROWS, 8)
    vecs = jnp.zeros((VR, L["VEC_W"]), f32)

    def setrow(v, r, w):
        return v.at[r:r + 1, :w.shape[1]].set(w)

    vecs = setrow(vecs, R_LN1G, p["ln1_g"])
    vecs = setrow(vecs, R_LN1B, p["ln1_b"])
    vecs = setrow(vecs, R_BNODE, b_node)
    vecs = setrow(vecs, R_POSW1, p["pos_w1"])
    vecs = setrow(vecs, R_POSB1, p["pos_b1"])
    vecs = setrow(vecs, R_POSB2, p["pos_b2"])
    vecs = setrow(vecs, R_EW1D, edge_w1_d)
    vecs = setrow(vecs, R_EB2, p["edge_b2"])
    vecs = setrow(vecs, R_EWB, p["ew_b"])
    vecs = setrow(vecs, R_MW1A, p["msg_w1"][Hd:Hd + 1])
    vecs = setrow(vecs, R_MB1, p["msg_b1"])
    vecs = setrow(vecs, R_MB2, p["msg_b2"])
    vecs = setrow(vecs, R_GATEB, p["gate_b"])
    vecs = setrow(vecs, R_CB1, p["coord_b1"])
    vecs = setrow(vecs, R_XB1, p["cross_b1"])
    vecs = setrow(vecs, R_CB2S, p["coord_b2"] * p["coord_wts"] * inv_nm1)
    vecs = setrow(vecs, R_XB2S, p["cross_b2"] * inv_nm1)
    vecs = setrow(vecs, R_BOUT, p["bout"])
    vecs = setrow(vecs, R_FFLNG, p["ffln_g"])
    vecs = setrow(vecs, R_FFLNB, p["ffln_b"])
    vecs = setrow(vecs, R_FFB1, p["ff_b1"])
    vecs = setrow(vecs, R_FFB2, p["ff_b2"])
    vecs = vecs.at[R_MW1P:R_MW1P + 3, :Hd].set(p["msg_w1"][Hd + 1:Hd + 4])

    inputs = [h.astype(f32), x.astype(f32), Grow, Gcol, Droll, mask_bias, S,
              wmatF, wmatH, p["wout"], p["ff_w2"], vecs]

    # advisory cost estimate so XLA schedules slab construction around the call
    bytes_in = sum(int(a.size) * 4 for a in inputs)
    flops = 2 * (N * F * L["Wn"]
                 + 2 * E * N * L["Wn_pad"]
                 + 2 * E * N * 3
                 + E * Hd * (Hd + _rup(Hd) + _rup(Hn))          # edge2 + fused msg1e/eww
                 + E * Hd * (Hd + _rup(Hn) + 2 * _rup(Hd))      # msg2 + fused gate/coord/cross
                 + E * Hd * 3 * Hn                              # coord_w2 / cross_w2 / pos_w2
                 + 2 * E * Hn * HnDh                            # logit head-sum + head-repeat
                 + E * N * (2 * Hn + HnDh + 3)                  # scatters + denom gather
                 + N * (HnDh * F + F * 2 * Hd + 2 * Hd * F))
    trans = E * (3 * Hd + 2 * Hn + 2 * Hd) + N * 2 * Hd
    cost = pl.CostEstimate(flops=int(flops), transcendentals=int(trans),
                           bytes_accessed=int(bytes_in + N * L["OUT_W"] * 4))

    vmem = pl.BlockSpec(memory_space=pltpu.MemorySpace.VMEM)
    kernel = make_kernel(N, F, Hd, Hn, Dh)
    out = pl.pallas_call(
        kernel,
        out_shape=jax.ShapeDtypeStruct((N, L["OUT_W"]), f32),
        in_specs=[vmem] * len(inputs),
        out_specs=vmem,
        cost_estimate=cost,
    )(*inputs)
    return out[:, :F], out[:, F:F + 3]


# ----------------------------------------------------------------------------
# Pure-JAX reference (f32, scatter via jax.ops.segment_*)
# ----------------------------------------------------------------------------
def ref_forward(h, x, row, col, mask, p, *, Hn, Dh):
    N, F = h.shape
    silu = lambda t: t * jax.nn.sigmoid(t)

    def ln(t, g, b):
        mu = t.mean(-1, keepdims=True)
        var = ((t - mu) ** 2).mean(-1, keepdims=True)
        return (t - mu) / jnp.sqrt(var + 1e-5) * g + b

    h_norm = ln(h, p["ln1_g"], p["ln1_b"])
    q = (h_norm @ p["wq"] + p["bq"]).reshape(N, Hn, Dh)
    k = (h_norm @ p["wk"] + p["bk"]).reshape(N, Hn, Dh)
    v = (h_norm @ p["wv"] + p["bv"]).reshape(N, Hn, Dh)

    rel_pos = x[row] - x[col]
    rel_dist = jnp.sum(rel_pos ** 2, -1, keepdims=True)
    pos_enc = silu(rel_dist @ p["pos_w1"] + p["pos_b1"]) @ p["pos_w2"] + p["pos_b2"]
    edge_attr = jnp.concatenate([h_norm[row], h_norm[col], rel_dist], -1)
    edge_features = silu(edge_attr @ p["edge_w1"] + p["edge_b1"]) @ p["edge_w2"] + p["edge_b2"]
    edge_weights = edge_features @ p["ew_w"] + p["ew_b"]

    attn = jnp.sum(q[row] * k[col], -1) / math.sqrt(Dh) + pos_enc + edge_weights
    attn = jnp.where(mask[:, None], attn, -1e9)
    amax = jax.ops.segment_max(attn, row, num_segments=N)
    attn = jnp.exp(attn - amax[row])
    asum = jax.ops.segment_sum(attn, row, num_segments=N)
    attn = attn / (asum[row] + 1e-8)

    msg_in = jnp.concatenate([edge_features, attn.mean(1, keepdims=True), rel_pos], -1)
    messages = silu(msg_in @ p["msg_w1"] + p["msg_b1"]) @ p["msg_w2"] + p["msg_b2"]
    gates = jax.nn.sigmoid(messages @ p["gate_w"] + p["gate_b"])
    cwf = silu(messages @ p["coord_w1"] + p["coord_b1"]) @ p["coord_w2"] + p["coord_b2"]
    hw = gates * cwf * p["coord_wts"]
    coord_update = jax.ops.segment_sum(hw.sum(1, keepdims=True) * rel_pos / (N - 1),
                                       row, num_segments=N)
    cross = jnp.cross(rel_pos, jnp.roll(rel_pos, 1, axis=0))
    cg = silu(messages @ p["cross_w1"] + p["cross_b1"]) @ p["cross_w2"] + p["cross_b2"]
    coord_update = coord_update + jax.ops.segment_sum(
        cg.sum(1, keepdims=True) * cross / (N - 1), row, num_segments=N)

    wv = jax.ops.segment_sum(attn[:, :, None] * v[col], row, num_segments=N)
    out_feat = wv.reshape(N, -1) @ p["wout"] + p["bout"]

    h2 = h + out_feat
    x2 = x + coord_update
    h2 = h2 + (silu(ln(h2, p["ffln_g"], p["ffln_b"]) @ p["ff_w1"] + p["ff_b1"])
               @ p["ff_w2"] + p["ff_b2"])
    return h2, x2


# ----------------------------------------------------------------------------
if __name__ == "__main__":
    N, F, Hd, Hn, Dh = 8, 32, 32, 4, 16   # input_nf = output_nf = 32, hidden_nf = 32

    key = jax.random.PRNGKey(0)
    k_h, k_x, k_p = jax.random.split(key, 3)
    h = jax.random.normal(k_h, (N, F), jnp.float32)
    x = jax.random.normal(k_x, (N, 3), jnp.float32)

    # fully-connected graph without self loops -> E = N*(N-1) = 56
    rows, cols = [], []
    for i in range(N):
        for j in range(N):
            if i != j:
                rows.append(i)
                cols.append(j)
    row = jnp.array(rows, jnp.int32)
    col = jnp.array(cols, jnp.int32)
    mask = ((row + col) % 5 != 0)  # deterministic mask; every node keeps valid edges

    params = init_params(k_p, F, Hd, Hn, Dh)

    h_out, x_out = en_transformer_layer(h, x, row, col, mask, params, Hn=Hn, Dh=Dh)
    jax.block_until_ready((h_out, x_out))

    h_ref, x_ref = ref_forward(h, x, row, col, mask, params, Hn=Hn, Dh=Dh)
    assert jnp.all(jnp.isfinite(h_out)) and jnp.all(jnp.isfinite(x_out))
    # f32 throughout; only the approx reciprocal / global-max shift differ
    assert jnp.allclose(h_out, h_ref, atol=5e-2, rtol=5e-2), \
        float(jnp.max(jnp.abs(h_out - h_ref)))
    assert jnp.allclose(x_out, x_ref, atol=5e-2, rtol=5e-2), \
        float(jnp.max(jnp.abs(x_out - x_ref)))
    print("KERNEL_OK")
</pallas_src>

<mosaic_0001>
module attributes {stable_mosaic.version = 11 : i64} {
  func.func @kernel(%arg0: memref<8x32xf32, #tpu.memory_space<vmem>>, %arg1: memref<8x3xf32, #tpu.memory_space<vmem>>, %arg2: memref<56x8xf32, #tpu.memory_space<vmem>>, %arg3: memref<56x8xf32, #tpu.memory_space<vmem>>, %arg4: memref<56x8xf32, #tpu.memory_space<vmem>>, %arg5: memref<56x1xf32, #tpu.memory_space<vmem>>, %arg6: memref<64x4xf32, #tpu.memory_space<vmem>>, %arg7: memref<32x384xf32, #tpu.memory_space<vmem>>, %arg8: memref<32x1280xf32, #tpu.memory_space<vmem>>, %arg9: memref<64x32xf32, #tpu.memory_space<vmem>>, %arg10: memref<64x32xf32, #tpu.memory_space<vmem>>, %arg11: memref<32x256xf32, #tpu.memory_space<vmem>>, %arg12: memref<8x128xf32, #tpu.memory_space<vmem>>) attributes {dimension_semantics = [], scalar_prefetch = 0 : i64, scratch_operands = 0 : i64, tpu.core_type = #tpu.core_type<tc>} {
    %c0 = arith.constant 0 : index
    %c0_0 = arith.constant 0 : index
    %0 = vector.load %arg11[%c0, %c0_0] : memref<32x256xf32, #tpu.memory_space<vmem>>, vector<32x256xf32>
    %c0_1 = arith.constant 0 : index
    %c0_2 = arith.constant 0 : index
    %1 = vector.load %arg0[%c0_1, %c0_2] : memref<8x32xf32, #tpu.memory_space<vmem>>, vector<8x32xf32>
    %c0_3 = arith.constant 0 : index
    %c0_4 = arith.constant 0 : index
    %2 = vector.load %arg1[%c0_3, %c0_4] : memref<8x3xf32, #tpu.memory_space<vmem>>, vector<8x3xf32>
    %c0_5 = arith.constant 0 : index
    %c0_6 = arith.constant 0 : index
    %3 = vector.load %arg2[%c0_5, %c0_6] : memref<56x8xf32, #tpu.memory_space<vmem>>, vector<56x8xf32>
    %c0_7 = arith.constant 0 : index
    %c0_8 = arith.constant 0 : index
    %4 = vector.load %arg3[%c0_7, %c0_8] : memref<56x8xf32, #tpu.memory_space<vmem>>, vector<56x8xf32>
    %c0_9 = arith.constant 0 : index
    %c0_10 = arith.constant 0 : index
    %5 = vector.load %arg6[%c0_9, %c0_10] : memref<64x4xf32, #tpu.memory_space<vmem>>, vector<64x4xf32>
    %6 = vector.extract_strided_slice %0 {offsets = [0, 0], sizes = [1, 32], strides = [1, 1]} : vector<32x256xf32> to vector<1x32xf32>
    %7 = vector.extract_strided_slice %0 {offsets = [1, 0], sizes = [1, 32], strides = [1, 1]} : vector<32x256xf32> to vector<1x32xf32>
    %cst = arith.constant dense<0.000000e+00> : vector<8xf32>
    %8 = vector.multi_reduction <add>, %1, %cst [1] : vector<8x32xf32> to vector<8xf32>
    %9 = vector.shape_cast %8 : vector<8xf32> to vector<8x1xf32>
    %cst_11 = arith.constant 3.200000e+01 : f32
    %10 = vector.broadcast %cst_11 : f32 to vector<8x1xf32>
    %11 = arith.divf %9, %10 : vector<8x1xf32>
    %12 = vector.broadcast %11 : vector<8x1xf32> to vector<8x32xf32>
    %13 = arith.subf %1, %12 : vector<8x32xf32>
    %14 = arith.mulf %13, %13 : vector<8x32xf32>
    %cst_12 = arith.constant dense<0.000000e+00> : vector<8xf32>
    %15 = vector.multi_reduction <add>, %14, %cst_12 [1] : vector<8x32xf32> to vector<8xf32>
    %16 = vector.shape_cast %15 : vector<8xf32> to vector<8x1xf32>
    %cst_13 = arith.constant 3.200000e+01 : f32
    %17 = vector.broadcast %cst_13 : f32 to vector<8x1xf32>
    %18 = arith.divf %16, %17 : vector<8x1xf32>
    %19 = vector.broadcast %11 : vector<8x1xf32> to vector<8x32xf32>
    %20 = arith.subf %1, %19 : vector<8x32xf32>
    %cst_14 = arith.constant 9.99999974E-6 : f32
    %21 = vector.broadcast %cst_14 : f32 to vector<8x1xf32>
    %22 = arith.addf %18, %21 : vector<8x1xf32>
    %23 = math.rsqrt %22 : vector<8x1xf32>
    %24 = vector.broadcast %23 : vector<8x1xf32> to vector<8x32xf32>
    %25 = arith.mulf %20, %24 : vector<8x32xf32>
    %26 = vector.broadcast %6 : vector<1x32xf32> to vector<8x32xf32>
    %27 = arith.mulf %25, %26 : vector<8x32xf32>
    %28 = vector.broadcast %7 : vector<1x32xf32> to vector<8x32xf32>
    %29 = arith.addf %27, %28 : vector<8x32xf32>
    %c0_15 = arith.constant 0 : index
    %c0_16 = arith.constant 0 : index
    %30 = vector.load %arg7[%c0_15, %c0_16] : memref<32x384xf32, #tpu.memory_space<vmem>>, vector<32x256xf32>
    %cst_17 = arith.constant dense<0.000000e+00> : vector<8x256xf32>
    %31 = tpu.matmul %29, %30, %cst_17 {dimension_numbers = #tpu.dot_dimension_numbers<[1], [0], [0], [1], [0, 0, 1, 1], [], []>} : vector<8x32xf32>, vector<32x256xf32>, vector<8x256xf32> -> vector<8x256xf32>
    %32 = vector.extract_strided_slice %0 {offsets = [2, 0], sizes = [1, 256], strides = [1, 1]} : vector<32x256xf32> to vector<1x256xf32>
    %33 = vector.broadcast %32 : vector<1x256xf32> to vector<8x256xf32>
    %34 = arith.addf %31, %33 : vector<8x256xf32>
    %cst_18 = arith.constant dense<0.000000e+00> : vector<56x256xf32>
    %35 = tpu.matmul %3, %34, %cst_18 {dimension_numbers = #tpu.dot_dimension_numbers<[1], [0], [0], [1], [0, 0, 1, 1], [], []>} : vector<56x8xf32>, vector<8x256xf32>, vector<56x256xf32> -> vector<56x256xf32>
    %cst_19 = arith.constant dense<0.000000e+00> : vector<56x256xf32>
    %36 = tpu.matmul %4, %34, %cst_19 {dimension_numbers = #tpu.dot_dimension_numbers<[1], [0], [0], [1], [0, 0, 1, 1], [], []>} : vector<56x8xf32>, vector<8x256xf32>, vector<56x256xf32> -> vector<56x256xf32>
    %37 = vector.extract_strided_slice %35 {offsets = [0, 0], sizes = [56, 64], strides = [1, 1]} : vector<56x256xf32> to vector<56x64xf32>
    %38 = vector.extract_strided_slice %35 {offsets = [0, 192], sizes = [56, 32], strides = [1, 1]} : vector<56x256xf32> to vector<56x32xf32>
    %39 = vector.extract_strided_slice %36 {offsets = [0, 64], sizes = [56, 64], strides = [1, 1]} : vector<56x256xf32> to vector<56x64xf32>
    %40 = vector.extract_strided_slice %36 {offsets = [0, 128], sizes = [56, 64], strides = [1, 1]} : vector<56x256xf32> to vector<56x64xf32>
    %41 = vector.extract_strided_slice %36 {offsets = [0, 224], sizes = [56, 32], strides = [1, 1]} : vector<56x256xf32> to vector<56x32xf32>
    %42 = arith.subf %3, %4 : vector<56x8xf32>
    %cst_20 = arith.constant dense<0.000000e+00> : vector<56x3xf32>
    %43 = tpu.matmul %42, %2, %cst_20 {dimension_numbers = #tpu.dot_dimension_numbers<[1], [0], [0], [1], [0, 0, 1, 1], [], []>} : vector<56x8xf32>, vector<8x3xf32>, vector<56x3xf32> -> vector<56x3xf32>
    %c0_21 = arith.constant 0 : index
    %c0_22 = arith.constant 0 : index
    %44 = vector.load %arg4[%c0_21, %c0_22] : memref<56x8xf32, #tpu.memory_space<vmem>>, vector<56x8xf32>
    %cst_23 = arith.constant dense<0.000000e+00> : vector<56x3xf32>
    %45 = tpu.matmul %44, %2, %cst_23 {dimension_numbers = #tpu.dot_dimension_numbers<[1], [0], [0], [1], [0, 0, 1, 1], [], []>} : vector<56x8xf32>, vector<8x3xf32>, vector<56x3xf32> -> vector<56x3xf32>
    %46 = arith.mulf %43, %43 : vector<56x3xf32>
    %cst_24 = arith.constant dense<0.000000e+00> : vector<56xf32>
    %47 = vector.multi_reduction <add>, %46, %cst_24 [1] : vector<56x3xf32> to vector<56xf32>
    %48 = vector.shape_cast %47 : vector<56xf32> to vector<56x1xf32>
    %49 = vector.extract_strided_slice %0 {offsets = [3, 0], sizes = [1, 32], strides = [1, 1]} : vector<32x256xf32> to vector<1x32xf32>
    %50 = vector.broadcast %48 : vector<56x1xf32> to vector<56x32xf32>
    %51 = vector.broadcast %49 : vector<1x32xf32> to vector<56x32xf32>
    %52 = arith.mulf %50, %51 : vector<56x32xf32>
    %53 = vector.extract_strided_slice %0 {offsets = [4, 0], sizes = [1, 32], strides = [1, 1]} : vector<32x256xf32> to vector<1x32xf32>
    %54 = vector.broadcast %53 : vector<1x32xf32> to vector<56x32xf32>
    %55 = arith.addf %52, %54 : vector<56x32xf32>
    %56 = arith.negf %55 : vector<56x32xf32>
    %57 = math.exp %56 : vector<56x32xf32>
    %cst_25 = arith.constant 1.000000e+00 : f32
    %58 = vector.broadcast %cst_25 : f32 to vector<56x32xf32>
    %59 = arith.addf %58, %57 : vector<56x32xf32>
    %60 = arith.divf %58, %59 : vector<56x32xf32>
    %61 = arith.mulf %55, %60 : vector<56x32xf32>
    %c0_26 = arith.constant 0 : index
    %c1152 = arith.constant 1152 : index
    %62 = vector.load %arg8[%c0_26, %c1152] : memref<32x1280xf32, #tpu.memory_space<vmem>>, vector<32x4xf32>
    %cst_27 = arith.constant dense<0.000000e+00> : vector<56x4xf32>
    %63 = tpu.matmul %61, %62, %cst_27 {dimension_numbers = #tpu.dot_dimension_numbers<[1], [0], [0], [1], [0, 0, 1, 1], [], []>} : vector<56x32xf32>, vector<32x4xf32>, vector<56x4xf32> -> vector<56x4xf32>
    %64 = vector.extract_strided_slice %0 {offsets = [5, 0], sizes = [1, 4], strides = [1, 1]} : vector<32x256xf32> to vector<1x4xf32>
    %65 = vector.broadcast %64 : vector<1x4xf32> to vector<56x4xf32>
    %66 = arith.addf %63, %65 : vector<56x4xf32>
    %67 = arith.addf %38, %41 : vector<56x32xf32>
    %68 = vector.extract_strided_slice %0 {offsets = [6, 0], sizes = [1, 32], strides = [1, 1]} : vector<32x256xf32> to vector<1x32xf32>
    %69 = vector.broadcast %48 : vector<56x1xf32> to vector<56x32xf32>
    %70 = vector.broadcast %68 : vector<1x32xf32> to vector<56x32xf32>
    %71 = arith.mulf %69, %70 : vector<56x32xf32>
    %72 = arith.addf %67, %71 : vector<56x32xf32>
    %73 = arith.negf %72 : vector<56x32xf32>
    %74 = math.exp %73 : vector<56x32xf32>
    %cst_28 = arith.constant 1.000000e+00 : f32
    %75 = vector.broadcast %cst_28 : f32 to vector<56x32xf32>
    %76 = arith.addf %75, %74 : vector<56x32xf32>
    %77 = arith.divf %75, %76 : vector<56x32xf32>
    %78 = arith.mulf %72, %77 : vector<56x32xf32>
    %c0_29 = arith.constant 0 : index
    %c0_30 = arith.constant 0 : index
    %79 = vector.load %arg8[%c0_29, %c0_30] : memref<32x1280xf32, #tpu.memory_space<vmem>>, vector<32x32xf32>
    %cst_31 = arith.constant dense<0.000000e+00> : vector<56x32xf32>
    %80 = tpu.matmul %78, %79, %cst_31 {dimension_numbers = #tpu.dot_dimension_numbers<[1], [0], [0], [1], [0, 0, 1, 1], [], []>} : vector<56x32xf32>, vector<32x32xf32>, vector<56x32xf32> -> vector<56x32xf32>
    %81 = vector.extract_strided_slice %0 {offsets = [7, 0], sizes = [1, 32], strides = [1, 1]} : vector<32x256xf32> to vector<1x32xf32>
    %82 = vector.broadcast %81 : vector<1x32xf32> to vector<56x32xf32>
    %83 = arith.addf %80, %82 : vector<56x32xf32>
    %c0_32 = arith.constant 0 : index
    %c128 = arith.constant 128 : index
    %84 = vector.load %arg8[%c0_32, %c128] : memref<32x1280xf32, #tpu.memory_space<vmem>>, vector<32x256xf32>
    %cst_33 = arith.constant dense<0.000000e+00> : vector<56x256xf32>
    %85 = tpu.matmul %83, %84, %cst_33 {dimension_numbers = #tpu.dot_dimension_numbers<[1], [0], [0], [1], [0, 0, 1, 1], [], []>} : vector<56x32xf32>, vector<32x256xf32>, vector<56x256xf32> -> vector<56x256xf32>
    %86 = vector.extract_strided_slice %85 {offsets = [0, 0], sizes = [56, 32], strides = [1, 1]} : vector<56x256xf32> to vector<56x32xf32>
    %87 = vector.extract_strided_slice %85 {offsets = [0, 128], sizes = [56, 4], strides = [1, 1]} : vector<56x256xf32> to vector<56x4xf32>
    %88 = vector.extract_strided_slice %0 {offsets = [8, 0], sizes = [1, 4], strides = [1, 1]} : vector<32x256xf32> to vector<1x4xf32>
    %89 = vector.broadcast %88 : vector<1x4xf32> to vector<56x4xf32>
    %90 = arith.addf %87, %89 : vector<56x4xf32>
    %91 = arith.mulf %37, %39 : vector<56x64xf32>
    %cst_34 = arith.constant dense<0.000000e+00> : vector<56x4xf32>
    %92 = tpu.matmul %91, %5, %cst_34 {dimension_numbers = #tpu.dot_dimension_numbers<[1], [0], [0], [1], [0, 0, 1, 1], [], []>} : vector<56x64xf32>, vector<64x4xf32>, vector<56x4xf32> -> vector<56x4xf32>
    %cst_35 = arith.constant 2.500000e-01 : f32
    %93 = vector.broadcast %cst_35 : f32 to vector<56x4xf32>
    %94 = arith.mulf %92, %93 : vector<56x4xf32>
    %95 = arith.addf %94, %66 : vector<56x4xf32>
    %96 = arith.addf %95, %90 : vector<56x4xf32>
    %c0_36 = arith.constant 0 : index
    %c0_37 = arith.constant 0 : index
    %97 = vector.load %arg5[%c0_36, %c0_37] : memref<56x1xf32, #tpu.memory_space<vmem>>, vector<56x1xf32>
    %98 = vector.broadcast %97 : vector<56x1xf32> to vector<56x4xf32>
    %99 = arith.addf %96, %98 : vector<56x4xf32>
    %cst_38 = arith.constant dense<0xFF800000> : vector<4xf32>
    %100 = vector.multi_reduction <maximumf>, %99, %cst_38 [0] : vector<56x4xf32> to vector<4xf32>
    %101 = vector.shape_cast %100 : vector<4xf32> to vector<1x4xf32>
    %102 = vector.broadcast %101 : vector<1x4xf32> to vector<56x4xf32>
    %103 = arith.subf %99, %102 : vector<56x4xf32>
    %104 = math.exp %103 : vector<56x4xf32>
    %cst_39 = arith.constant dense<0.000000e+00> : vector<8x4xf32>
    %105 = tpu.matmul %3, %104, %cst_39 {dimension_numbers = #tpu.dot_dimension_numbers<[0], [0], [1], [1], [0, 1, 1, 1], [], []>} : vector<56x8xf32>, vector<56x4xf32>, vector<8x4xf32> -> vector<8x4xf32>
    %cst_40 = arith.constant dense<0.000000e+00> : vector<56x4xf32>
    %106 = tpu.matmul %3, %105, %cst_40 {dimension_numbers = #tpu.dot_dimension_numbers<[1], [0], [0], [1], [0, 0, 1, 1], [], []>} : vector<56x8xf32>, vector<8x4xf32>, vector<56x4xf32> -> vector<56x4xf32>
    %cst_41 = arith.constant 9.99999993E-9 : f32
    %107 = vector.broadcast %cst_41 : f32 to vector<56x4xf32>
    %108 = arith.addf %106, %107 : vector<56x4xf32>
    %109 = tpu.reciprocal %108 {approx = true} : vector<56x4xf32> -> vector<56x4xf32>
    %110 = arith.mulf %104, %109 : vector<56x4xf32>
    %cst_42 = arith.constant dense<0.000000e+00> : vector<56xf32>
    %111 = vector.multi_reduction <add>, %110, %cst_42 [1] : vector<56x4xf32> to vector<56xf32>
    %112 = vector.shape_cast %111 : vector<56xf32> to vector<56x1xf32>
    %cst_43 = arith.constant 4.000000e+00 : f32
    %113 = vector.broadcast %cst_43 : f32 to vector<56x1xf32>
    %114 = arith.divf %112, %113 : vector<56x1xf32>
    %115 = vector.extract_strided_slice %0 {offsets = [9, 0], sizes = [1, 32], strides = [1, 1]} : vector<32x256xf32> to vector<1x32xf32>
    %116 = vector.broadcast %114 : vector<56x1xf32> to vector<56x32xf32>
    %117 = vector.broadcast %115 : vector<1x32xf32> to vector<56x32xf32>
    %118 = arith.mulf %116, %117 : vector<56x32xf32>
    %119 = arith.addf %86, %118 : vector<56x32xf32>
    %120 = vector.extract_strided_slice %0 {offsets = [22, 0], sizes = [3, 32], strides = [1, 1]} : vector<32x256xf32> to vector<3x32xf32>
    %cst_44 = arith.constant dense<0.000000e+00> : vector<56x32xf32>
    %121 = tpu.matmul %43, %120, %cst_44 {dimension_numbers = #tpu.dot_dimension_numbers<[1], [0], [0], [1], [0, 0, 1, 1], [], []>} : vector<56x3xf32>, vector<3x32xf32>, vector<56x32xf32> -> vector<56x32xf32>
    %122 = arith.addf %119, %121 : vector<56x32xf32>
    %123 = vector.extract_strided_slice %0 {offsets = [10, 0], sizes = [1, 32], strides = [1, 1]} : vector<32x256xf32> to vector<1x32xf32>
    %124 = vector.broadcast %123 : vector<1x32xf32> to vector<56x32xf32>
    %125 = arith.addf %122, %124 : vector<56x32xf32>
    %126 = arith.negf %125 : vector<56x32xf32>
    %127 = math.exp %126 : vector<56x32xf32>
    %cst_45 = arith.constant 1.000000e+00 : f32
    %128 = vector.broadcast %cst_45 : f32 to vector<56x32xf32>
    %129 = arith.addf %128, %127 : vector<56x32xf32>
    %130 = arith.divf %128, %129 : vector<56x32xf32>
    %131 = arith.mulf %125, %130 : vector<56x32xf32>
    %c0_46 = arith.constant 0 : index
    %c384 = arith.constant 384 : index
    %132 = vector.load %arg8[%c0_46, %c384] : memref<32x1280xf32, #tpu.memory_space<vmem>>, vector<32x32xf32>
    %cst_47 = arith.constant dense<0.000000e+00> : vector<56x32xf32>
    %133 = tpu.matmul %131, %132, %cst_47 {dimension_numbers = #tpu.dot_dimension_numbers<[1], [0], [0], [1], [0, 0, 1, 1], [], []>} : vector<56x32xf32>, vector<32x32xf32>, vector<56x32xf32> -> vector<56x32xf32>
    %134 = vector.extract_strided_slice %0 {offsets = [11, 0], sizes = [1, 32], strides = [1, 1]} : vector<32x256xf32> to vector<1x32xf32>
    %135 = vector.broadcast %134 : vector<1x32xf32> to vector<56x32xf32>
    %136 = arith.addf %133, %135 : vector<56x32xf32>
    %c0_48 = arith.constant 0 : index
    %c512 = arith.constant 512 : index
    %137 = vector.load %arg8[%c0_48, %c512] : memref<32x1280xf32, #tpu.memory_space<vmem>>, vector<32x384xf32>
    %cst_49 = arith.constant dense<0.000000e+00> : vector<56x384xf32>
    %138 = tpu.matmul %136, %137, %cst_49 {dimension_numbers = #tpu.dot_dimension_numbers<[1], [0], [0], [1], [0, 0, 1, 1], [], []>} : vector<56x32xf32>, vector<32x384xf32>, vector<56x384xf32> -> vector<56x384xf32>
    %139 = vector.extract_strided_slice %138 {offsets = [0, 0], sizes = [56, 4], strides = [1, 1]} : vector<56x384xf32> to vector<56x4xf32>
    %140 = vector.extract_strided_slice %0 {offsets = [12, 0], sizes = [1, 4], strides = [1, 1]} : vector<32x256xf32> to vector<1x4xf32>
    %141 = vector.broadcast %140 : vector<1x4xf32> to vector<56x4xf32>
    %142 = arith.addf %139, %141 : vector<56x4xf32>
    %143 = arith.negf %142 : vector<56x4xf32>
    %144 = math.exp %143 : vector<56x4xf32>
    %cst_50 = arith.constant 1.000000e+00 : f32
    %145 = vector.broadcast %cst_50 : f32 to vector<56x4xf32>
    %146 = arith.addf %145, %144 : vector<56x4xf32>
    %147 = arith.divf %145, %146 : vector<56x4xf32>
    %148 = vector.extract_strided_slice %138 {offsets = [0, 128], sizes = [56, 32], strides = [1, 1]} : vector<56x384xf32> to vector<56x32xf32>
    %149 = vector.extract_strided_slice %0 {offsets = [13, 0], sizes = [1, 32], strides = [1, 1]} : vector<32x256xf32> to vector<1x32xf32>
    %150 = vector.broadcast %149 : vector<1x32xf32> to vector<56x32xf32>
    %151 = arith.addf %148, %150 : vector<56x32xf32>
    %152 = arith.negf %151 : vector<56x32xf32>
    %153 = math.exp %152 : vector<56x32xf32>
    %cst_51 = arith.constant 1.000000e+00 : f32
    %154 = vector.broadcast %cst_51 : f32 to vector<56x32xf32>
    %155 = arith.addf %154, %153 : vector<56x32xf32>
    %156 = arith.divf %154, %155 : vector<56x32xf32>
    %157 = arith.mulf %151, %156 : vector<56x32xf32>
    %158 = vector.extract_strided_slice %138 {offsets = [0, 256], sizes = [56, 32], strides = [1, 1]} : vector<56x384xf32> to vector<56x32xf32>
    %159 = vector.extract_strided_slice %0 {offsets = [14, 0], sizes = [1, 32], strides = [1, 1]} : vector<32x256xf32> to vector<1x32xf32>
    %160 = vector.broadcast %159 : vector<1x32xf32> to vector<56x32xf32>
    %161 = arith.addf %158, %160 : vector<56x32xf32>
    %162 = arith.negf %161 : vector<56x32xf32>
    %163 = math.exp %162 : vector<56x32xf32>
    %cst_52 = arith.constant 1.000000e+00 : f32
    %164 = vector.broadcast %cst_52 : f32 to vector<56x32xf32>
    %165 = arith.addf %164, %163 : vector<56x32xf32>
    %166 = arith.divf %164, %165 : vector<56x32xf32>
    %167 = arith.mulf %161, %166 : vector<56x32xf32>
    %c0_53 = arith.constant 0 : index
    %c896 = arith.constant 896 : index
    %168 = vector.load %arg8[%c0_53, %c896] : memref<32x1280xf32, #tpu.memory_space<vmem>>, vector<32x4xf32>
    %cst_54 = arith.constant dense<0.000000e+00> : vector<56x4xf32>
    %169 = tpu.matmul %157, %168, %cst_54 {dimension_numbers = #tpu.dot_dimension_numbers<[1], [0], [0], [1], [0, 0, 1, 1], [], []>} : vector<56x32xf32>, vector<32x4xf32>, vector<56x4xf32> -> vector<56x4xf32>
    %170 = vector.extract_strided_slice %0 {offsets = [15, 0], sizes = [1, 4], strides = [1, 1]} : vector<32x256xf32> to vector<1x4xf32>
    %171 = vector.broadcast %170 : vector<1x4xf32> to vector<56x4xf32>
    %172 = arith.addf %169, %171 : vector<56x4xf32>
    %c0_55 = arith.constant 0 : index
    %c1024 = arith.constant 1024 : index
    %173 = vector.load %arg8[%c0_55, %c1024] : memref<32x1280xf32, #tpu.memory_space<vmem>>, vector<32x4xf32>
    %cst_56 = arith.constant dense<0.000000e+00> : vector<56x4xf32>
    %174 = tpu.matmul %167, %173, %cst_56 {dimension_numbers = #tpu.dot_dimension_numbers<[1], [0], [0], [1], [0, 0, 1, 1], [], []>} : vector<56x32xf32>, vector<32x4xf32>, vector<56x4xf32> -> vector<56x4xf32>
    %175 = vector.extract_strided_slice %0 {offsets = [16, 0], sizes = [1, 4], strides = [1, 1]} : vector<32x256xf32> to vector<1x4xf32>
    %176 = vector.broadcast %175 : vector<1x4xf32> to vector<56x4xf32>
    %177 = arith.addf %174, %176 : vector<56x4xf32>
    %178 = arith.mulf %147, %172 : vector<56x4xf32>
    %cst_57 = arith.constant dense<0.000000e+00> : vector<56xf32>
    %179 = vector.multi_reduction <add>, %178, %cst_57 [1] : vector<56x4xf32> to vector<56xf32>
    %180 = vector.shape_cast %179 : vector<56xf32> to vector<56x1xf32>
    %cst_58 = arith.constant dense<0.000000e+00> : vector<56xf32>
    %181 = vector.multi_reduction <add>, %177, %cst_58 [1] : vector<56x4xf32> to vector<56xf32>
    %182 = vector.shape_cast %181 : vector<56xf32> to vector<56x1xf32>
    %183 = vector.extract_strided_slice %43 {offsets = [0, 0], sizes = [56, 1], strides = [1, 1]} : vector<56x3xf32> to vector<56x1xf32>
    %184 = vector.extract_strided_slice %43 {offsets = [0, 1], sizes = [56, 1], strides = [1, 1]} : vector<56x3xf32> to vector<56x1xf32>
    %185 = vector.extract_strided_slice %43 {offsets = [0, 2], sizes = [56, 1], strides = [1, 1]} : vector<56x3xf32> to vector<56x1xf32>
    %186 = vector.extract_strided_slice %45 {offsets = [0, 0], sizes = [56, 1], strides = [1, 1]} : vector<56x3xf32> to vector<56x1xf32>
    %187 = vector.extract_strided_slice %45 {offsets = [0, 1], sizes = [56, 1], strides = [1, 1]} : vector<56x3xf32> to vector<56x1xf32>
    %188 = vector.extract_strided_slice %45 {offsets = [0, 2], sizes = [56, 1], strides = [1, 1]} : vector<56x3xf32> to vector<56x1xf32>
    %189 = arith.mulf %184, %188 : vector<56x1xf32>
    %190 = arith.mulf %185, %187 : vector<56x1xf32>
    %191 = arith.subf %189, %190 : vector<56x1xf32>
    %192 = arith.mulf %185, %186 : vector<56x1xf32>
    %193 = arith.mulf %183, %188 : vector<56x1xf32>
    %194 = arith.subf %192, %193 : vector<56x1xf32>
    %195 = arith.mulf %183, %187 : vector<56x1xf32>
    %196 = arith.mulf %184, %186 : vector<56x1xf32>
    %197 = arith.subf %195, %196 : vector<56x1xf32>
    %198 = tpu.concatenate %191, %194, %197 in 1 : vector<56x1xf32>, vector<56x1xf32>, vector<56x1xf32> -> vector<56x3xf32>
    %199 = vector.broadcast %180 : vector<56x1xf32> to vector<56x3xf32>
    %200 = arith.mulf %199, %43 : vector<56x3xf32>
    %201 = vector.broadcast %182 : vector<56x1xf32> to vector<56x3xf32>
    %202 = arith.mulf %201, %198 : vector<56x3xf32>
    %203 = arith.addf %200, %202 : vector<56x3xf32>
    %cst_59 = arith.constant dense<0.000000e+00> : vector<56x64xf32>
    %204 = tpu.matmul %110, %5, %cst_59 {dimension_numbers = #tpu.dot_dimension_numbers<[1], [1], [0], [0], [0, 0, 1, 0], [], []>} : vector<56x4xf32>, vector<64x4xf32>, vector<56x64xf32> -> vector<56x64xf32>
    %205 = arith.mulf %204, %40 : vector<56x64xf32>
    %cst_60 = arith.constant dense<0.000000e+00> : vector<8x64xf32>
    %206 = tpu.matmul %3, %205, %cst_60 {dimension_numbers = #tpu.dot_dimension_numbers<[0], [0], [1], [1], [0, 1, 1, 1], [], []>} : vector<56x8xf32>, vector<56x64xf32>, vector<8x64xf32> -> vector<8x64xf32>
    %cst_61 = arith.constant dense<0.000000e+00> : vector<8x3xf32>
    %207 = tpu.matmul %3, %203, %cst_61 {dimension_numbers = #tpu.dot_dimension_numbers<[0], [0], [1], [1], [0, 1, 1, 1], [], []>} : vector<56x8xf32>, vector<56x3xf32>, vector<8x3xf32> -> vector<8x3xf32>
    %c0_62 = arith.constant 0 : index
    %c0_63 = arith.constant 0 : index
    %208 = vector.load %arg9[%c0_62, %c0_63] : memref<64x32xf32, #tpu.memory_space<vmem>>, vector<64x32xf32>
    %cst_64 = arith.constant dense<0.000000e+00> : vector<8x32xf32>
    %209 = tpu.matmul %206, %208, %cst_64 {dimension_numbers = #tpu.dot_dimension_numbers<[1], [0], [0], [1], [0, 0, 1, 1], [], []>} : vector<8x64xf32>, vector<64x32xf32>, vector<8x32xf32> -> vector<8x32xf32>
    %210 = vector.extract_strided_slice %0 {offsets = [17, 0], sizes = [1, 32], strides = [1, 1]} : vector<32x256xf32> to vector<1x32xf32>
    %211 = vector.broadcast %210 : vector<1x32xf32> to vector<8x32xf32>
    %212 = arith.addf %209, %211 : vector<8x32xf32>
    %213 = arith.addf %1, %212 : vector<8x32xf32>
    %214 = arith.addf %2, %207 : vector<8x3xf32>
    %215 = vector.extract_strided_slice %0 {offsets = [18, 0], sizes = [1, 32], strides = [1, 1]} : vector<32x256xf32> to vector<1x32xf32>
    %216 = vector.extract_strided_slice %0 {offsets = [19, 0], sizes = [1, 32], strides = [1, 1]} : vector<32x256xf32> to vector<1x32xf32>
    %cst_65 = arith.constant dense<0.000000e+00> : vector<8xf32>
    %217 = vector.multi_reduction <add>, %213, %cst_65 [1] : vector<8x32xf32> to vector<8xf32>
    %218 = vector.shape_cast %217 : vector<8xf32> to vector<8x1xf32>
    %cst_66 = arith.constant 3.200000e+01 : f32
    %219 = vector.broadcast %cst_66 : f32 to vector<8x1xf32>
    %220 = arith.divf %218, %219 : vector<8x1xf32>
    %221 = vector.broadcast %220 : vector<8x1xf32> to vector<8x32xf32>
    %222 = arith.subf %213, %221 : vector<8x32xf32>
    %223 = arith.mulf %222, %222 : vector<8x32xf32>
    %cst_67 = arith.constant dense<0.000000e+00> : vector<8xf32>
    %224 = vector.multi_reduction <add>, %223, %cst_67 [1] : vector<8x32xf32> to vector<8xf32>
    %225 = vector.shape_cast %224 : vector<8xf32> to vector<8x1xf32>
    %cst_68 = arith.constant 3.200000e+01 : f32
    %226 = vector.broadcast %cst_68 : f32 to vector<8x1xf32>
    %227 = arith.divf %225, %226 : vector<8x1xf32>
    %228 = vector.broadcast %220 : vector<8x1xf32> to vector<8x32xf32>
    %229 = arith.subf %213, %228 : vector<8x32xf32>
    %cst_69 = arith.constant 9.99999974E-6 : f32
    %230 = vector.broadcast %cst_69 : f32 to vector<8x1xf32>
    %231 = arith.addf %227, %230 : vector<8x1xf32>
    %232 = math.rsqrt %231 : vector<8x1xf32>
    %233 = vector.broadcast %232 : vector<8x1xf32> to vector<8x32xf32>
    %234 = arith.mulf %229, %233 : vector<8x32xf32>
    %235 = vector.broadcast %215 : vector<1x32xf32> to vector<8x32xf32>
    %236 = arith.mulf %234, %235 : vector<8x32xf32>
    %237 = vector.broadcast %216 : vector<1x32xf32> to vector<8x32xf32>
    %238 = arith.addf %236, %237 : vector<8x32xf32>
    %c0_70 = arith.constant 0 : index
    %c256 = arith.constant 256 : index
    %239 = vector.load %arg7[%c0_70, %c256] : memref<32x384xf32, #tpu.memory_space<vmem>>, vector<32x64xf32>
    %cst_71 = arith.constant dense<0.000000e+00> : vector<8x64xf32>
    %240 = tpu.matmul %238, %239, %cst_71 {dimension_numbers = #tpu.dot_dimension_numbers<[1], [0], [0], [1], [0, 0, 1, 1], [], []>} : vector<8x32xf32>, vector<32x64xf32>, vector<8x64xf32> -> vector<8x64xf32>
    %241 = vector.extract_strided_slice %0 {offsets = [20, 0], sizes = [1, 64], strides = [1, 1]} : vector<32x256xf32> to vector<1x64xf32>
    %242 = vector.broadcast %241 : vector<1x64xf32> to vector<8x64xf32>
    %243 = arith.addf %240, %242 : vector<8x64xf32>
    %244 = arith.negf %243 : vector<8x64xf32>
    %245 = math.exp %244 : vector<8x64xf32>
    %cst_72 = arith.constant 1.000000e+00 : f32
    %246 = vector.broadcast %cst_72 : f32 to vector<8x64xf32>
    %247 = arith.addf %246, %245 : vector<8x64xf32>
    %248 = arith.divf %246, %247 : vector<8x64xf32>
    %249 = arith.mulf %243, %248 : vector<8x64xf32>
    %c0_73 = arith.constant 0 : index
    %c0_74 = arith.constant 0 : index
    %250 = vector.load %arg10[%c0_73, %c0_74] : memref<64x32xf32, #tpu.memory_space<vmem>>, vector<64x32xf32>
    %cst_75 = arith.constant dense<0.000000e+00> : vector<8x32xf32>
    %251 = tpu.matmul %249, %250, %cst_75 {dimension_numbers = #tpu.dot_dimension_numbers<[1], [0], [0], [1], [0, 0, 1, 1], [], []>} : vector<8x64xf32>, vector<64x32xf32>, vector<8x32xf32> -> vector<8x32xf32>
    %252 = arith.addf %213, %251 : vector<8x32xf32>
    %253 = vector.extract_strided_slice %0 {offsets = [21, 0], sizes = [1, 32], strides = [1, 1]} : vector<32x256xf32> to vector<1x32xf32>
    %254 = vector.broadcast %253 : vector<1x32xf32> to vector<8x32xf32>
    %255 = arith.addf %252, %254 : vector<8x32xf32>
    %cst_76 = arith.constant 0.000000e+00 : f32
    %256 = vector.broadcast %cst_76 : f32 to vector<8x128xf32>
    %c0_77 = arith.constant 0 : index
    %c0_78 = arith.constant 0 : index
    %257 = vector.load %arg12[%c0_77, %c0_78] : memref<8x128xf32, #tpu.memory_space<vmem>>, vector<8x128xf32>
    tpu.vector_store %arg12[%c0_77, %c0_78], %256 {strides = array<i32>} : memref<8x128xf32, #tpu.memory_space<vmem>>, vector<8x128xf32>,
    %c0_79 = arith.constant 0 : index
    %c0_80 = arith.constant 0 : index
    %258 = vector.load %arg12[%c0_79, %c0_80] : memref<8x128xf32, #tpu.memory_space<vmem>>, vector<8x32xf32>
    tpu.vector_store %arg12[%c0_79, %c0_80], %255 {strides = array<i32>} : memref<8x128xf32, #tpu.memory_space<vmem>>, vector<8x32xf32>,
    %c0_81 = arith.constant 0 : index
    %c32 = arith.constant 32 : index
    %259 = vector.load %arg12[%c0_81, %c32] : memref<8x128xf32, #tpu.memory_space<vmem>>, vector<8x3xf32>
    tpu.vector_store %arg12[%c0_81, %c32], %214 {strides = array<i32>} : memref<8x128xf32, #tpu.memory_space<vmem>>, vector<8x3xf32>,
    return
  }
}

</mosaic_0001>

<bundles_post_ra>
// kernel: tpu_custom_call.1
= control target key start
LH: loop header
LB: loop body
LE: loop exit
PB: predicated region body
PF: predicated region fallthrough
CT: control target
= control target key end

     0   :  { %17 = vsyncpa [#allocation3], 0  ;;  %s6768_s0 = inlined_call_operand.hbm [shape: f32[8,32], index: 0, kind: input, shape index: {}]   ;;  %s6769_s1 = inlined_call_operand.vmem [shape: f32[8,3], index: 1, kind: input, shape index: {}]   ;;  %s6770_s2 = inlined_call_operand.vmem [shape: f32[56,8], index: 2, kind: input, shape index: {}]   ;;  %s6771_s3 = inlined_call_operand.vmem [shape: f32[56,8], index: 3, kind: input, shape index: {}]   ;;  %s6772_s4 = inlined_call_operand.vmem [shape: f32[56,8], index: 4, kind: input, shape index: {}]   ;;  %s6773_s5 = inlined_call_operand.vmem [shape: f32[56,1], index: 5, kind: input, shape index: {}]   ;;  %s6774_s6 = inlined_call_operand.vmem [shape: f32[64,4], index: 6, kind: input, shape index: {}]   ;;  %s6775_s7 = inlined_call_operand.vmem [shape: f32[32,384], index: 7, kind: input, shape index: {}]   ;;  %s6776_s8 = inlined_call_operand.vmem [shape: f32[32,1280], index: 8, kind: input, shape index: {}]   ;;  %s6777_s9 = inlined_call_operand.vmem [shape: f32[64,32], index: 9, kind: input, shape index: {}]   ;;  %s6778_s10 = inlined_call_operand.vmem [shape: f32[64,32], index: 10, kind: input, shape index: {}]   ;;  %s6779_s11 = inlined_call_operand.vmem [shape: f32[32,256], index: 11, kind: input, shape index: {}]   ;;  %s6780_s12 = inlined_call_operand.hbm [shape: f32[8,128], index: 12, kind: output, shape index: {}]  }
   0x1   :  { %18 = vsyncpa [#allocation4], 0  ;;  %s5059_s21 = smov [#allocation2]   ;;  %s5011_s25 = scalar_lea.hbm %s6768_s0, 128 }
   0x2   :  { %s25_s22 = sshll.u32 %s5059_s21, 4  ;;  %p5012_p0 = scmp.ne.s32.totalorder %s6768_s0, %s5011_s25  ;;  %s26_s22 = int_to_ptr.vmem [resolvable:$true] %s25_s22 }
   0x3   :  { %p5015_p1 = scmp.lt.u32.totalorder %s5011_s25, %s6768_s0 }
   0x5   :  { %p5017_p2 = pnand %p5015_p1, %p5012_p0 }
   0x7   :  { %5020 = shalt.err (!%p5017_p2)
}
   0x8   :  { %s5021_s30 = scalar_lea.vmem %s26_s22, 128  ;;  %p5026_p4 = scmp.lt.s32.totalorder %s26_s22, %s26_s22 }
   0x9   :  { %p5022_p3 = scmp.ne.s32.totalorder %s26_s22, %s5021_s30  ;;  %p5027_p5 = scmp.lt.s32.totalorder %s5021_s30, %s5021_s30 }
   0xb   :  { %p5028_p6 = por %p5027_p5, %p5026_p4 }
   0xd   :  { %p5029_p7 = pnand %p5028_p6, %p5022_p3 }
   0xf   :  { %5032 = shalt.err (!%p5029_p7)
}
  0x10   :  { %28 = dma.hbm_to_vmem [thread:$0]  %s6768_s0, 128, %s26_s22, [#allocation3]  }
  0x11   :  { %5055 = dma.done.wait [#allocation3], 128  }
  0x12   :  { %5056 = vsyncadd [#allocation3], 4294967168  ;;  %vm83_vm0 = vcmask 261120   ;;  %v59_v0 = vld [vmem:[#allocation2] sm:$0xff]  ;;  %v109_v7 = vld [vmem:[%s6775_s7 + $0x8] sm:$0xff]  ;;  %v6784_v14 = vmov 0.0   ;;  %v98_v22 = vlaneseq }
  0x13   :  { %v84_v1 = vsel %vm83_vm0, %v59_v0, 0.0  ;;  %v111_v8 = vld [vmem:[%s6775_s7 + $0x20] sm:$0xff]  ;;  %v110_v11 = vld [vmem:[%s6775_s7 + $0x18] sm:$0xff]  ;;  %v115_v13 = vld [vmem:[%s6775_s7 + $0x50] sm:$0xff]  ;;  %191 = vmatprep.mubr.f32.mxu0 %v6784_v14  ;;  %3821 = vst [vmem:[#allocation5] sm:$0xff] %v6784_v14  ;;  %290 = vmatprep.mubr.f32.mxu1 %v6784_v14  ;;  %vm198_vm1 = vcmask 64512  }
  0x14   :  { %85 = vadd.xlane.f32.xlu0 %v84_v1  ;;  %v108_v9 = vld [vmem:[%s6775_s7] sm:$0xff]  ;;  %v4630_v10 = vpack.c.bf16 %v111_v8, %v109_v7  ;;  %v113_v12 = vld [vmem:[%s6775_s7 + $0x38] sm:$0xff]  ;;  %v112_v17 = vld [vmem:[%s6775_s7 + $0x30] sm:$0xff]  ;;  %v5178_v24 = vshrl.u32 %v98_v22, 7  ;;  %vm5061_vm2 = vmmov 0   ;;  %vm718_vm3 = vcmask 23552  }
  0x15   :  { %v4632_v15 = vpack.c.bf16 %v110_v11, %v108_v9  ;;  %v4634_v16 = vpack.c.bf16 %v115_v13, %v113_v12  ;;  %v114_v18 = vld [vmem:[%s6775_s7 + $0x48] sm:$0xff]  ;;  %v5186_v26 = vld [vmem:[%s6779_s11] sm:$0xff]  ;;  %v5227_v45 = vld [vmem:[%s6770_s2 + $0x10] sm:$0xff]  ;;  %vm1395_vm4 = vcmask 523264   ;;  %s5067_s20 = smov 126   ;;  %s5068_s27 = smov 127  }
  0x16   :  { %4631 = vmatprep.subr.bf16.mxu0 %v4630_v10  ;;  %v4636_v19 = vpack.c.bf16 %v114_v18, %v112_v17  ;;  %v5181_v25 = vsub.s32 0, %v5178_v24  ;;  %v5189_v27 = vsub.s32 1, %v5178_v24  ;;  %v5198_v34 = vsub.s32 2, %v5178_v24  ;;  %v55_v35 = vld [vmem:[%s6779_s11 + $0x8] sm:$0xff]  ;;  %v5214_v43 = vld [vmem:[%s6770_s2] sm:$0xff]  ;;  %v5241_v47 = vld [vmem:[%s6770_s2 + $0x18] sm:$0xff] }
  0x17   :  { %4633 = vmatpush1.bf16.msra.mxu0 %v4632_v15  ;;  %v5209_v42 = vld [vmem:[%s6770_s2 + $0x8] sm:$0xff]  ;;  %v60_v44 = vld [vmem:[%s6769_s1] sm:$0xff]  ;;  %v70_v50 = vld [vmem:[%s6771_s3 + $0x10] sm:$0xff]  ;;  %s5069_s14 = smov 2   ;;  %vm1587_vm5 = vcmask 31744   ;;  %vm1897_vm6 = vcmask 1041408  }
  0x18   :  { %4635 = vmatprep.subr.bf16.mxu0 %v4634_v16  ;;  %v101_v28 = vrot.slane %v5186_v26, %v5181_v25  ;;  %v106_v31 = vrot.slane %v5186_v26, %v5189_v27  ;;  %6800 = vst [vmem:[#allocation8_spill] sm:$0xff] %v5198_v34  ;;  %v123_v36 = vrot.slane %v55_v35, %v5198_v34  ;;  %v68_v46 = vld [vmem:[%s6771_s3] sm:$0xff]  ;;  %v69_v48 = vld [vmem:[%s6771_s3 + $0x8] sm:$0xff]  ;;  %v71_v52 = vld [vmem:[%s6771_s3 + $0x18] sm:$0xff]  ;;  %vm1660_vm7 = vcmask 457728   ;;  %s5070_s26 = smov 32  }
  0x19   :  { %v119_v37 = vrot.slane %v5186_v26, %v5198_v34  ;;  %v5254_v49 = vld [vmem:[%s6770_s2 + $0x20] sm:$0xff]  ;;  %v5267_v51 = vld [vmem:[%s6770_s2 + $0x28] sm:$0xff]  ;;  %v5280_v53 = vld [vmem:[%s6770_s2 + $0x30] sm:$0xff]  ;;  %v455_v54 = vsub.f32 %v5214_v43, %v68_v46  ;;  %v456_v56 = vsub.f32 %v5209_v42, %v69_v48  ;;  %v457_v58 = vsub.f32 %v5227_v45, %v70_v50 }
  0x1a   :  { %v72_v55 = vld [vmem:[%s6771_s3 + $0x20] sm:$0xff]  ;;  %v73_v57 = vld [vmem:[%s6771_s3 + $0x28] sm:$0xff]  ;;  %v74_v59 = vld [vmem:[%s6771_s3 + $0x30] sm:$0xff]  ;;  %v458_v60 = vsub.f32 %v5241_v47, %v71_v52  ;;  %s5062_s3 = smov 96   ;;  %vm1922_vm8 = vcmask 1042432   ;;  %vm3207_vm10 = vcmask 7168  }
  0x1b   :  { %4637 = vmatpush1.bf16.msra.mxu0 %v4636_v19  ;;  %v459_v61 = vsub.f32 %v5254_v49, %v72_v55  ;;  %v460_v62 = vsub.f32 %v5267_v51, %v73_v57  ;;  %v461_v63 = vsub.f32 %v5280_v53, %v74_v59  ;;  %vm6355_vm9 = vmpackc.low %vm1587_vm5, %vm1587_vm5  ;;  %vm3215_vm11 = vcmask 15360  }
  0x1c   :  { %vm3827_vm12 = vcmask 285952  }
  0xa1   :  { %v86_v2 = vpop.xlane.xlu0 %85 }
  0xa2   :  { %v88_v3 = vmul.f32 0.03125, %v86_v2 }
  0xa4   :  { %v89_v4 = vsub.f32 %v59_v0, %v88_v3 }
  0xa6   :  { %v90_v5 = vmul.f32 %v89_v4, %v89_v4 }
  0xa8   :  { %v91_v6 = vsel %vm83_vm0, %v90_v5, 0.0 }
  0xa9   :  { %92 = vadd.xlane.f32.xlu0 %v91_v6 }
 0x136   :  { %v93_v20 = vpop.xlane.xlu0 %92 }
 0x137   :  { %v94_v21 = vmul.f32 0.03125, %v93_v20 }
 0x139   :  { %v95_v23 = vadd.f32 1e-05, %v94_v21 }
 0x13b   :  { %4792 = vrsqrt.f32 %v95_v23 }
 0x145   :  { %v4793_v29 = vpop.eup %4792 }
 0x146   :  { %v97_v30 = vmul.f32 %v4793_v29, %v89_v4 }
 0x148   :  { %v102_v32 = vmul.f32 %v101_v28, %v97_v30 }
 0x14a   :  { %v107_v33 = vadd.f32 %v106_v31, %v102_v32 }
 0x14c   :  { %3844 = vmatmul.mubr.msk.f32.vlgmr.msra.gmra.mrb[0].mxu0 %vm83_vm0, %v107_v33 }
 0x14d   :  { %284 = vmatprep.mubr.f32.mxu0 %v6784_v14 }
 0x21f   :  { %v193_v38 = vpop.f32.mrb[0].mxu0 }
 0x220   :  { %v195_v39 = vpop.f32.mrb[1].mxu0  ;;  %v194_v41 = vadd.f32 %v193_v38, %v119_v37 }
 0x221   :  { %v196_v40 = vadd.f32 %v195_v39, %v123_v36 }
 0x223   :  { %220 = vmatprep.subr.mxu0 %v196_v40  ;;  %4775 = vmatprep.subr.mxu1 %v196_v40 }
 0x224   :  { %221 = vmatpush1.msra.mxu0 %v194_v41  ;;  %4776 = vmatpush1.msra.mxu1 %v194_v41 }
 0x225   :  { %3846 = vmatmul.mubr.msk.f32.vlgmr.msra.gmra.mrb[0].mxu1 %vm198_vm1, %v5209_v42  ;;  %348 = vmatprep.subr.mxu0 %v196_v40 }
 0x226   :  { %3845 = vmatmul.mubr.msk.f32.vlgmr.msra.gmra.mrb[2].mxu0 %vm198_vm1, %v5214_v43  ;;  %296 = vmatprep.mubr.f32.mxu1 %v6784_v14 }
 0x227   :  { %349 = vmatpush1.msra.mxu0 %v194_v41  ;;  %4190 = vmatprep.subr.mxu1 %v6784_v14 }
 0x228   :  { %4191 = vmatpush3.msra.mxu1 %v60_v44  ;;  %412 = vmatprep.mubr.f32.mxu0 %v6784_v14 }
 0x229   :  { %3847 = vmatmul.mubr.msk.f32.gmra.mrb[2].mxu1 %vm198_vm1, %v5227_v45  ;;  %4213 = vmatprep.subr.mxu0 %v6784_v14 }
 0x22a   :  { %302 = vmatprep.mubr.f32.mxu1 %v6784_v14  ;;  %3852 = vmatmul.mubr.msk.f32.vlgmr.msra.gmra.mrb[4].mxu0 %vm198_vm1, %v68_v46 }
 0x22b   :  { %418 = vmatprep.mubr.f32.mxu0 %v6784_v14  ;;  %4214 = vmatpush3.msra.mxu0 %v60_v44 }
 0x22d   :  { %3848 = vmatmul.mubr.msk.f32.gmra.mrb[4].mxu1 %vm198_vm1, %v5241_v47 }
 0x22e   :  { %308 = vmatprep.mubr.f32.mxu1 %v6784_v14  ;;  %3853 = vmatmul.mubr.msk.f32.gmra.mrb[6].mxu0 %vm198_vm1, %v69_v48 }
 0x22f   :  { %424 = vmatprep.mubr.f32.mxu0 %v6784_v14 }
 0x231   :  { %3849 = vmatmul.mubr.msk.f32.gmra.mrb[6].mxu1 %vm198_vm1, %v5254_v49 }
 0x232   :  { %314 = vmatprep.mubr.f32.mxu1 %v6784_v14  ;;  %3854 = vmatmul.mubr.msk.f32.gmra.mrb[8].mxu0 %vm198_vm1, %v70_v50 }
 0x233   :  { %430 = vmatprep.mubr.f32.mxu0 %v6784_v14 }
 0x235   :  { %3850 = vmatmul.mubr.msk.f32.gmra.mrb[8].mxu1 %vm198_vm1, %v5267_v51 }
 0x236   :  { %320 = vmatprep.mubr.f32.mxu1 %v6784_v14  ;;  %3855 = vmatmul.mubr.msk.f32.gmra.mrb[10].mxu0 %vm198_vm1, %v71_v52 }
 0x237   :  { %436 = vmatprep.mubr.f32.mxu0 %v6784_v14 }
 0x239   :  { %3851 = vmatmul.mubr.msk.f32.gmra.mrb[10].mxu1 %vm198_vm1, %v5280_v53 }
 0x23a   :  { %4192 = vmatprep.mubr.msk.f32.mxu1 %vm5061_vm2, %v6784_v14  ;;  %3856 = vmatmul.mubr.msk.f32.gmra.mrb[12].mxu0 %vm198_vm1, %v72_v55 }
 0x23b   :  { %442 = vmatprep.mubr.f32.mxu0 %v6784_v14 }
 0x23d   :  { %4193 = vmatmul.mubr.msk.f32.vlgmr.msra.gmra.mrb[12].mxu1 %vm198_vm1, %v455_v54 }
 0x23e   :  { %4195 = vmatprep.mubr.msk.f32.mxu1 %vm5061_vm2, %v6784_v14  ;;  %3857 = vmatmul.mubr.msk.f32.gmra.mrb[14].mxu0 %vm198_vm1, %v73_v57 }
 0x23f   :  { %448 = vmatprep.mubr.f32.mxu0 %v6784_v14 }
 0x241   :  { %4196 = vmatmul.mubr.msk.f32.gmra.mrb[14].mxu1 %vm198_vm1, %v456_v56 }
 0x242   :  { %4198 = vmatprep.mubr.msk.f32.mxu1 %vm5061_vm2, %v6784_v14  ;;  %3858 = vmatmul.mubr.msk.f32.gmra.mrb[16].mxu0 %vm198_vm1, %v74_v59 }
 0x243   :  { %4215 = vmatprep.mubr.msk.f32.mxu0 %vm5061_vm2, %v6784_v14 }
 0x245   :  { %4199 = vmatmul.mubr.msk.f32.gmra.mrb[16].mxu1 %vm198_vm1, %v457_v58 }
 0x246   :  { %4201 = vmatprep.mubr.msk.f32.mxu1 %vm5061_vm2, %v6784_v14 }
 0x249   :  { %4202 = vmatmul.mubr.msk.f32.gmra.mrb[18].mxu1 %vm198_vm1, %v458_v60 }
 0x24a   :  { %4204 = vmatprep.mubr.msk.f32.mxu1 %vm5061_vm2, %v6784_v14 }
 0x24d   :  { %4205 = vmatmul.mubr.msk.f32.gmra.mrb[20].mxu1 %vm198_vm1, %v459_v61 }
 0x24e   :  { %4207 = vmatprep.mubr.msk.f32.mxu1 %vm5061_vm2, %v6784_v14 }
 0x251   :  { %4208 = vmatmul.mubr.msk.f32.gmra.mrb[22].mxu1 %vm198_vm1, %v460_v62 }
 0x252   :  { %4210 = vmatprep.mubr.msk.f32.mxu1 %vm5061_vm2, %v6784_v14 }
 0x255   :  { %4211 = vmatmul.mubr.msk.f32.gmra.mrb[24].mxu1 %vm198_vm1, %v461_v63 }
 0x256   :  { %4244 = vmatprep.mubr.msk.f32.mxu1 %vm5061_vm2, %v6784_v14 }
 0x2f8   :  { %v5332_v0 = vpop.f32.mrb[0].mxu1 }
 0x2f9   :  { %v5334_v1 = vpop.f32.mrb[1].mxu1  ;;  %v5336_v2 = vpop.f32.mrb[2].mxu0 }
 0x2fa   :  { %v5338_v3 = vpop.f32.mrb[3].mxu0 }
 0x2fc   :  { %v5340_v4 = vpop.f32.mrb[2].mxu1 }
 0x2fd   :  { %v5342_v5 = vpop.f32.mrb[3].mxu1  ;;  %v5344_v6 = vpop.f32.mrb[4].mxu0 }
 0x2fe   :  { %v5346_v7 = vpop.f32.mrb[5].mxu0 }
 0x2ff   :  { %6801 = vst [vmem:[#allocation9_spill] sm:$0xff] %v5346_v7 }
 0x300   :  { %v5348_v8 = vpop.f32.mrb[4].mxu1 }
 0x301   :  { %v5350_v9 = vpop.f32.mrb[5].mxu1  ;;  %v5352_v10 = vpop.f32.mrb[6].mxu0 }
 0x302   :  { %v5354_v11 = vpop.f32.mrb[7].mxu0 }
 0x303   :  { %6802 = vst [vmem:[#allocation10_spill] sm:$0xff] %v5354_v11 }
 0x304   :  { %v5356_v12 = vpop.f32.mrb[6].mxu1 }
 0x305   :  { %v5358_v13 = vpop.f32.mrb[7].mxu1  ;;  %v5402_v58 = vpop.f32.mrb[8].mxu0 }
 0x306   :  { %v5405_v60 = vpop.f32.mrb[9].mxu0 }
 0x307   :  { %6803 = vst [vmem:[#allocation11_spill] sm:$0xff] %v5405_v60 }
 0x308   :  { %v5360_v15 = vpop.f32.mrb[8].mxu1 }
 0x309   :  { %v5362_v16 = vpop.f32.mrb[9].mxu1  ;;  %v5407_v61 = vpop.f32.mrb[10].mxu0 }
 0x30a   :  { %v5409_v62 = vpop.f32.mrb[11].mxu0 }
 0x30b   :  { %6804 = vst [vmem:[#allocation12_spill] sm:$0xff] %v5409_v62 }
 0x30c   :  { %v5364_v17 = vpop.f32.mrb[10].mxu1 }
 0x30d   :  { %v5366_v18 = vpop.f32.mrb[11].mxu1  ;;  %v5411_v63 = vpop.f32.mrb[12].mxu0 }
 0x310   :  { %v5368_v19 = vpop.f32.mrb[12].mxu1 }
 0x311   :  { %v4194_v20 = vpop.f32.mrb[13].mxu1  ;;  %v711_v21 = vmul.f32 %v5368_v19, %v5368_v19 }
 0x312   :  { %v5413_v20 = vpop.f32.mrb[13].mxu0 }
 0x313   :  { %v719_v22 = vsel %vm718_vm3, %v711_v21, 0.0  ;;  %6805 = vst [vmem:[#allocation13_spill] sm:$0xff] %v5413_v20  ;;  %v5415_v21 = vpop.f32.mrb[14].mxu0 }
 0x314   :  { %720 = vadd.xlane.f32.xlu1 %v719_v22  ;;  %v5373_v23 = vpop.f32.mrb[14].mxu1  ;;  %v5417_v22 = vpop.f32.mrb[15].mxu0 }
 0x315   :  { %v4197_v28 = vpop.f32.mrb[15].mxu1  ;;  %v712_v29 = vmul.f32 %v5373_v23, %v5373_v23 }
 0x316   :  { %v811_v28 = vld [vmem:[%s6776_s8 + $0x48] sm:$0xff] }
 0x317   :  { %v722_v30 = vsel %vm718_vm3, %v712_v29, 0.0  ;;  %v812_v29 = vld [vmem:[%s6776_s8 + $0x98] sm:$0xff] }
 0x318   :  { %723 = vadd.xlane.f32.xlu1 %v722_v30  ;;  %v5378_v31 = vpop.f32.mrb[16].mxu1  ;;  %v5427_v30 = vpop.f32.mrb[16].mxu0 }
 0x319   :  { %v4200_v32 = vpop.f32.mrb[17].mxu1  ;;  %v713_v33 = vmul.f32 %v5378_v31, %v5378_v31 }
 0x31a   :  { %v4639_v32 = vpack.c.bf16 %v812_v29, %v811_v28  ;;  %v5489_v28 = vsub.s32 4, %v5178_v24 }
 0x31b   :  { %v725_v35 = vsel %vm718_vm3, %v713_v33, 0.0  ;;  %v6782_v33 = vmov 0.0|0.0  }
 0x31c   :  { %726 = vadd.xlane.f32.xlu0 %v725_v35  ;;  %v5383_v36 = vpop.f32.mrb[18].mxu1  ;;  %4638 = vmatprep.subr.bf16.mxu1 %v6782_v33  ;;  %v5430_v35 = vpop.f32.mrb[17].mxu0  ;;  %6808 = vst [vmem:[#allocation16_spill] sm:$0xff] %v5489_v28 }
 0x31d   :  { %v4203_v37 = vpop.f32.mrb[19].mxu1  ;;  %v714_v38 = vmul.f32 %v5383_v36, %v5383_v36  ;;  %6806 = vst [vmem:[#allocation14_spill] sm:$0xff] %v5430_v35  ;;  %4644 = vmatprep.subr.bf16.mxu0 %v6782_v33  ;;  %4640 = vmatpush3.bf16.msra.mxu1 %v4639_v32 }
 0x31e   :  { %4641 = vmatprep.subr.bf16.mxu1 %v6782_v33  ;;  %v813_v37 = vld [vmem:[%s6776_s8 + $0xe8] sm:$0xff] }
 0x31f   :  { %v728_v39 = vsel %vm718_vm3, %v714_v38, 0.0  ;;  %v814_v38 = vld [vmem:[%s6776_s8 + $0x138] sm:$0xff] }
 0x320   :  { %729 = vadd.xlane.f32.xlu1 %v728_v39  ;;  %v5388_v40 = vpop.f32.mrb[20].mxu1  ;;  %v4642_v39 = vpack.c.bf16 %v814_v38, %v813_v37  ;;  %v754_v37 = vrot.slane %v5186_v26, %v5489_v28 }
 0x321   :  { %v4206_v41 = vpop.f32.mrb[21].mxu1  ;;  %v715_v44 = vmul.f32 %v5388_v40, %v5388_v40 }
 0x322   :  { %4643 = vmatpush3.bf16.msra.mxu1 %v4642_v39  ;;  %v583_v41 = vld [vmem:[%s6772_s4] sm:$0xff] }
 0x323   :  { %v731_v46 = vsel %vm718_vm3, %v715_v44, 0.0  ;;  %4216 = vmatmul.mubr.msk.f32.vlgmr.msra.gmra.mrb[18].mxu0 %vm198_vm1, %v583_v41  ;;  %v584_v44 = vld [vmem:[%s6772_s4 + $0x8] sm:$0xff] }
 0x324   :  { %732 = vadd.xlane.f32.xlu0 %v731_v46  ;;  %v5393_v48 = vpop.f32.mrb[22].mxu1  ;;  %4218 = vmatprep.mubr.msk.f32.mxu0 %vm5061_vm2, %v6784_v14  ;;  %v585_v46 = vld [vmem:[%s6772_s4 + $0x10] sm:$0xff] }
 0x325   :  { %v4209_v50 = vpop.f32.mrb[23].mxu1  ;;  %v716_v52 = vmul.f32 %v5393_v48, %v5393_v48 }
 0x326   :  { %v586_v50 = vld [vmem:[%s6772_s4 + $0x18] sm:$0xff] }
 0x327   :  { %v734_v54 = vsel %vm718_vm3, %v716_v52, 0.0  ;;  %4219 = vmatmul.mubr.msk.f32.gmra.mrb[20].mxu0 %vm198_vm1, %v584_v44  ;;  %v587_v52 = vld [vmem:[%s6772_s4 + $0x20] sm:$0xff] }
 0x328   :  { %735 = vadd.xlane.f32.xlu1 %v734_v54  ;;  %v5398_v55 = vpop.f32.mrb[24].mxu1  ;;  %4221 = vmatprep.mubr.msk.f32.mxu0 %vm5061_vm2, %v6784_v14  ;;  %v588_v54 = vld [vmem:[%s6772_s4 + $0x28] sm:$0xff] }
 0x329   :  { %v4212_v56 = vpop.f32.mrb[25].mxu1  ;;  %v717_v57 = vmul.f32 %v5398_v55, %v5398_v55 }
 0x32a   :  { %v589_v56 = vld [vmem:[%s6772_s4 + $0x30] sm:$0xff]  ;;  %s5064_s4 = smov 64  }
 0x32b   :  { %v737_v59 = vsel %vm718_vm3, %v717_v57, 0.0  ;;  %4222 = vmatmul.mubr.msk.f32.gmra.mrb[22].mxu0 %vm198_vm1, %v585_v46  ;;  %v5485_v57 = vsub.s32 3, %v5178_v24 }
 0x32c   :  { %738 = vadd.xlane.f32.xlu0 %v737_v59  ;;  %4224 = vmatprep.mubr.msk.f32.mxu0 %vm5061_vm2, %v6784_v14  ;;  %v6781_v59 = vsub.s32 6, %v5178_v24 }
 0x32d   :  { %6807 = vst [vmem:[#allocation15_spill] sm:$0xff] %v5485_v57  ;;  %v743_v29 = vrot.slane %v5186_v26, %v5485_v57 }
 0x32e   :  { %v978_v32 = vrot.slane %v5186_v26, %v6781_v59 }
 0x32f   :  { %4225 = vmatmul.mubr.msk.f32.gmra.mrb[24].mxu0 %vm198_vm1, %v586_v50 }
 0x330   :  { %4227 = vmatprep.mubr.msk.f32.mxu0 %vm5061_vm2, %v6784_v14 }
 0x333   :  { %4228 = vmatmul.mubr.msk.f32.gmra.mrb[26].mxu0 %vm198_vm1, %v587_v52 }
 0x334   :  { %4230 = vmatprep.mubr.msk.f32.mxu0 %vm5061_vm2, %v6784_v14 }
 0x337   :  { %4231 = vmatmul.mubr.msk.f32.gmra.mrb[28].mxu0 %vm198_vm1, %v588_v54 }
 0x338   :  { %4233 = vmatprep.mubr.msk.f32.mxu0 %vm5061_vm2, %v6784_v14 }
 0x339   :  { %947 = vrot.lane.b32.xlu1 %v5346_v7, %s5062_s3 }
 0x33b   :  { %4234 = vmatmul.mubr.msk.f32.gmra.mrb[30].mxu0 %vm198_vm1, %v589_v56 }
 0x33c   :  { %4273 = vmatprep.mubr.msk.f32.mxu0 %vm5061_vm2, %v6784_v14 }
 0x33d   :  { %949 = vrot.lane.b32.xlu1 %v5354_v11, %s5062_s3 }
 0x3a1   :  { %v721_v38 = vpop.xlane.xlu1 %720 }
 0x3a2   :  { %v744_v39 = vmul.f32 %v743_v29, %v721_v38  ;;  %v979_v41 = vmul.f32 %v978_v32, %v721_v38 }
 0x3a4   :  { %v5498_v44 = vadd.f32 %v754_v37, %v744_v39  ;;  %993 = vrot.lane.b32.xlu0 %v979_v41, %s5064_s4 }
 0x3a5   :  { %v724_v46 = vpop.xlane.xlu1 %723 }
 0x3a6   :  { %v3873_v50 = vmul.f32 -1.442695, %v5498_v44  ;;  %v745_v52 = vmul.f32 %v743_v29, %v724_v46  ;;  %v980_v54 = vmul.f32 %v978_v32, %v724_v46 }
 0x3a8   :  { %4794 = vpow2.f32 %v3873_v50  ;;  %v5502_v56 = vadd.f32 %v754_v37, %v745_v52  ;;  %995 = vrot.lane.b32.xlu1 %v980_v54, %s5064_s4 }
 0x3a9   :  { %v727_v59 = vpop.xlane.xlu0 %726 }
 0x3aa   :  { %v3874_v26 = vmul.f32 -1.442695, %v5502_v56  ;;  %v746_v33 = vmul.f32 %v743_v29, %v727_v59  ;;  %v981_v38 = vmul.f32 %v978_v32, %v727_v59 }
 0x3ac   :  { %4796 = vpow2.f32 %v3874_v26  ;;  %v5506_v39 = vadd.f32 %v754_v37, %v746_v33  ;;  %951 = vrot.lane.b32.xlu1 %v5405_v60, %s5062_s3  ;;  %997 = vrot.lane.b32.xlu0 %v981_v38, %s5064_s4 }
 0x3ad   :  { %v730_v41 = vpop.xlane.xlu1 %729 }
 0x3ae   :  { %v3875_v46 = vmul.f32 -1.442695, %v5506_v39  ;;  %v747_v50 = vmul.f32 %v743_v29, %v730_v41  ;;  %v982_v52 = vmul.f32 %v978_v32, %v730_v41 }
 0x3b0   :  { %4798 = vpow2.f32 %v3875_v46  ;;  %v758_v54 = vadd.f32 %v754_v37, %v747_v50  ;;  %953 = vrot.lane.b32.xlu1 %v5409_v62, %s5062_s3  ;;  %999 = vrot.lane.b32.xlu0 %v982_v52, %s5064_s4 }
 0x3b1   :  { %v733_v59 = vpop.xlane.xlu0 %732 }
 0x3b2   :  { %v4795_v33 = vpop.eup %4794  ;;  %v3876_v26 = vmul.f32 -1.442695, %v758_v54  ;;  %v748_v14 = vmul.f32 %v743_v29, %v733_v59  ;;  %v983_v11 = vmul.f32 %v978_v32, %v733_v59 }
 0x3b3   :  { %v783_v60 = vadd.f32 1.0, %v4795_v33 }
 0x3b4   :  { %4800 = vpow2.f32 %v3876_v26  ;;  %v759_v38 = vadd.f32 %v754_v37, %v748_v14  ;;  %955 = vrot.lane.b32.xlu1 %v5413_v20, %s5062_s3  ;;  %1001 = vrot.lane.b32.xlu0 %v983_v11, %s5064_s4 }
 0x3b5   :  { %4802 = vrcp.f32 %v783_v60  ;;  %v736_v41 = vpop.xlane.xlu1 %735 }
 0x3b6   :  { %v4797_v46 = vpop.eup %4796  ;;  %v3877_v50 = vmul.f32 -1.442695, %v759_v38  ;;  %v749_v62 = vmul.f32 %v743_v29, %v736_v41  ;;  %v984_v7 = vmul.f32 %v978_v32, %v736_v41 }
 0x3b7   :  { %v784_v52 = vadd.f32 1.0, %v4797_v46 }
 0x3b8   :  { %4804 = vpow2.f32 %v3877_v50  ;;  %v760_v28 = vadd.f32 %v754_v37, %v749_v62  ;;  %957 = vrot.lane.b32.xlu1 %v5417_v22, %s5062_s3  ;;  %1003 = vrot.lane.b32.xlu0 %v984_v7, %s5064_s4 }
 0x3b9   :  { %4806 = vrcp.f32 %v784_v52  ;;  %v739_v14 = vpop.xlane.xlu0 %738 }
 0x3ba   :  { %v4799_v59 = vpop.eup %4798  ;;  %v3878_v33 = vmul.f32 -1.442695, %v760_v28  ;;  %v750_v26 = vmul.f32 %v743_v29, %v739_v14  ;;  %v985_v11 = vmul.f32 %v978_v32, %v739_v14 }
 0x3bb   :  { %v785_v60 = vadd.f32 1.0, %v4799_v59 }
 0x3bc   :  { %4808 = vpow2.f32 %v3878_v33  ;;  %v761_v20 = vadd.f32 %v754_v37, %v750_v26  ;;  %959 = vrot.lane.b32.xlu1 %v5430_v35, %s5062_s3  ;;  %1005 = vrot.lane.b32.xlu0 %v985_v11, %s5064_s4  ;;  %v6809_v37 = vmov 0.0  }
 0x3bd   :  { %4810 = vrcp.f32 %v785_v60 }
 0x3be   :  { %v4801_v62 = vpop.eup %4800  ;;  %v3879_v41 = vmul.f32 -1.442695, %v761_v20 }
 0x3bf   :  { %v4803_v46 = vpop.eup %4802  ;;  %v786_v50 = vadd.f32 1.0, %v4801_v62 }
 0x3c0   :  { %v804_v7 = vmul.f32 %v4803_v46, %v5498_v44  ;;  %4812 = vpow2.f32 %v3879_v41 }
 0x3c1   :  { %4814 = vrcp.f32 %v786_v50 }
 0x3c2   :  { %v4805_v52 = vpop.eup %4804  ;;  %4245 = vmatmul.mubr.msk.f32.vlgmr.msra.gmra.mrb[26].mxu1 %vm83_vm0, %v804_v7 }
 0x3c3   :  { %v4807_v29 = vpop.eup %4806  ;;  %v787_v32 = vadd.f32 1.0, %v4805_v52  ;;  %4247 = vmatprep.mubr.msk.f32.mxu1 %vm5061_vm2, %v6809_v37  ;;  %v5065_v52 = vmov 0  }
 0x3c4   :  { %v805_v14 = vmul.f32 %v4807_v29, %v5502_v56  ;;  %4790 = vset.pattern.permute.xlu1 %v5065_v52  ;;  %4791 = vset.pattern.permute.xlu0 %v5065_v52  ;;  %v1073_v52 = vld [vmem:[%s6776_s8 + $0xf0] sm:$0xff] }
 0x3c5   :  { %4816 = vrcp.f32 %v787_v32 }
 0x3c6   :  { %v4809_v59 = vpop.eup %4808  ;;  %4248 = vmatmul.mubr.msk.f32.gmra.mrb[28].mxu1 %vm83_vm0, %v805_v14 }
 0x3c7   :  { %v4811_v33 = vpop.eup %4810  ;;  %v788_v26 = vadd.f32 1.0, %v4809_v59  ;;  %4250 = vmatprep.mubr.msk.f32.mxu1 %vm5061_vm2, %v6809_v37 }
 0x3c8   :  { %v806_v44 = vmul.f32 %v4811_v33, %v5506_v39 }
 0x3c9   :  { %4818 = vrcp.f32 %v788_v26 }
 0x3ca   :  { %v4813_v11 = vpop.eup %4812  ;;  %4251 = vmatmul.mubr.msk.f32.gmra.mrb[30].mxu1 %vm83_vm0, %v806_v44 }
 0x3cb   :  { %v4815_v60 = vpop.eup %4814  ;;  %v789_v62 = vadd.f32 1.0, %v4813_v11  ;;  %4253 = vmatprep.mubr.msk.f32.mxu1 %vm5061_vm2, %v6809_v37 }
 0x3cc   :  { %v807_v56 = vmul.f32 %v4815_v60, %v758_v54 }
 0x3cd   :  { %4820 = vrcp.f32 %v789_v62 }
 0x3ce   :  { %4254 = vmatmul.mubr.msk.f32.gmra.mrb[32].mxu1 %vm83_vm0, %v807_v56  ;;  %v1070_v56 = vld [vmem:[%s6776_s8] sm:$0xff] }
 0x3cf   :  { %v4817_v41 = vpop.eup %4816  ;;  %4256 = vmatprep.mubr.msk.f32.mxu1 %vm5061_vm2, %v6809_v37 }
 0x3d0   :  { %v808_v46 = vmul.f32 %v4817_v41, %v759_v38  ;;  %v948_v38 = vpop.permute.xlu1 %947 }
 0x3d1   :  { %v968_v29 = vadd.f32 %v948_v38, %v5338_v3  ;;  %v1071_v3 = vld [vmem:[%s6776_s8 + $0x50] sm:$0xff] }
 0x3d2   :  { %4257 = vmatmul.mubr.msk.f32.gmra.mrb[34].mxu1 %vm83_vm0, %v808_v46  ;;  %v4645_v41 = vpack.c.bf16 %v1071_v3, %v1070_v56 }
 0x3d3   :  { %v4819_v39 = vpop.eup %4818  ;;  %4259 = vmatprep.mubr.msk.f32.mxu1 %vm5061_vm2, %v6809_v37 }
 0x3d4   :  { %v809_v50 = vmul.f32 %v4819_v39, %v760_v28  ;;  %v950_v32 = vpop.permute.xlu1 %949  ;;  %4646 = vmatpush3.bf16.msra.mxu0 %v4645_v41 }
 0x3d5   :  { %v969_v59 = vadd.f32 %v950_v32, %v5334_v1 }
 0x3d6   :  { %4260 = vmatmul.mubr.msk.f32.gmra.mrb[36].mxu1 %vm83_vm0, %v809_v50 }
 0x3d7   :  { %v4821_v7 = vpop.eup %4820  ;;  %4262 = vmatprep.mubr.msk.f32.mxu1 %vm5061_vm2, %v6809_v37 }
 0x3d8   :  { %v810_v54 = vmul.f32 %v4821_v7, %v761_v20 }
 0x3da   :  { %4263 = vmatmul.mubr.msk.f32.gmra.mrb[38].mxu1 %vm83_vm0, %v810_v54  ;;  %v6810_v54 = vmov 0.0|0.0  }
 0x3db   :  { %1306 = vmatprep.mubr.f32.mxu1 %v6809_v37  ;;  %4647 = vmatprep.subr.bf16.mxu0 %v6810_v54 }
 0x416   :  { %v994_v14 = vpop.permute.xlu0 %993 }
 0x417   :  { %v1014_v28 = vadd.f32 %v994_v14, %v968_v29 }
 0x419   :  { %v3887_v33 = vmul.f32 -1.442695, %v1014_v28 }
 0x41a   :  { %v996_v26 = vpop.permute.xlu1 %995 }
 0x41b   :  { %4822 = vpow2.f32 %v3887_v33  ;;  %v1015_v44 = vadd.f32 %v996_v26, %v969_v59 }
 0x41d   :  { %v3888_v20 = vmul.f32 -1.442695, %v1015_v44 }
 0x41e   :  { %v952_v11 = vpop.permute.xlu1 %951  ;;  %v998_v60 = vpop.permute.xlu0 %997 }
 0x41f   :  { %4824 = vpow2.f32 %v3888_v20  ;;  %v970_v62 = vadd.f32 %v952_v11, %v5342_v5  ;;  %v1072_v5 = vld [vmem:[%s6776_s8 + $0xa0] sm:$0xff] }
 0x420   :  { %v4648_v38 = vpack.c.bf16 %v1073_v52, %v1072_v5 }
 0x421   :  { %v1016_v1 = vadd.f32 %v998_v60, %v970_v62 }
 0x422   :  { %v954_v46 = vpop.permute.xlu1 %953  ;;  %v1000_v39 = vpop.permute.xlu0 %999  ;;  %4649 = vmatpush3.bf16.msra.mxu0 %v4648_v38 }
 0x423   :  { %v3889_v50 = vmul.f32 -1.442695, %v1016_v1  ;;  %v971_v7 = vadd.f32 %v954_v46, %v5350_v9  ;;  %4658 = vmatprep.subr.bf16.mxu0 %v6810_v54 }
 0x425   :  { %v4823_v29 = vpop.eup %4822  ;;  %4826 = vpow2.f32 %v3889_v50  ;;  %v1017_v32 = vadd.f32 %v1000_v39, %v971_v7 }
 0x426   :  { %v1042_v14 = vadd.f32 1.0, %v4823_v29  ;;  %v956_v59 = vpop.permute.xlu1 %955  ;;  %v1002_v33 = vpop.permute.xlu0 %1001 }
 0x427   :  { %v3890_v26 = vmul.f32 -1.442695, %v1017_v32  ;;  %v972_v9 = vadd.f32 %v956_v59, %v5358_v13 }
 0x428   :  { %4828 = vrcp.f32 %v1042_v14 }
 0x429   :  { %v4825_v20 = vpop.eup %4824  ;;  %4830 = vpow2.f32 %v3890_v26  ;;  %v1018_v11 = vadd.f32 %v1002_v33, %v972_v9 }
 0x42a   :  { %v1043_v60 = vadd.f32 1.0, %v4825_v20  ;;  %v958_v62 = vpop.permute.xlu1 %957  ;;  %v1004_v56 = vpop.permute.xlu0 %1003 }
 0x42b   :  { %v3891_v3 = vmul.f32 -1.442695, %v1018_v11  ;;  %v973_v41 = vadd.f32 %v958_v62, %v5362_v16 }
 0x42c   :  { %4832 = vrcp.f32 %v1043_v60 }
 0x42d   :  { %4834 = vpow2.f32 %v3891_v3  ;;  %v1019_v46 = vadd.f32 %v1004_v56, %v973_v41 }
 0x42e   :  { %v960_v39 = vpop.permute.xlu1 %959  ;;  %v1006_v50 = vpop.permute.xlu0 %1005 }
 0x42f   :  { %v4827_v7 = vpop.eup %4826  ;;  %v3892_v5 = vmul.f32 -1.442695, %v1019_v46  ;;  %v974_v13 = vadd.f32 %v960_v39, %v5366_v18 }
 0x430   :  { %v1044_v52 = vadd.f32 1.0, %v4827_v7 }
 0x431   :  { %4836 = vpow2.f32 %v3892_v5  ;;  %v1020_v38 = vadd.f32 %v1006_v50, %v974_v13  ;;  %v5572_v5 = vpop.f32.mrb[18].mxu0 }
 0x432   :  { %v4829_v29 = vpop.eup %4828  ;;  %4838 = vrcp.f32 %v1044_v52  ;;  %v4217_v13 = vpop.f32.mrb[19].mxu0 }
 0x433   :  { %v4831_v14 = vpop.eup %4830  ;;  %v1063_v59 = vmul.f32 %v4829_v29, %v1014_v28  ;;  %v3893_v33 = vmul.f32 -1.442695, %v1020_v38 }
 0x434   :  { %v1045_v26 = vadd.f32 1.0, %v4831_v14 }
 0x435   :  { %4840 = vpow2.f32 %v3893_v33  ;;  %1085 = vrot.lane.b32.xlu1 %v1063_v59, %s5064_s4 }
 0x436   :  { %v4833_v16 = vpop.eup %4832  ;;  %4842 = vrcp.f32 %v1045_v26 }
 0x437   :  { %v4835_v9 = vpop.eup %4834  ;;  %v1064_v20 = vmul.f32 %v4833_v16, %v1015_v44 }
 0x438   :  { %v1046_v60 = vadd.f32 1.0, %v4835_v9 }
 0x439   :  { %1087 = vrot.lane.b32.xlu0 %v1064_v20, %s5064_s4 }
 0x43a   :  { %4844 = vrcp.f32 %v1046_v60 }
 0x43b   :  { %v4837_v18 = vpop.eup %4836 }
 0x43c   :  { %v4839_v62 = vpop.eup %4838  ;;  %v1047_v56 = vadd.f32 1.0, %v4837_v18 }
 0x43d   :  { %v1065_v3 = vmul.f32 %v4839_v62, %v1016_v1  ;;  %v5575_v1 = vpop.f32.mrb[20].mxu0 }
 0x43e   :  { %4846 = vrcp.f32 %v1047_v56  ;;  %v4220_v14 = vpop.f32.mrb[21].mxu0 }
 0x43f   :  { %v4841_v41 = vpop.eup %4840  ;;  %1089 = vrot.lane.b32.xlu1 %v1065_v3, %s5064_s4  ;;  %v5578_v33 = vpop.f32.mrb[22].mxu0 }
 0x440   :  { %v4843_v28 = vpop.eup %4842  ;;  %v1048_v39 = vadd.f32 1.0, %v4841_v41  ;;  %v4223_v26 = vpop.f32.mrb[23].mxu0 }
 0x441   :  { %v1066_v50 = vmul.f32 %v4843_v28, %v1017_v32  ;;  %v5580_v16 = vpop.f32.mrb[24].mxu0 }
 0x442   :  { %4848 = vrcp.f32 %v1048_v39 }
 0x443   :  { %1091 = vrot.lane.b32.xlu0 %v1066_v50, %s5064_s4 }
 0x444   :  { %v4845_v7 = vpop.eup %4844 }
 0x445   :  { %v1067_v44 = vmul.f32 %v4845_v7, %v1018_v11  ;;  %v4226_v11 = vpop.f32.mrb[25].mxu0  ;;  %v78_v7 = vld [vmem:[%s6774_s6 + $0x18] sm:$0xff] }
 0x446   :  { %v5585_v9 = vpop.f32.mrb[26].mxu0  ;;  %v81_v11 = vld [vmem:[%s6774_s6 + $0x30] sm:$0xff] }
 0x447   :  { %1093 = vrot.lane.b32.xlu1 %v1067_v44, %s5064_s4 }
 0x448   :  { %v4847_v52 = vpop.eup %4846 }
 0x449   :  { %v1068_v29 = vmul.f32 %v4847_v52, %v1019_v46  ;;  %v4229_v46 = vpop.f32.mrb[27].mxu0 }
 0x44a   :  { %v5587_v20 = vpop.f32.mrb[28].mxu0 }
 0x44b   :  { %1095 = vrot.lane.b32.xlu0 %v1068_v29, %s5064_s4  ;;  %v79_v29 = vld [vmem:[%s6774_s6 + $0x20] sm:$0xff] }
 0x44c   :  { %v4849_v59 = vpop.eup %4848 }
 0x44d   :  { %v1069_v32 = vmul.f32 %v4849_v59, %v1020_v38  ;;  %v4232_v38 = vpop.f32.mrb[29].mxu0 }
 0x44e   :  { %v5593_v60 = vpop.f32.mrb[30].mxu0 }
 0x44f   :  { %1367 = vrot.lane.b32.xlu0 %v5344_v6, %s5064_s4  ;;  %1097 = vrot.lane.b32.xlu1 %v1069_v32, %s5064_s4  ;;  %v4235_v6 = vpop.f32.mrb[31].mxu0 }
 0x453   :  { %1371 = vrot.lane.b32.xlu0 %v5402_v58, %s5064_s4  ;;  %1369 = vrot.lane.b32.xlu1 %v5352_v10, %s5064_s4  ;;  %v1538_v10 = vld [vmem:[%s6773_s5] sm:$0xff]  ;;  %v1540_v58 = vld [vmem:[%s6773_s5 + $0x10] sm:$0xff] }
 0x457   :  { %1375 = vrot.lane.b32.xlu0 %v5411_v63, %s5064_s4  ;;  %1373 = vrot.lane.b32.xlu1 %v5407_v61, %s5064_s4  ;;  %v1542_v61 = vld [vmem:[%s6773_s5 + $0x20] sm:$0xff]  ;;  %v1544_v63 = vld [vmem:[%s6773_s5 + $0x30] sm:$0xff] }
 0x45b   :  { %1379 = vrot.lane.b32.xlu0 %v5427_v30, %s5064_s4  ;;  %1377 = vrot.lane.b32.xlu1 %v5415_v21, %s5064_s4 }
 0x45f   :  { %1547 = vperm.xlu1 %4790, %v1538_v10  }
 0x463   :  { %1557 = vperm.xlu1 %4790, %v1540_v58  }
 0x467   :  { %1567 = vperm.xlu1 %4790, %v1542_v61  }
 0x46b   :  { %1577 = vperm.xlu1 %4790, %v1544_v63  }
 0x494   :  { %1628 = vxpose.xlu1.b32.start [1/7] (short) (narrow) %v5214_v43, 8  ;;  %v75_v43 = vld [vmem:[%s6774_s6] sm:$0xff] }
 0x495   :  { %v5616_v21 = vpop.f32.mrb[26].mxu1 }
 0x496   :  { %v4246_v30 = vpop.f32.mrb[27].mxu1 }
 0x498   :  { %1629 = vxpose.xlu1.b32.cont [2/7] (short) (narrow) %v5209_v42, 8  ;;  %v76_v42 = vld [vmem:[%s6774_s6 + $0x8] sm:$0xff] }
 0x499   :  { %v5619_v18 = vpop.f32.mrb[28].mxu1 }
 0x49a   :  { %v4249_v62 = vpop.f32.mrb[29].mxu1 }
 0x49c   :  { %1630 = vxpose.xlu1.b32.cont [3/7] (short) (narrow) %v5227_v45, 8  ;;  %v5636_v45 = vpack.c.bf16 %v76_v42, %v75_v43 }
 0x49d   :  { %v5622_v56 = vpop.f32.mrb[30].mxu1 }
 0x49e   :  { %v4252_v3 = vpop.f32.mrb[31].mxu1 }
 0x49f   :  { %v5699_v3 = vld [vmem:[#allocation5] sm:$0xff] }
 0x4a0   :  { %1631 = vxpose.xlu1.b32.cont [4/7] (short) (narrow) %v5241_v47, 8  ;;  %v77_v47 = vld [vmem:[%s6774_s6 + $0x10] sm:$0xff] }
 0x4a1   :  { %v5625_v41 = vpop.f32.mrb[32].mxu1 }
 0x4a2   :  { %v4255_v28 = vpop.f32.mrb[33].mxu1 }
 0x4a4   :  { %1632 = vxpose.xlu1.b32.cont [5/7] (short) (narrow) %v5254_v49, 8  ;;  %v5651_v49 = vpack.c.bf16 %v78_v7, %v77_v47  ;;  %v1214_v7 = vld [vmem:[%s6776_s8 + $0x10] sm:$0xff] }
 0x4a5   :  { %v5634_v39 = vpop.f32.mrb[34].mxu1 }
 0x4a6   :  { %v4258_v50 = vpop.f32.mrb[35].mxu1 }
 0x4a7   :  { %v1086_v44 = vpop.permute.xlu1 %1085 }
 0x4a8   :  { %1633 = vxpose.xlu1.b32.cont [6/7] (short) (narrow) %v5267_v51, 8  ;;  %4274 = vmatmul.mubr.msk.f32.vlgmr.msra.gmra.mrb[32].mxu0 %vm83_vm0, %v1086_v44  ;;  %v80_v51 = vld [vmem:[%s6774_s6 + $0x28] sm:$0xff]  ;;  %v1216_v44 = vld [vmem:[%s6776_s8 + $0x60] sm:$0xff] }
 0x4a9   :  { %v5646_v13 = vpop.f32.mrb[36].mxu1  ;;  %4276 = vmatprep.mubr.msk.f32.mxu0 %vm5061_vm2, %v6809_v37  ;;  %4660 = vmatpush3.bf16.msra.mxu0 %v5636_v45  ;;  %v5667_v32 = vpack.c.bf16 %v80_v51, %v79_v29  ;;  %v1218_v29 = vld [vmem:[%s6776_s8 + $0xb0] sm:$0xff]  ;;  %v1220_v51 = vld [vmem:[%s6776_s8 + $0x100] sm:$0xff] }
 0x4aa   :  { %v4261_v52 = vpop.f32.mrb[37].mxu1  ;;  %4661 = vmatprep.subr.bf16.mxu0 %v6810_v54 }
 0x4ab   :  { %v1088_v14 = vpop.permute.xlu0 %1087  ;;  %v4650_v52 = vpack.c.bf16 %v1216_v44, %v1214_v7 }
 0x4ac   :  { %1634 = vxpose.xlu1.b32.end [7/7] (short) (narrow) %v5280_v53, 8  ;;  %4277 = vmatmul.mubr.msk.f32.gmra.mrb[34].mxu0 %vm83_vm0, %v1088_v14  ;;  %v82_v53 = vld [vmem:[%s6774_s6 + $0x38] sm:$0xff]  ;;  %s5066_s6 = smov 1  }
 0x4ad   :  { %v5662_v59 = vpop.f32.mrb[38].mxu1  ;;  %4279 = vmatprep.mubr.msk.f32.mxu0 %vm5061_vm2, %v6809_v37  ;;  %4663 = vmatpush3.bf16.msra.mxu0 %v5651_v49  ;;  %v5677_v38 = vpack.c.bf16 %v82_v53, %v81_v11  ;;  %v1217_v11 = vld [vmem:[%s6776_s8 + $0xa8] sm:$0xff]  ;;  %v1219_v53 = vld [vmem:[%s6776_s8 + $0xf8] sm:$0xff] }
 0x4ae   :  { %v4264_v26 = vpop.f32.mrb[39].mxu1  ;;  %4664 = vmatprep.subr.bf16.mxu0 %v6810_v54  ;;  %4651 = vmatprep.subr.bf16.mxu1 %v4650_v52 }
 0x4af   :  { %v4654_v26 = vpack.c.bf16 %v1220_v51, %v1218_v29 }
 0x4b1   :  { %v1090_v46 = vpop.permute.xlu1 %1089  ;;  %4666 = vmatpush3.bf16.msra.mxu0 %v5667_v32 }
 0x4b2   :  { %4280 = vmatmul.mubr.msk.f32.gmra.mrb[36].mxu0 %vm83_vm0, %v1090_v46  ;;  %4667 = vmatprep.subr.bf16.mxu0 %v6810_v54  ;;  %v4656_v46 = vpack.c.bf16 %v1219_v53, %v1217_v11 }
 0x4b3   :  { %4282 = vmatprep.mubr.msk.f32.mxu0 %vm5061_vm2, %v6809_v37 }
 0x4b5   :  { %v1092_v6 = vpop.permute.xlu0 %1091  ;;  %4669 = vmatpush3.bf16.msra.mxu0 %v5677_v38 }
 0x4b6   :  { %4283 = vmatmul.mubr.msk.f32.gmra.mrb[38].mxu0 %vm83_vm0, %v1092_v6  ;;  %4670 = vmatprep.subr.bf16.mxu0 %v6810_v54  ;;  %v1539_v6 = vld [vmem:[%s6773_s5 + $0x8] sm:$0xff] }
 0x4b7   :  { %4285 = vmatprep.mubr.msk.f32.mxu0 %vm5061_vm2, %v6809_v37  ;;  %1552 = vperm.xlu0 %4791, %v1539_v6  }
 0x4b9   :  { %v1094_v10 = vpop.permute.xlu1 %1093 }
 0x4ba   :  { %4286 = vmatmul.mubr.msk.f32.gmra.mrb[40].mxu0 %vm83_vm0, %v1094_v10  ;;  %v1543_v10 = vld [vmem:[%s6773_s5 + $0x28] sm:$0xff] }
 0x4bb   :  { %4288 = vmatprep.mubr.msk.f32.mxu0 %vm5061_vm2, %v6809_v37  ;;  %1572 = vperm.xlu0 %4791, %v1543_v10  }
 0x4bd   :  { %v1096_v58 = vpop.permute.xlu0 %1095 }
 0x4be   :  { %4289 = vmatmul.mubr.msk.f32.gmra.mrb[42].mxu0 %vm83_vm0, %v1096_v58  ;;  %v1541_v58 = vld [vmem:[%s6773_s5 + $0x18] sm:$0xff] }
 0x4bf   :  { %4291 = vmatprep.mubr.msk.f32.mxu0 %vm5061_vm2, %v6809_v37  ;;  %1562 = vperm.xlu0 %4791, %v1541_v58  }
 0x4c1   :  { %v1368_v61 = vpop.permute.xlu0 %1367  ;;  %v1098_v63 = vpop.permute.xlu1 %1097 }
 0x4c2   :  { %4292 = vmatmul.mubr.msk.f32.gmra.mrb[44].mxu0 %vm83_vm0, %v1098_v63  ;;  %v1388_v30 = vmul.f32 %v1368_v61, %v5336_v2  ;;  %v6793_v61 = vsub.s32 7, %v5178_v24  ;;  %v4997_v63 = vld [vmem:[%s6779_s11] sm:$0xff] }
 0x4c3   :  { %4310 = vmatprep.mubr.msk.f32.mxu0 %vm5061_vm2, %v6809_v37 }
 0x4c5   :  { %v1370_v62 = vpop.permute.xlu1 %1369  ;;  %v1372_v43 = vpop.permute.xlu0 %1371 }
 0x4c6   :  { %4311 = vmatmul.mubr.msk.f32.vlgmr.msra.gmra.mrb[46].mxu0 %vm1395_vm4, %v1388_v30  ;;  %v1389_v28 = vmul.f32 %v1370_v62, %v5332_v0  ;;  %v1390_v2 = vmul.f32 %v1372_v43, %v5340_v4  ;;  %v1077_v30 = vrot.slane %v4997_v63, %v6793_v61 }
 0x4c7   :  { %4313 = vmatprep.mubr.msk.f32.mxu0 %vm5061_vm2, %v5699_v3 }
 0x4c9   :  { %v1374_v37 = vpop.permute.xlu1 %1373  ;;  %v1376_v42 = vpop.permute.xlu0 %1375 }
 0x4ca   :  { %4314 = vmatmul.mubr.msk.f32.gmra.mrb[48].mxu0 %vm1395_vm4, %v1389_v28  ;;  %2978 = vrot.lane.b32.xlu1 %v5575_v1, %s5066_s6  ;;  %v1391_v0 = vmul.f32 %v1374_v37, %v5348_v8  ;;  %v1392_v4 = vmul.f32 %v1376_v42, %v5356_v12 }
 0x4cb   :  { %4316 = vmatprep.mubr.msk.f32.mxu0 %vm5061_vm2, %v5699_v3 }
 0x4cd   :  { %v1378_v50 = vpop.permute.xlu1 %1377  ;;  %v1380_v47 = vpop.permute.xlu0 %1379 }
 0x4ce   :  { %4317 = vmatmul.mubr.msk.f32.gmra.mrb[50].mxu0 %vm1395_vm4, %v1390_v2  ;;  %3073 = vrot.lane.b32.xlu1 %v5580_v16, %s5067_s20  ;;  %v1393_v8 = vmul.f32 %v1378_v50, %v5360_v15  ;;  %v1394_v12 = vmul.f32 %v1380_v47, %v5364_v17  ;;  %v1213_v15 = vld [vmem:[%s6776_s8 + $0x8] sm:$0xff]  ;;  %v1215_v17 = vld [vmem:[%s6776_s8 + $0x58] sm:$0xff] }
 0x4cf   :  { %4319 = vmatprep.mubr.msk.f32.mxu0 %vm5061_vm2, %v5699_v3  ;;  %v4652_v14 = vpack.c.bf16 %v1215_v17, %v1213_v15  ;;  %v5796_v17 = vsub.s32 5, %v5178_v24 }
 0x4d1   :  { %4653 = vmatpush1.bf16.msra.mxu1 %v4652_v14  ;;  %6811 = vst [vmem:[#allocation17_spill] sm:$0xff] %v5796_v17 }
 0x4d2   :  { %4320 = vmatmul.mubr.msk.f32.gmra.mrb[52].mxu0 %vm1395_vm4, %v1391_v0  ;;  %2986 = vrot.lane.b32.xlu1 %v5587_v20, %s5066_s6 }
 0x4d3   :  { %4322 = vmatprep.mubr.msk.f32.mxu0 %vm5061_vm2, %v5699_v3  ;;  %4655 = vmatprep.subr.bf16.mxu1 %v4654_v26  ;;  %v818_v26 = vrot.slane %v4997_v63, %v5796_v17 }
 0x4d5   :  { %4657 = vmatpush1.bf16.msra.mxu1 %v4656_v46  ;;  %v907_v6 = vadd.f32 %v5616_v21, %v818_v26 }
 0x4d6   :  { %4323 = vmatmul.mubr.msk.f32.gmra.mrb[54].mxu0 %vm1395_vm4, %v1392_v4  ;;  %3077 = vrot.lane.b32.xlu1 %v5587_v20, %s5067_s20 }
 0x4d7   :  { %4325 = vmatprep.mubr.msk.f32.mxu0 %vm5061_vm2, %v5699_v3  ;;  %4348 = vmatprep.subr.mxu1 %v5699_v3 }
 0x4da   :  { %4326 = vmatmul.mubr.msk.f32.gmra.mrb[56].mxu0 %vm1395_vm4, %v1393_v8  ;;  %3079 = vrot.lane.b32.xlu1 %v5593_v60, %s5067_s20 }
 0x4db   :  { %4328 = vmatprep.mubr.msk.f32.mxu0 %vm5061_vm2, %v5699_v3 }
 0x4de   :  { %4329 = vmatmul.mubr.msk.f32.gmra.mrb[58].mxu0 %vm1395_vm4, %v1394_v12  ;;  %2948 = vrot.lane.b32.xlu1 %v5572_v5, %s5068_s27 }
 0x4df   :  { %4345 = vmatprep.mubr.msk.f32.mxu0 %vm5061_vm2, %v5699_v3 }
 0x4e2   :  { %2950 = vrot.lane.b32.xlu1 %v5575_v1, %s5068_s27 }
 0x4e6   :  { %3039 = vrot.lane.b32.xlu1 %v5572_v5, %s5069_s14 }
 0x4ea   :  { %3041 = vrot.lane.b32.xlu1 %v5575_v1, %s5069_s14 }
 0x57b   :  { %v1179_v62 = vpop.f32.mrb[32].mxu0 }
 0x57c   :  { %v1180_v28 = vadd.f32 %v1179_v62, %v1077_v30  ;;  %v4275_v43 = vpop.f32.mrb[33].mxu0 }
 0x57d   :  { %v912_v43 = vadd.f32 %v5619_v18, %v818_v26 }
 0x57e   :  { %3901 = vmatmul.mubr.msk.f32.vlgmr.msra.gmra.mrb[40].mxu1 %vm83_vm0, %v1180_v28 }
 0x57f   :  { %v1184_v2 = vpop.f32.mrb[34].mxu0  ;;  %1312 = vmatprep.mubr.f32.mxu1 %v5699_v3 }
 0x580   :  { %v1185_v37 = vadd.f32 %v1184_v2, %v1077_v30  ;;  %v4278_v0 = vpop.f32.mrb[35].mxu0 }
 0x582   :  { %3902 = vmatmul.mubr.msk.f32.gmra.mrb[42].mxu1 %vm83_vm0, %v1185_v37 }
 0x583   :  { %1318 = vmatprep.mubr.f32.mxu1 %v5699_v3 }
 0x585   :  { %v1189_v42 = vpop.f32.mrb[36].mxu0 }
 0x586   :  { %v1190_v4 = vadd.f32 %v1189_v42, %v1077_v30  ;;  %v4281_v50 = vpop.f32.mrb[37].mxu0 }
 0x588   :  { %3903 = vmatmul.mubr.msk.f32.gmra.mrb[44].mxu1 %vm83_vm0, %v1190_v4 }
 0x589   :  { %v1194_v8 = vpop.f32.mrb[38].mxu0  ;;  %1324 = vmatprep.mubr.f32.mxu1 %v5699_v3 }
 0x58a   :  { %v1195_v47 = vadd.f32 %v1194_v8, %v1077_v30  ;;  %v4284_v12 = vpop.f32.mrb[39].mxu0 }
 0x58c   :  { %3904 = vmatmul.mubr.msk.f32.gmra.mrb[46].mxu1 %vm83_vm0, %v1195_v47  ;;  %v922_v47 = vadd.f32 %v5625_v41, %v818_v26 }
 0x58d   :  { %v1199_v7 = vpop.f32.mrb[40].mxu0  ;;  %1330 = vmatprep.mubr.f32.mxu1 %v5699_v3 }
 0x58e   :  { %v1200_v44 = vadd.f32 %v1199_v7, %v1077_v30  ;;  %v4287_v15 = vpop.f32.mrb[41].mxu0 }
 0x58f   :  { %v927_v15 = vadd.f32 %v5634_v39, %v818_v26 }
 0x590   :  { %3905 = vmatmul.mubr.msk.f32.gmra.mrb[48].mxu1 %vm83_vm0, %v1200_v44 }
 0x591   :  { %v1204_v52 = vpop.f32.mrb[42].mxu0  ;;  %1336 = vmatprep.mubr.f32.mxu1 %v5699_v3 }
 0x592   :  { %v1205_v29 = vadd.f32 %v1204_v52, %v1077_v30  ;;  %v4290_v51 = vpop.f32.mrb[43].mxu0 }
 0x594   :  { %3906 = vmatmul.mubr.msk.f32.gmra.mrb[50].mxu1 %vm83_vm0, %v1205_v29 }
 0x595   :  { %v1209_v14 = vpop.f32.mrb[44].mxu0  ;;  %1342 = vmatprep.mubr.f32.mxu1 %v5699_v3 }
 0x596   :  { %v1210_v11 = vadd.f32 %v1209_v14, %v1077_v30  ;;  %v4293_v53 = vpop.f32.mrb[45].mxu0  ;;  %v917_v30 = vadd.f32 %v5622_v56, %v818_v26  ;;  %v932_v14 = vadd.f32 %v5646_v13, %v818_v26 }
 0x598   :  { %3907 = vmatmul.mubr.msk.f32.gmra.mrb[52].mxu1 %vm83_vm0, %v1210_v11 }
 0x599   :  { %v1483_v46 = vpop.f32.mrb[46].mxu0  ;;  %4350 = vmatprep.mubr.msk.f32.mxu1 %vm5061_vm2, %v5699_v3 }
 0x59a   :  { %v1517_v10 = vmul.f32 0.25, %v1483_v46  ;;  %v4312_v58 = vpop.f32.mrb[47].mxu0 }
 0x59c   :  { %v1524_v62 = vadd.f32 %v1517_v10, %v907_v6  ;;  %v937_v6 = vadd.f32 %v5662_v59, %v818_v26 }
 0x59d   :  { %v1488_v28 = vpop.f32.mrb[48].mxu0 }
 0x59e   :  { %v1518_v2 = vmul.f32 0.25, %v1488_v28  ;;  %v4315_v37 = vpop.f32.mrb[49].mxu0  ;;  %v5814_v28 = vld [vmem:[%s6779_s11 + $0x10] sm:$0xff] }
 0x59f   :  { %v1352_v39 = vrot.slane %v5814_v28, %v5181_v25 }
 0x5a0   :  { %v1525_v0 = vadd.f32 %v1518_v2, %v912_v43 }
 0x5a1   :  { %v1493_v63 = vpop.f32.mrb[50].mxu0 }
 0x5a2   :  { %v1519_v42 = vmul.f32 0.25, %v1493_v63  ;;  %v4318_v4 = vpop.f32.mrb[51].mxu0 }
 0x5a4   :  { %v1526_v50 = vadd.f32 %v1519_v42, %v917_v30  ;;  %v1548_v42 = vpop.permute.xlu1 %1547 }
 0x5a5   :  { %v1498_v8 = vpop.f32.mrb[52].mxu0 }
 0x5a6   :  { %v1520_v12 = vmul.f32 0.25, %v1498_v8  ;;  %v4321_v21 = vpop.f32.mrb[53].mxu0 }
 0x5a8   :  { %v1527_v7 = vadd.f32 %v1520_v12, %v922_v47 }
 0x5a9   :  { %v1503_v44 = vpop.f32.mrb[54].mxu0 }
 0x5aa   :  { %v1521_v52 = vmul.f32 0.25, %v1503_v44  ;;  %v4324_v18 = vpop.f32.mrb[55].mxu0 }
 0x5ac   :  { %v1528_v29 = vadd.f32 %v1521_v52, %v927_v15  ;;  %v1558_v15 = vpop.permute.xlu1 %1557 }
 0x5ad   :  { %v1508_v51 = vpop.f32.mrb[56].mxu0 }
 0x5ae   :  { %v1522_v11 = vmul.f32 0.25, %v1508_v51  ;;  %v4327_v56 = vpop.f32.mrb[57].mxu0 }
 0x5b0   :  { %v1529_v53 = vadd.f32 %v1522_v11, %v932_v14  ;;  %v1568_v56 = vpop.permute.xlu1 %1567 }
 0x5b1   :  { %v1513_v46 = vpop.f32.mrb[58].mxu0 }
 0x5b2   :  { %v1523_v10 = vmul.f32 0.25, %v1513_v46  ;;  %v4330_v41 = vpop.f32.mrb[59].mxu0 }
 0x5b4   :  { %v1530_v58 = vadd.f32 %v1523_v10, %v937_v6 }
 0x651   :  { %v5818_v43 = vpop.f32.mrb[40].mxu1 }
 0x652   :  { %v1310_v13 = vpop.f32.mrb[41].mxu1 }
 0x653   :  { %v1353_v2 = vadd.f32 %v1352_v39, %v1310_v13 }
 0x655   :  { %v1531_v37 = vadd.f32 %v1524_v62, %v1353_v2  ;;  %v5820_v63 = vpop.f32.mrb[42].mxu1  ;;  %v1553_v62 = vpop.permute.xlu0 %1552 }
 0x656   :  { %v1316_v30 = vpop.f32.mrb[43].mxu1 }
 0x657   :  { %v1354_v59 = vadd.f32 %v1352_v39, %v1316_v30  ;;  %v1580_v46 = vadd.f32 %v1548_v42, %v1531_v37 }
 0x659   :  { %v1532_v26 = vadd.f32 %v1525_v0, %v1354_v59  ;;  %v1573_v10 = vpop.permute.xlu0 %1572  ;;  %v1588_v2 = vsel %vm1587_vm5, %v1580_v46, -inf }
 0x65b   :  { %v5822_v4 = vpop.f32.mrb[44].mxu1  ;;  %v1581_v30 = vadd.f32 %v1553_v62, %v1532_v26 }
 0x65c   :  { %v1322_v8 = vpop.f32.mrb[45].mxu1 }
 0x65d   :  { %v1355_v47 = vadd.f32 %v1352_v39, %v1322_v8  ;;  %v1589_v42 = vsel %vm1587_vm5, %v1581_v30, -inf }
 0x65f   :  { %v1533_v12 = vadd.f32 %v1526_v50, %v1355_v47  ;;  %v5824_v21 = vpop.f32.mrb[46].mxu1 }
 0x660   :  { %v1328_v44 = vpop.f32.mrb[47].mxu1 }
 0x661   :  { %v1356_v52 = vadd.f32 %v1352_v39, %v1328_v44 }
 0x663   :  { %v5826_v18 = vpop.f32.mrb[48].mxu1  ;;  %v1534_v51 = vadd.f32 %v1527_v7, %v1356_v52 }
 0x664   :  { %v1334_v14 = vpop.f32.mrb[49].mxu1 }
 0x665   :  { %v1357_v11 = vadd.f32 %v1352_v39, %v1334_v14  ;;  %v1582_v14 = vadd.f32 %v1558_v15, %v1533_v12 }
 0x667   :  { %v1535_v0 = vadd.f32 %v1528_v29, %v1357_v11  ;;  %v5828_v6 = vpop.f32.mrb[50].mxu1  ;;  %v1563_v29 = vpop.permute.xlu0 %1562 }
 0x668   :  { %v1340_v41 = vpop.f32.mrb[51].mxu1  ;;  %v1583_v61 = vadd.f32 %v1563_v29, %v1534_v51 }
 0x669   :  { %v1584_v50 = vadd.f32 %v1568_v56, %v1535_v0  ;;  %v1358_v13 = vadd.f32 %v1352_v39, %v1340_v41  ;;  %v1578_v0 = vpop.permute.xlu1 %1577 }
 0x66b   :  { %v1592_v59 = vsel %vm1587_vm5, %v1584_v50, -inf  ;;  %v1536_v8 = vadd.f32 %v1529_v53, %v1358_v13  ;;  %v5832_v7 = vpop.f32.mrb[52].mxu1  ;;  %v1590_v53 = vsel %vm1587_vm5, %v1582_v14, -inf }
 0x66c   :  { %v1593_v47 = vmax.f32 %v1588_v2, %v1592_v59  ;;  %v1346_v44 = vpop.f32.mrb[53].mxu1 }
 0x66d   :  { %v1585_v52 = vadd.f32 %v1573_v10, %v1536_v8  ;;  %v1359_v37 = vadd.f32 %v1352_v39, %v1346_v44  ;;  %v1591_v10 = vsel %vm1587_vm5, %v1583_v61, -inf }
 0x66f   :  { %v1594_v11 = vsel %vm1587_vm5, %v1585_v52, -inf  ;;  %v1537_v56 = vadd.f32 %v1530_v58, %v1359_v37 }
 0x670   :  { %v1595_v41 = vmax.f32 %v1589_v42, %v1594_v11 }
 0x671   :  { %v1586_v26 = vadd.f32 %v1578_v0, %v1537_v56 }
 0x672   :  { %v1598_v62 = vmax.f32 %v1593_v47, %v1595_v41 }
 0x673   :  { %v1596_v13 = vsel %vm1587_vm5, %v1586_v26, -inf }
 0x674   :  { %v1597_v2 = vmax.f32 %v1590_v53, %v1596_v13 }
 0x676   :  { %v1599_v39 = vmax.f32 %v1597_v2, %v1591_v10 }
 0x678   :  { %v1600_v59 = vmax.f32 %v1598_v62, %v1599_v39  ;;  %v57_v39 = vld [vmem:[%s6779_s11 + $0x20] sm:$0xff] }
 0x67a   :  { %v1601_v8 = vrot.slane %v1600_v59, 4 }
 0x67c   :  { %v1602_v44 = vmax.f32 %v1600_v59, %v1601_v8  ;;  %v58_v59 = vld [vmem:[%s6779_s11 + $0x30] sm:$0xff] }
 0x67e   :  { %v1603_v12 = vrot.slane %v1602_v44, 2 }
 0x680   :  { %v1604_v15 = vmax.f32 %v1602_v44, %v1603_v12  ;;  %v1898_v44 = vrot.slane %v57_v39, 6  ;;  %v1899_v12 = vrot.slane %v58_v59, 6 }
 0x682   :  { %v1605_v35 = vrot.slane %v1604_v15, 1 }
 0x684   :  { %v1606_v58 = vmax.f32 %v1604_v15, %v1605_v35 }
 0x686   :  { %v1613_v37 = vsub.f32 %v1586_v26, %v1606_v58  ;;  %v1607_v42 = vsub.f32 %v1580_v46, %v1606_v58  ;;  %v1608_v51 = vsub.f32 %v1581_v30, %v1606_v58  ;;  %v1609_v29 = vsub.f32 %v1582_v14, %v1606_v58 }
 0x687   :  { %v1610_v47 = vsub.f32 %v1583_v61, %v1606_v58  ;;  %v1611_v11 = vsub.f32 %v1584_v50, %v1606_v58  ;;  %v1612_v56 = vsub.f32 %v1585_v52, %v1606_v58  ;;  %v1900_v58 = vsel %vm1897_vm6, %v1898_v44, %v1899_v12 }
 0x688   :  { %v1614_v0 = vmul.f32 1.442695, %v1607_v42  ;;  %v1616_v41 = vmul.f32 1.442695, %v1608_v51  ;;  %v1618_v53 = vmul.f32 1.442695, %v1609_v29 }
 0x689   :  { %v1620_v13 = vmul.f32 1.442695, %v1610_v47  ;;  %v1622_v62 = vmul.f32 1.442695, %v1611_v11  ;;  %v1624_v2 = vmul.f32 1.442695, %v1612_v56 }
 0x68a   :  { %4850 = vpow2.f32 %v1614_v0  ;;  %v1626_v30 = vmul.f32 1.442695, %v1613_v37  ;;  %v5868_v37 = vpop.trf.xlu1  ;;  %v4998_v29 = vld [vmem:[%s6770_s2] sm:$0xff]  ;;  %v4999_v56 = vld [vmem:[%s6770_s2 + $0x8] sm:$0xff] }
 0x68b   :  { %4852 = vpow2.f32 %v1616_v41  ;;  %6812 = vst [vmem:[#allocation18_spill] sm:$0xff] %v5868_v37 }
 0x68c   :  { %4854 = vpow2.f32 %v1618_v53  ;;  %v5000_v53 = vld [vmem:[%s6770_s2 + $0x10] sm:$0xff] }
 0x68d   :  { %4856 = vpow2.f32 %v1620_v13 }
 0x68e   :  { %4858 = vpow2.f32 %v1622_v62 }
 0x68f   :  { %4860 = vpow2.f32 %v1624_v2  ;;  %v5001_v2 = vld [vmem:[%s6770_s2 + $0x18] sm:$0xff] }
 0x690   :  { %4862 = vpow2.f32 %v1626_v30 }
 0x694   :  { %v5839_v35 = vpop.eup %4850 }
 0x695   :  { %v5841_v46 = vpop.eup %4852 }
 0x696   :  { %v5843_v61 = vpop.eup %4854  ;;  %v4671_v50 = vpack.c.bf16 %v5841_v46, %v5839_v35 }
 0x697   :  { %v5847_v52 = vpop.eup %4856 }
 0x698   :  { %4672 = vmatpush3.bf16.msra.mxu0 %v4671_v50  ;;  %v5850_v14 = vpop.eup %4858  ;;  %v4674_v26 = vpack.c.bf16 %v5847_v52, %v5843_v61 }
 0x699   :  { %4673 = vmatprep.subr.bf16.mxu0 %v6810_v54  ;;  %v5854_v10 = vpop.eup %4860 }
 0x69a   :  { %v4677_v8 = vpack.c.bf16 %v5854_v10, %v5850_v14  ;;  %v5866_v15 = vpop.eup %4862 }
 0x69c   :  { %4675 = vmatpush3.bf16.msra.mxu0 %v4674_v26  ;;  %v5002_v26 = vld [vmem:[%s6770_s2 + $0x20] sm:$0xff] }
 0x69d   :  { %4676 = vmatprep.subr.bf16.mxu0 %v6810_v54 }
 0x6a0   :  { %4678 = vmatpush3.bf16.msra.mxu0 %v4677_v8  ;;  %v5003_v8 = vld [vmem:[%s6770_s2 + $0x28] sm:$0xff] }
 0x6a1   :  { %4343 = vmatprep.subr.mxu0 %v5699_v3 }
 0x6a4   :  { %4344 = vmatpush3.msra.mxu0 %v5866_v15 }
 0x6a5   :  { %4346 = vmatmul.mubr.msk.f32.vlgmr.msra.gmra.mrb[60].mxu0 %vm1660_vm7, %v5868_v37  ;;  %4371 = vmatprep.subr.mxu0 %v5699_v3 }
 0x6a6   :  { %4372 = vmatpush3.msk.msra.mxu0 %vm1922_vm8, %v1900_v58  ;;  %4373 = vmatprep.mubr.msk.f32.mxu0 %vm5061_vm2, %v5699_v3  ;;  %v5004_v58 = vld [vmem:[%s6770_s2 + $0x30] sm:$0xff] }
 0x6a9   :  { %4374 = vmatmul.mubr.msk.f32.vlgmr.msra.gmra.mrb[62].mxu0 %vm718_vm3, %v5368_v19 }
 0x6aa   :  { %4376 = vmatprep.mubr.msk.f32.mxu0 %vm5061_vm2, %v5699_v3 }
 0x6ad   :  { %4377 = vmatmul.mubr.msk.f32.gmra.mrb[64].mxu0 %vm718_vm3, %v5373_v23 }
 0x6ae   :  { %4379 = vmatprep.mubr.msk.f32.mxu0 %vm5061_vm2, %v5699_v3 }
 0x6b1   :  { %4380 = vmatmul.mubr.msk.f32.gmra.mrb[66].mxu0 %vm718_vm3, %v5378_v31 }
 0x6b2   :  { %4382 = vmatprep.mubr.msk.f32.mxu0 %vm5061_vm2, %v5699_v3 }
 0x6b5   :  { %4383 = vmatmul.mubr.msk.f32.gmra.mrb[68].mxu0 %vm718_vm3, %v5383_v36 }
 0x6b6   :  { %4385 = vmatprep.mubr.msk.f32.mxu0 %vm5061_vm2, %v5699_v3 }
 0x6b9   :  { %4386 = vmatmul.mubr.msk.f32.gmra.mrb[70].mxu0 %vm718_vm3, %v5388_v40 }
 0x6ba   :  { %4388 = vmatprep.mubr.msk.f32.mxu0 %vm5061_vm2, %v5699_v3 }
 0x6bd   :  { %4389 = vmatmul.mubr.msk.f32.gmra.mrb[72].mxu0 %vm718_vm3, %v5393_v48 }
 0x6be   :  { %4391 = vmatprep.mubr.msk.f32.mxu0 %vm5061_vm2, %v5699_v3 }
 0x6c1   :  { %4392 = vmatmul.mubr.msk.f32.gmra.mrb[74].mxu0 %vm718_vm3, %v5398_v55 }
 0x6c2   :  { %2318 = vmatprep.mubr.f32.mxu0 %v5699_v3 }
 0x778   :  { %v1730_v42 = vpop.f32.mrb[60].mxu0 }
 0x779   :  { %v4347_v51 = vpop.f32.mrb[61].mxu0  ;;  %4349 = vmatpush3.msra.mxu1 %v1730_v42 }
 0x77a   :  { %4351 = vmatmul.mubr.msk.f32.vlgmr.msra.gmra.mrb[54].mxu1 %vm198_vm1, %v4998_v29  ;;  %4679 = vmatprep.subr.bf16.mxu1 %v6810_v54 }
 0x77b   :  { %4353 = vmatprep.mubr.msk.f32.mxu1 %vm5061_vm2, %v5699_v3 }
 0x77c   :  { %v5910_v47 = vpop.f32.mrb[62].mxu0 }
 0x77d   :  { %v4375_v11 = vpop.f32.mrb[63].mxu0 }
 0x77e   :  { %4354 = vmatmul.mubr.msk.f32.gmra.mrb[56].mxu1 %vm198_vm1, %v4999_v56 }
 0x77f   :  { %4356 = vmatprep.mubr.msk.f32.mxu1 %vm5061_vm2, %v5699_v3 }
 0x780   :  { %v5918_v0 = vpop.f32.mrb[64].mxu0 }
 0x781   :  { %v4378_v41 = vpop.f32.mrb[65].mxu0 }
 0x782   :  { %4357 = vmatmul.mubr.msk.f32.gmra.mrb[58].mxu1 %vm198_vm1, %v5000_v53 }
 0x783   :  { %4359 = vmatprep.mubr.msk.f32.mxu1 %vm5061_vm2, %v5699_v3 }
 0x784   :  { %v5926_v13 = vpop.f32.mrb[66].mxu0 }
 0x785   :  { %v4381_v62 = vpop.f32.mrb[67].mxu0 }
 0x786   :  { %4360 = vmatmul.mubr.msk.f32.gmra.mrb[60].mxu1 %vm198_vm1, %v5001_v2 }
 0x787   :  { %4362 = vmatprep.mubr.msk.f32.mxu1 %vm5061_vm2, %v5699_v3 }
 0x788   :  { %v5934_v30 = vpop.f32.mrb[68].mxu0 }
 0x789   :  { %v4384_v50 = vpop.f32.mrb[69].mxu0 }
 0x78a   :  { %4363 = vmatmul.mubr.msk.f32.gmra.mrb[62].mxu1 %vm198_vm1, %v5002_v26 }
 0x78b   :  { %4365 = vmatprep.mubr.msk.f32.mxu1 %vm5061_vm2, %v5699_v3 }
 0x78c   :  { %v5942_v39 = vpop.f32.mrb[70].mxu0 }
 0x78d   :  { %v4387_v59 = vpop.f32.mrb[71].mxu0 }
 0x78e   :  { %4366 = vmatmul.mubr.msk.f32.gmra.mrb[64].mxu1 %vm198_vm1, %v5003_v8 }
 0x78f   :  { %4368 = vmatprep.mubr.msk.f32.mxu1 %vm5061_vm2, %v5699_v3 }
 0x790   :  { %v5950_v44 = vpop.f32.mrb[72].mxu0 }
 0x791   :  { %v4390_v12 = vpop.f32.mrb[73].mxu0 }
 0x792   :  { %4369 = vmatmul.mubr.msk.f32.gmra.mrb[66].mxu1 %vm198_vm1, %v5004_v58 }
 0x793   :  { %4402 = vmatprep.mubr.msk.f32.mxu1 %vm5061_vm2, %v5699_v3 }
 0x794   :  { %v5958_v42 = vpop.f32.mrb[74].mxu0 }
 0x795   :  { %v4393_v51 = vpop.f32.mrb[75].mxu0 }
 0x84d   :  { %v1800_v29 = vpop.f32.mrb[54].mxu1 }
 0x84e   :  { %v1801_v11 = vadd.f32 1e-08, %v1800_v29  ;;  %v4352_v56 = vpop.f32.mrb[55].mxu1 }
 0x850   :  { %4864 = vrcp.f32 %v1801_v11 }
 0x851   :  { %v1805_v41 = vpop.f32.mrb[56].mxu1 }
 0x852   :  { %v1806_v53 = vadd.f32 1e-08, %v1805_v41  ;;  %v4355_v62 = vpop.f32.mrb[57].mxu1 }
 0x854   :  { %4866 = vrcp.f32 %v1806_v53 }
 0x855   :  { %v1810_v2 = vpop.f32.mrb[58].mxu1 }
 0x856   :  { %v1811_v50 = vadd.f32 1e-08, %v1810_v2  ;;  %v4358_v26 = vpop.f32.mrb[59].mxu1 }
 0x858   :  { %4868 = vrcp.f32 %v1811_v50 }
 0x859   :  { %v1815_v59 = vpop.f32.mrb[60].mxu1 }
 0x85a   :  { %v4865_v8 = vpop.eup %4864  ;;  %v1816_v12 = vadd.f32 1e-08, %v1815_v59  ;;  %v4361_v58 = vpop.f32.mrb[61].mxu1 }
 0x85b   :  { %v5961_v37 = vmul.f32 %v4865_v8, %v5839_v35 }
 0x85c   :  { %4870 = vrcp.f32 %v1816_v12 }
 0x85d   :  { %v1820_v51 = vpop.f32.mrb[62].mxu1  ;;  %v1848_v29 = vsel %vm1587_vm5, %v5961_v37, 0.0 }
 0x85e   :  { %v4867_v11 = vpop.eup %4866  ;;  %v1821_v56 = vadd.f32 1e-08, %v1820_v51  ;;  %1849 = vadd.xlane.f32.xlu0 %v1848_v29  ;;  %v4364_v41 = vpop.f32.mrb[63].mxu1 }
 0x85f   :  { %v5966_v53 = vmul.f32 %v4867_v11, %v5841_v46 }
 0x860   :  { %4872 = vrcp.f32 %v1821_v56 }
 0x861   :  { %v1825_v62 = vpop.f32.mrb[64].mxu1  ;;  %v1851_v2 = vsel %vm1587_vm5, %v5966_v53, 0.0 }
 0x862   :  { %v4869_v50 = vpop.eup %4868  ;;  %v1826_v35 = vadd.f32 1e-08, %v1825_v62  ;;  %1852 = vadd.xlane.f32.xlu0 %v1851_v2  ;;  %v4367_v26 = vpop.f32.mrb[65].mxu1 }
 0x863   :  { %v5971_v59 = vmul.f32 %v4869_v50, %v5843_v61  ;;  %v2093_v26 = vld [vmem:[%s6776_s8 + $0x68] sm:$0xff] }
 0x864   :  { %4874 = vrcp.f32 %v1826_v35 }
 0x865   :  { %v1830_v8 = vpop.f32.mrb[66].mxu1  ;;  %v1854_v12 = vsel %vm1587_vm5, %v5971_v59, 0.0 }
 0x866   :  { %v4871_v58 = vpop.eup %4870  ;;  %v1831_v46 = vadd.f32 1e-08, %v1830_v8  ;;  %1855 = vadd.xlane.f32.xlu0 %v1854_v12  ;;  %v4370_v51 = vpop.f32.mrb[67].mxu1  ;;  %v2095_v12 = vld [vmem:[%s6776_s8 + $0x108] sm:$0xff] }
 0x867   :  { %v5976_v29 = vmul.f32 %v4871_v58, %v5847_v52 }
 0x868   :  { %4876 = vrcp.f32 %v1831_v46 }
 0x869   :  { %v1857_v11 = vsel %vm1587_vm5, %v5976_v29, 0.0 }
 0x86a   :  { %v4873_v56 = vpop.eup %4872  ;;  %1858 = vadd.xlane.f32.xlu0 %v1857_v11 }
 0x86b   :  { %v5981_v61 = vmul.f32 %v4873_v56, %v5850_v14  ;;  %v6033_v56 = vrot.slane %v5814_v28, %v5198_v34 }
 0x86d   :  { %v1860_v41 = vsel %vm1587_vm5, %v5981_v61, 0.0 }
 0x86e   :  { %v4875_v62 = vpop.eup %4874  ;;  %1861 = vadd.xlane.f32.xlu0 %v1860_v41 }
 0x86f   :  { %v5986_v2 = vmul.f32 %v4875_v62, %v5854_v10  ;;  %v2092_v10 = vld [vmem:[%s6776_s8 + $0x18] sm:$0xff] }
 0x870   :  { %v4680_v8 = vpack.c.bf16 %v2093_v26, %v2092_v10 }
 0x871   :  { %v1863_v52 = vsel %vm1587_vm5, %v5986_v2, 0.0 }
 0x872   :  { %v4877_v50 = vpop.eup %4876  ;;  %1864 = vadd.xlane.f32.xlu0 %v1863_v52  ;;  %4681 = vmatpush3.bf16.msra.mxu1 %v4680_v8 }
 0x873   :  { %v5991_v35 = vmul.f32 %v4877_v50, %v5866_v15  ;;  %4682 = vmatprep.subr.bf16.mxu1 %v6810_v54  ;;  %v2094_v15 = vld [vmem:[%s6776_s8 + $0xb8] sm:$0xff] }
 0x874   :  { %v4683_v58 = vpack.c.bf16 %v2095_v12, %v2094_v15 }
 0x875   :  { %v1866_v14 = vsel %vm1587_vm5, %v5991_v35, 0.0 }
 0x876   :  { %1867 = vadd.xlane.f32.xlu0 %v1866_v14  ;;  %4684 = vmatpush3.bf16.msra.mxu1 %v4683_v58 }
 0x877   :  { %4693 = vmatprep.subr.bf16.mxu1 %v6810_v54 }
 0x88c   :  { %2976 = vrot.lane.b32.xlu0 %v5572_v5, %s5066_s6 }
 0x890   :  { %3067 = vrot.lane.b32.xlu0 %v5572_v5, %s5067_s20  ;;  %v1880_v5 = vrot.slane %v5814_v28, %v5189_v27 }
 0x894   :  { %3069 = vrot.lane.b32.xlu0 %v5575_v1, %s5067_s20 }
 0x898   :  { %2980 = vrot.lane.b32.xlu0 %v5578_v33, %s5066_s6 }
 0x89c   :  { %2982 = vrot.lane.b32.xlu0 %v5580_v16, %s5066_s6 }
 0x8a0   :  { %3071 = vrot.lane.b32.xlu0 %v5578_v33, %s5067_s20 }
 0x8a4   :  { %2984 = vrot.lane.b32.xlu0 %v5585_v9, %s5066_s6 }
 0x8a8   :  { %3075 = vrot.lane.b32.xlu0 %v5585_v9, %s5067_s20 }
 0x8ac   :  { %2988 = vrot.lane.b32.xlu0 %v5593_v60, %s5066_s6 }
 0x8b0   :  { %2952 = vrot.lane.b32.xlu0 %v5578_v33, %s5068_s27 }
 0x8eb   :  { %v1850_v1 = vpop.xlane.xlu0 %1849 }
 0x8ec   :  { %v1870_v46 = vmul.f32 0.25, %v1850_v1 }
 0x8ee   :  { %v1881_v51 = vmul.f32 %v1880_v5, %v1870_v46 }
 0x8ef   :  { %v1853_v11 = vpop.xlane.xlu0 %1852 }
 0x8f0   :  { %v1888_v41 = vadd.f32 %v1881_v51, %v5818_v43  ;;  %v1871_v62 = vmul.f32 0.25, %v1853_v11 }
 0x8f2   :  { %v2025_v52 = vadd.f32 %v5910_v47, %v1888_v41  ;;  %v1882_v50 = vmul.f32 %v1880_v5, %v1871_v62 }
 0x8f3   :  { %v1856_v14 = vpop.xlane.xlu0 %1855 }
 0x8f4   :  { %v6038_v10 = vadd.f32 %v6033_v56, %v2025_v52  ;;  %v1889_v26 = vadd.f32 %v1882_v50, %v5820_v63  ;;  %v1872_v8 = vmul.f32 0.25, %v1856_v14 }
 0x8f6   :  { %v3931_v15 = vmul.f32 -1.442695, %v6038_v10  ;;  %v2026_v12 = vadd.f32 %v5918_v0, %v1889_v26  ;;  %v1883_v58 = vmul.f32 %v1880_v5, %v1872_v8 }
 0x8f7   :  { %v1859_v1 = vpop.xlane.xlu0 %1858 }
 0x8f8   :  { %4878 = vpow2.f32 %v3931_v15  ;;  %v6044_v43 = vadd.f32 %v6033_v56, %v2026_v12  ;;  %v1890_v47 = vadd.f32 %v1883_v58, %v5822_v4  ;;  %v1873_v46 = vmul.f32 0.25, %v1859_v1 }
 0x8fa   :  { %v3932_v51 = vmul.f32 -1.442695, %v6044_v43  ;;  %v2027_v11 = vadd.f32 %v5926_v13, %v1890_v47  ;;  %v1884_v41 = vmul.f32 %v1880_v5, %v1873_v46 }
 0x8fb   :  { %v1862_v63 = vpop.xlane.xlu0 %1861 }
 0x8fc   :  { %4880 = vpow2.f32 %v3932_v51  ;;  %v6050_v62 = vadd.f32 %v6033_v56, %v2027_v11  ;;  %v1891_v0 = vadd.f32 %v1884_v41, %v5824_v21  ;;  %v1874_v52 = vmul.f32 0.25, %v1862_v63 }
 0x8fe   :  { %v3933_v50 = vmul.f32 -1.442695, %v6050_v62  ;;  %v2028_v14 = vadd.f32 %v5934_v30, %v1891_v0  ;;  %v1885_v26 = vmul.f32 %v1880_v5, %v1874_v52 }
 0x8ff   :  { %v1865_v4 = vpop.xlane.xlu0 %1864 }
 0x900   :  { %4882 = vpow2.f32 %v3933_v50  ;;  %v6056_v8 = vadd.f32 %v6033_v56, %v2028_v14  ;;  %v1892_v13 = vadd.f32 %v1885_v26, %v5826_v18  ;;  %v1875_v15 = vmul.f32 0.25, %v1865_v4  ;;  %v2979_v4 = vpop.permute.xlu1 %2978 }
 0x902   :  { %v4879_v12 = vpop.eup %4878  ;;  %v3934_v58 = vmul.f32 -1.442695, %v6056_v8  ;;  %v2029_v1 = vadd.f32 %v5942_v39, %v1892_v13  ;;  %v1886_v21 = vmul.f32 %v1880_v5, %v1875_v15 }
 0x903   :  { %v2064_v47 = vadd.f32 1.0, %v4879_v12  ;;  %v1868_v46 = vpop.xlane.xlu0 %1867  ;;  %v2998_v12 = vmul.f32 %v2979_v4, %v5373_v23 }
 0x904   :  { %4884 = vpow2.f32 %v3934_v58  ;;  %v6062_v30 = vadd.f32 %v6033_v56, %v2029_v1  ;;  %v1893_v51 = vadd.f32 %v1886_v21, %v5828_v6  ;;  %v1876_v11 = vmul.f32 0.25, %v1868_v46 }
 0x905   :  { %4886 = vrcp.f32 %v2064_v47 }
 0x906   :  { %v4881_v41 = vpop.eup %4880  ;;  %v3935_v18 = vmul.f32 -1.442695, %v6062_v30  ;;  %v2030_v63 = vadd.f32 %v5950_v44, %v1893_v51  ;;  %v1887_v0 = vmul.f32 %v1880_v5, %v1876_v11 }
 0x907   :  { %v2065_v52 = vadd.f32 1.0, %v4881_v41  ;;  %v2977_v50 = vpop.permute.xlu0 %2976 }
 0x908   :  { %4888 = vpow2.f32 %v3935_v18  ;;  %v6068_v39 = vadd.f32 %v6033_v56, %v2030_v63  ;;  %v1894_v14 = vadd.f32 %v1887_v0, %v5832_v7  ;;  %v2997_v26 = vmul.f32 %v2977_v50, %v5368_v19 }
 0x909   :  { %4890 = vrcp.f32 %v2065_v52 }
 0x90a   :  { %v4883_v6 = vpop.eup %4882  ;;  %v3936_v13 = vmul.f32 -1.442695, %v6068_v39  ;;  %v2031_v15 = vadd.f32 %v5958_v42, %v1894_v14  ;;  %3011 = vrot.lane.b32.xlu1 %v2997_v26, %s5068_s27 }
 0x90b   :  { %v2066_v44 = vadd.f32 1.0, %v4883_v6  ;;  %v3068_v5 = vpop.permute.xlu0 %3067 }
 0x90c   :  { %4892 = vpow2.f32 %v3936_v13  ;;  %v2042_v58 = vadd.f32 %v6033_v56, %v2031_v15  ;;  %v3088_v42 = vmul.f32 %v3068_v5, %v5368_v19 }
 0x90d   :  { %4894 = vrcp.f32 %v2066_v44 }
 0x90e   :  { %v4885_v7 = vpop.eup %4884  ;;  %v3937_v1 = vmul.f32 -1.442695, %v2042_v58  ;;  %3013 = vrot.lane.b32.xlu1 %v2998_v12, %s5068_s27 }
 0x90f   :  { %v4887_v21 = vpop.eup %4886  ;;  %v2067_v47 = vadd.f32 1.0, %v4885_v7  ;;  %v3070_v46 = vpop.permute.xlu0 %3069 }
 0x910   :  { %v2085_v51 = vmul.f32 %v4887_v21, %v6038_v10  ;;  %4896 = vpow2.f32 %v3937_v1  ;;  %v3089_v63 = vmul.f32 %v3070_v46, %v5373_v23 }
 0x911   :  { %4898 = vrcp.f32 %v2067_v47  ;;  %v3074_v47 = vpop.permute.xlu1 %3073 }
 0x912   :  { %v4889_v11 = vpop.eup %4888  ;;  %3102 = vrot.lane.b32.xlu1 %v3088_v42, %s5069_s14  ;;  %4403 = vmatmul.mubr.msk.f32.vlgmr.msra.gmra.mrb[68].mxu1 %vm83_vm0, %v2085_v51 }
 0x913   :  { %v4891_v56 = vpop.eup %4890  ;;  %v2068_v41 = vadd.f32 1.0, %v4889_v11  ;;  %v2981_v18 = vpop.permute.xlu0 %2980  ;;  %4405 = vmatprep.mubr.msk.f32.mxu1 %vm5061_vm2, %v5699_v3 }
 0x914   :  { %v2086_v0 = vmul.f32 %v4891_v56, %v6044_v43  ;;  %v2222_v56 = vld [vmem:[%s6776_s8 + $0x28] sm:$0xff] }
 0x915   :  { %4900 = vrcp.f32 %v2068_v41  ;;  %v2987_v51 = vpop.permute.xlu1 %2986  ;;  %v2225_v41 = vld [vmem:[%s6776_s8 + $0x78] sm:$0xff] }
 0x916   :  { %v4893_v10 = vpop.eup %4892  ;;  %3104 = vrot.lane.b32.xlu1 %v3089_v63, %s5069_s14  ;;  %4406 = vmatmul.mubr.msk.f32.gmra.mrb[70].mxu1 %vm83_vm0, %v2086_v0  ;;  %v2224_v63 = vld [vmem:[%s6776_s8 + $0x70] sm:$0xff] }
 0x917   :  { %v4895_v52 = vpop.eup %4894  ;;  %v2069_v50 = vadd.f32 1.0, %v4893_v10  ;;  %v2983_v14 = vpop.permute.xlu0 %2982  ;;  %4408 = vmatprep.mubr.msk.f32.mxu1 %vm5061_vm2, %v5699_v3  ;;  %v2223_v0 = vld [vmem:[%s6776_s8 + $0x30] sm:$0xff]  ;;  %v2226_v10 = vld [vmem:[%s6776_s8 + $0x80] sm:$0xff] }
 0x918   :  { %v2087_v26 = vmul.f32 %v4895_v52, %v6050_v62 }
 0x919   :  { %4902 = vrcp.f32 %v2069_v50  ;;  %v3078_v11 = vpop.permute.xlu1 %3077  ;;  %v4694_v50 = vpack.c.bf16 %v2226_v10, %v2223_v0 }
 0x91a   :  { %v4897_v4 = vpop.eup %4896  ;;  %2954 = vrot.lane.b32.xlu1 %v5580_v16, %s5068_s27  ;;  %4409 = vmatmul.mubr.msk.f32.gmra.mrb[72].mxu1 %vm83_vm0, %v2087_v26  ;;  %v2231_v26 = vld [vmem:[%s6776_s8 + $0x118] sm:$0xff] }
 0x91b   :  { %v4899_v43 = vpop.eup %4898  ;;  %v2070_v6 = vadd.f32 1.0, %v4897_v4  ;;  %v3072_v13 = vpop.permute.xlu0 %3071  ;;  %4411 = vmatprep.mubr.msk.f32.mxu1 %vm5061_vm2, %v5699_v3  ;;  %v3093_v4 = vmul.f32 %v3078_v11, %v5393_v48  ;;  %4695 = vmatpush3.bf16.msra.mxu1 %v4694_v50 }
 0x91c   :  { %v3090_v15 = vmul.f32 %v3072_v13, %v5378_v31  ;;  %v2088_v44 = vmul.f32 %v4899_v43, %v6056_v8  ;;  %4696 = vmatprep.subr.bf16.mxu1 %v6810_v54 }
 0x91d   :  { %4904 = vrcp.f32 %v2070_v6  ;;  %v3080_v6 = vpop.permute.xlu1 %3079 }
 0x91e   :  { %3043 = vrot.lane.b32.xlu1 %v5578_v33, %s5069_s14  ;;  %3106 = vrot.lane.b32.xlu0 %v3090_v15, %s5069_s14  ;;  %v2999_v33 = vmul.f32 %v2981_v18, %v5378_v31  ;;  %v2221_v18 = vld [vmem:[%s6776_s8 + $0x20] sm:$0xff]  ;;  %v3094_v13 = vmul.f32 %v3080_v6, %v5398_v55 }
 0x91f   :  { %v4901_v62 = vpop.eup %4900  ;;  %4412 = vmatmul.mubr.msk.f32.gmra.mrb[74].mxu1 %vm83_vm0, %v2088_v44  ;;  %v2985_v12 = vpop.permute.xlu0 %2984  ;;  %v4687_v52 = vpack.c.bf16 %v2224_v63, %v2221_v18  ;;  %v2227_v44 = vld [vmem:[%s6776_s8 + $0xc0] sm:$0xff]  ;;  %v2099_v63 = vrot.slane %v5814_v28, %v5485_v57 }
 0x920   :  { %4414 = vmatprep.mubr.msk.f32.mxu1 %vm5061_vm2, %v5699_v3  ;;  %v2089_v5 = vmul.f32 %v4901_v62, %v6062_v30  ;;  %v3000_v30 = vmul.f32 %v2983_v14, %v5383_v36  ;;  %v3001_v1 = vmul.f32 %v2985_v12, %v5388_v40  ;;  %v2228_v14 = vld [vmem:[%s6776_s8 + $0xc8] sm:$0xff]  ;;  %v2230_v62 = vld [vmem:[%s6776_s8 + $0x110] sm:$0xff] }
 0x921   :  { %v4689_v43 = vpack.c.bf16 %v2231_v26, %v2228_v14  ;;  %v2949_v15 = vpop.permute.xlu1 %2948  ;;  %v6209_v14 = vld [vmem:[#allocation5] sm:$0xff] }
 0x922   :  { %3045 = vrot.lane.b32.xlu1 %v5580_v16, %s5069_s14  ;;  %2956 = vrot.lane.b32.xlu0 %v5585_v9, %s5068_s27 }
 0x923   :  { %v4903_v8 = vpop.eup %4902  ;;  %4415 = vmatmul.mubr.msk.f32.gmra.mrb[76].mxu1 %vm83_vm0, %v2089_v5  ;;  %v3076_v46 = vpop.permute.xlu0 %3075  ;;  %v2229_v5 = vld [vmem:[%s6776_s8 + $0xd0] sm:$0xff] }
 0x924   :  { %4417 = vmatprep.mubr.msk.f32.mxu1 %vm5061_vm2, %v5699_v3  ;;  %v2090_v7 = vmul.f32 %v4903_v8, %v6068_v39  ;;  %v3092_v39 = vmul.f32 %v3076_v46, %v5388_v40  ;;  %v4691_v8 = vpack.c.bf16 %v2230_v62, %v2227_v44 }
 0x926   :  { %3015 = vrot.lane.b32.xlu1 %v2999_v33, %s5068_s27  ;;  %3047 = vrot.lane.b32.xlu0 %v5585_v9, %s5069_s14  ;;  %v3091_v9 = vmul.f32 %v3074_v47, %v5383_v36  ;;  %v2951_v33 = vpop.permute.xlu1 %2950 }
 0x927   :  { %v4905_v16 = vpop.eup %4904  ;;  %4418 = vmatmul.mubr.msk.f32.gmra.mrb[78].mxu1 %vm83_vm0, %v2090_v7  ;;  %v2970_v47 = vmul.f32 %v2951_v33, %v5373_v23 }
 0x928   :  { %4420 = vmatprep.mubr.msk.f32.mxu1 %vm5061_vm2, %v5699_v3  ;;  %v2091_v21 = vmul.f32 %v4905_v16, %v2042_v58  ;;  %v2989_v58 = vpop.permute.xlu0 %2988 }
 0x929   :  { %v3003_v42 = vmul.f32 %v2989_v58, %v5398_v55 }
 0x92a   :  { %3017 = vrot.lane.b32.xlu1 %v3000_v30, %s5068_s27  ;;  %3019 = vrot.lane.b32.xlu0 %v3001_v1, %s5068_s27  ;;  %v3040_v7 = vpop.permute.xlu1 %3039  ;;  %v2969_v30 = vmul.f32 %v2949_v15, %v5368_v19 }
 0x92b   :  { %4421 = vmatmul.mubr.msk.f32.gmra.mrb[80].mxu1 %vm83_vm0, %v2091_v21 }
 0x92c   :  { %4431 = vmatprep.mubr.msk.f32.mxu1 %vm5061_vm2, %v5699_v3  ;;  %v3002_v3 = vmul.f32 %v2987_v51, %v5393_v48 }
 0x92e   :  { %3108 = vrot.lane.b32.xlu1 %v3091_v9, %s5069_s14  ;;  %3110 = vrot.lane.b32.xlu0 %v3092_v39, %s5069_s14  ;;  %v3042_v16 = vpop.permute.xlu1 %3041  ;;  %v3060_v39 = vmul.f32 %v3040_v7, %v5368_v19 }
 0x932   :  { %2958 = vrot.lane.b32.xlu1 %v5587_v20, %s5068_s27  ;;  %2960 = vrot.lane.b32.xlu0 %v5593_v60, %s5068_s27 }
 0x936   :  { %3049 = vrot.lane.b32.xlu1 %v5587_v20, %s5069_s14  ;;  %3023 = vrot.lane.b32.xlu0 %v3003_v42, %s5068_s27  ;;  %v4685_v20 = vpack.c.bf16 %v2225_v41, %v2222_v56  ;;  %v3061_v42 = vmul.f32 %v3042_v16, %v5373_v23 }
 0x938   :  { %4686 = vmatprep.subr.bf16.mxu0 %v4685_v20 }
 0x939   :  { %4688 = vmatpush1.bf16.msra.mxu0 %v4687_v52 }
 0x93a   :  { %3021 = vrot.lane.b32.xlu1 %v3002_v3, %s5068_s27  ;;  %4690 = vmatprep.subr.bf16.mxu0 %v4689_v43 }
 0x93d   :  { %4692 = vmatpush1.bf16.msra.mxu0 %v4691_v8 }
 0x93e   :  { %3112 = vrot.lane.b32.xlu1 %v3093_v4, %s5069_s14  ;;  %4699 = vmatprep.subr.bf16.mxu0 %v6810_v54 }
 0x942   :  { %3051 = vrot.lane.b32.xlu1 %v5593_v60, %s5069_s14  ;;  %v2232_v60 = vld [vmem:[%s6776_s8 + $0x120] sm:$0xff] }
 0x943   :  { %v4697_v12 = vpack.c.bf16 %v2232_v60, %v2229_v5 }
 0x945   :  { %4698 = vmatpush3.bf16.msra.mxu1 %v4697_v12 }
 0x946   :  { %3114 = vrot.lane.b32.xlu1 %v3094_v13, %s5069_s14  ;;  %4705 = vmatprep.subr.bf16.mxu1 %v6810_v54 }
 0x97c   :  { %v3012_v1 = vpop.permute.xlu1 %3011 }
 0x97d   :  { %v3032_v21 = vsub.f32 %v2969_v30, %v3012_v1  ;;  %v2634_v1 = vld [vmem:[%s6776_s8 + $0x38] sm:$0xff] }
 0x97f   :  { %3137 = vrot.lane.b32.xlu0 %v3032_v21, %s5068_s27 }
 0x980   :  { %v3014_v46 = vpop.permute.xlu1 %3013 }
 0x981   :  { %v6189_v9 = vsub.f32 %v2970_v47, %v3014_v46  ;;  %v2636_v46 = vld [vmem:[%s6776_s8 + $0xd8] sm:$0xff] }
 0x983   :  { %3139 = vrot.lane.b32.xlu1 %v6189_v9, %s5068_s27 }
 0x984   :  { %v3103_v58 = vpop.permute.xlu1 %3102 }
 0x985   :  { %v3123_v51 = vsub.f32 %v3060_v39, %v3103_v58  ;;  %v2637_v39 = vld [vmem:[%s6776_s8 + $0x128] sm:$0xff] }
 0x986   :  { %v4703_v58 = vpack.c.bf16 %v2637_v39, %v2636_v46 }
 0x987   :  { %3165 = vrot.lane.b32.xlu1 %v3123_v51, %s5068_s27  ;;  %v2763_v51 = vld [vmem:[%s6776_s8 + $0x40] sm:$0xff] }
 0x988   :  { %v3105_v3 = vpop.permute.xlu1 %3104 }
 0x989   :  { %v3124_v11 = vsub.f32 %v3061_v42, %v3105_v3  ;;  %v2764_v42 = vld [vmem:[%s6776_s8 + $0x90] sm:$0xff] }
 0x98a   :  { %v4706_v3 = vpack.c.bf16 %v2764_v42, %v2763_v51 }
 0x98b   :  { %3186 = vrot.lane.b32.xlu1 %v3032_v21, %s5069_s14  ;;  %3167 = vrot.lane.b32.xlu0 %v3124_v11, %s5068_s27  ;;  %v2635_v21 = vld [vmem:[%s6776_s8 + $0x88] sm:$0xff]  ;;  %v2765_v11 = vld [vmem:[%s6776_s8 + $0xe0] sm:$0xff] }
 0x98c   :  { %v6198_v56 = vpop.permute.xlu1 %2954  ;;  %v4700_v47 = vpack.c.bf16 %v2635_v21, %v2634_v1 }
 0x990   :  { %v6200_v41 = vpop.permute.xlu1 %3043 }
 0x994   :  { %v3046_v18 = vpop.permute.xlu1 %3045 }
 0x995   :  { %v6203_v20 = vmul.f32 %v3046_v18, %v5383_v36  ;;  %v2766_v18 = vld [vmem:[%s6776_s8 + $0x130] sm:$0xff] }
 0x9e5   :  { %v2187_v0 = vpop.f32.mrb[68].mxu1 }
 0x9e6   :  { %v2188_v10 = vadd.f32 %v2187_v0, %v2099_v63  ;;  %v4404_v52 = vpop.f32.mrb[69].mxu1  ;;  %v6276_v0 = vld [vmem:[%s6779_s11 + $0x10] sm:$0xff] }
 0x9e8   :  { %3945 = vmatmul.mubr.msk.f32.vlgmr.msra.gmra.mrb[76].mxu0 %vm83_vm0, %v2188_v10  ;;  %4432 = vmatmul.mubr.msk.f32.vlgmr.msra.gmra.mrb[82].mxu1 %vm83_vm0, %v2188_v10  ;;  %v6813_v10 = vsub.s32 6, %v5178_v24 }
 0x9e9   :  { %v2192_v50 = vpop.f32.mrb[70].mxu1  ;;  %2324 = vmatprep.mubr.f32.mxu0 %v6209_v14  ;;  %4434 = vmatprep.mubr.msk.f32.mxu1 %vm5061_vm2, %v6209_v14 }
 0x9ea   :  { %v2193_v26 = vadd.f32 %v2192_v50, %v2099_v63  ;;  %v4407_v4 = vpop.f32.mrb[71].mxu1  ;;  %4701 = vmatpush3.bf16.msra.mxu0 %v4700_v47  ;;  %4707 = vmatpush3.bf16.msra.mxu1 %v4706_v3  ;;  %v6281_v52 = vrot.slane %v6276_v0, %v6813_v10  ;;  %v6285_v50 = vrot.slane %v6276_v0, %v5796_v17 }
 0x9eb   :  { %4702 = vmatprep.subr.bf16.mxu0 %v6810_v54  ;;  %4708 = vmatprep.subr.bf16.mxu1 %v6810_v54 }
 0x9ec   :  { %3946 = vmatmul.mubr.msk.f32.gmra.mrb[78].mxu0 %vm83_vm0, %v2193_v26  ;;  %4435 = vmatmul.mubr.msk.f32.gmra.mrb[84].mxu1 %vm83_vm0, %v2193_v26 }
 0x9ed   :  { %v2197_v28 = vpop.f32.mrb[72].mxu1  ;;  %2330 = vmatprep.mubr.f32.mxu0 %v6209_v14  ;;  %4437 = vmatprep.mubr.msk.f32.mxu1 %vm5061_vm2, %v6209_v14 }
 0x9ee   :  { %v2198_v43 = vadd.f32 %v2197_v28, %v2099_v63  ;;  %v4410_v6 = vpop.f32.mrb[73].mxu1  ;;  %4704 = vmatpush3.bf16.msra.mxu0 %v4703_v58 }
 0x9ef   :  { %4711 = vmatprep.subr.bf16.mxu0 %v6810_v54 }
 0x9f0   :  { %3947 = vmatmul.mubr.msk.f32.gmra.mrb[80].mxu0 %vm83_vm0, %v2198_v43  ;;  %4438 = vmatmul.mubr.msk.f32.gmra.mrb[86].mxu1 %vm83_vm0, %v2198_v43 }
 0x9f1   :  { %2336 = vmatprep.mubr.f32.mxu0 %v6209_v14  ;;  %4440 = vmatprep.mubr.msk.f32.mxu1 %vm5061_vm2, %v6209_v14 }
 0x9f2   :  { %v2202_v13 = vpop.f32.mrb[74].mxu1 }
 0x9f3   :  { %v2203_v15 = vadd.f32 %v2202_v13, %v2099_v63  ;;  %v4413_v44 = vpop.f32.mrb[75].mxu1 }
 0x9f5   :  { %3948 = vmatmul.mubr.msk.f32.gmra.mrb[82].mxu0 %vm83_vm0, %v2203_v15  ;;  %4441 = vmatmul.mubr.msk.f32.gmra.mrb[88].mxu1 %vm83_vm0, %v2203_v15 }
 0x9f6   :  { %v2207_v62 = vpop.f32.mrb[76].mxu1  ;;  %2342 = vmatprep.mubr.f32.mxu0 %v6209_v14  ;;  %4443 = vmatprep.mubr.msk.f32.mxu1 %vm5061_vm2, %v6209_v14 }
 0x9f7   :  { %v2208_v5 = vadd.f32 %v2207_v62, %v2099_v63  ;;  %v4416_v8 = vpop.f32.mrb[77].mxu1 }
 0x9f9   :  { %3949 = vmatmul.mubr.msk.f32.gmra.mrb[84].mxu0 %vm83_vm0, %v2208_v5  ;;  %4444 = vmatmul.mubr.msk.f32.gmra.mrb[90].mxu1 %vm83_vm0, %v2208_v5 }
 0x9fa   :  { %v2212_v60 = vpop.f32.mrb[78].mxu1  ;;  %2348 = vmatprep.mubr.f32.mxu0 %v6209_v14  ;;  %4446 = vmatprep.mubr.msk.f32.mxu1 %vm5061_vm2, %v6209_v14 }
 0x9fb   :  { %v2213_v12 = vadd.f32 %v2212_v60, %v2099_v63  ;;  %v4419_v33 = vpop.f32.mrb[79].mxu1 }
 0x9fd   :  { %3950 = vmatmul.mubr.msk.f32.gmra.mrb[86].mxu0 %vm83_vm0, %v2213_v12  ;;  %4447 = vmatmul.mubr.msk.f32.gmra.mrb[92].mxu1 %vm83_vm0, %v2213_v12 }
 0x9fe   :  { %v2217_v7 = vpop.f32.mrb[80].mxu1  ;;  %2354 = vmatprep.mubr.f32.mxu0 %v6209_v14  ;;  %4449 = vmatprep.mubr.msk.f32.mxu1 %vm5061_vm2, %v6209_v14 }
 0x9ff   :  { %v2218_v16 = vadd.f32 %v2217_v7, %v2099_v63  ;;  %v4422_v30 = vpop.f32.mrb[81].mxu1  ;;  %v4709_v63 = vpack.c.bf16 %v2766_v18, %v2765_v11 }
 0xa01   :  { %3951 = vmatmul.mubr.msk.f32.gmra.mrb[88].mxu0 %vm83_vm0, %v2218_v16  ;;  %4450 = vmatmul.mubr.msk.f32.gmra.mrb[94].mxu1 %vm83_vm0, %v2218_v16 }
 0xa02   :  { %4489 = vmatprep.mubr.msk.f32.mxu1 %vm5061_vm2, %v6209_v14  ;;  %4460 = vmatprep.mubr.msk.f32.mxu0 %vm5061_vm2, %v6209_v14 }
 0xa03   :  { %4710 = vmatpush3.bf16.msra.mxu1 %v4709_v63 }
 0xa04   :  { %4727 = vmatprep.subr.bf16.mxu1 %v6810_v54 }
 0xabb   :  { %v6287_v26 = vpop.f32.mrb[76].mxu0  ;;  %v2427_v4 = vpop.f32.mrb[82].mxu1 }
 0xabc   :  { %v6290_v28 = vadd.f32 %v6281_v52, %v2427_v4  ;;  %v2322_v43 = vpop.f32.mrb[77].mxu0  ;;  %v4433_v6 = vpop.f32.mrb[83].mxu1 }
 0xabd   :  { %v6293_v13 = vadd.f32 %v6285_v50, %v2322_v43 }
 0xabe   :  { %v3973_v15 = vmul.f32 -1.442695, %v6290_v28 }
 0xabf   :  { %v3966_v44 = vmul.f32 -1.442695, %v6293_v13  ;;  %v6297_v62 = vpop.f32.mrb[78].mxu0  ;;  %v2432_v5 = vpop.f32.mrb[84].mxu1 }
 0xac0   :  { %v6300_v8 = vadd.f32 %v6281_v52, %v2432_v5  ;;  %v2328_v60 = vpop.f32.mrb[79].mxu0  ;;  %v4436_v12 = vpop.f32.mrb[85].mxu1  ;;  %4906 = vpow2.f32 %v3973_v15 }
 0xac1   :  { %v6303_v33 = vadd.f32 %v6285_v50, %v2328_v60  ;;  %4908 = vpow2.f32 %v3966_v44 }
 0xac2   :  { %v3974_v7 = vmul.f32 -1.442695, %v6300_v8 }
 0xac3   :  { %v3967_v16 = vmul.f32 -1.442695, %v6303_v33  ;;  %v6307_v30 = vpop.f32.mrb[80].mxu0  ;;  %v2437_v1 = vpop.f32.mrb[86].mxu1 }
 0xac4   :  { %v6310_v21 = vadd.f32 %v6281_v52, %v2437_v1  ;;  %v2334_v47 = vpop.f32.mrb[81].mxu0  ;;  %v4439_v46 = vpop.f32.mrb[87].mxu1  ;;  %4910 = vpow2.f32 %v3974_v7 }
 0xac5   :  { %v6313_v39 = vadd.f32 %v6285_v50, %v2334_v47  ;;  %4912 = vpow2.f32 %v3967_v16 }
 0xac6   :  { %v3975_v58 = vmul.f32 -1.442695, %v6310_v21 }
 0xac7   :  { %v3968_v51 = vmul.f32 -1.442695, %v6313_v39 }
 0xac8   :  { %v6317_v42 = vpop.f32.mrb[82].mxu0  ;;  %v2442_v3 = vpop.f32.mrb[88].mxu1  ;;  %4914 = vpow2.f32 %v3975_v58 }
 0xac9   :  { %v2340_v11 = vpop.f32.mrb[83].mxu0  ;;  %v4442_v18 = vpop.f32.mrb[89].mxu1  ;;  %4916 = vpow2.f32 %v3968_v51  ;;  %v6320_v43 = vadd.f32 %v6281_v52, %v2442_v3 }
 0xaca   :  { %v4907_v63 = vpop.eup %4906  ;;  %v6326_v47 = vadd.f32 %v6285_v50, %v2340_v11 }
 0xacb   :  { %v4909_v10 = vpop.eup %4908  ;;  %v2606_v4 = vadd.f32 1.0, %v4907_v63  ;;  %v3976_v1 = vmul.f32 -1.442695, %v6320_v43 }
 0xacc   :  { %v6322_v6 = vpop.f32.mrb[84].mxu0  ;;  %v2447_v15 = vpop.f32.mrb[90].mxu1  ;;  %v2546_v44 = vadd.f32 1.0, %v4909_v10  ;;  %v3969_v11 = vmul.f32 -1.442695, %v6326_v47 }
 0xacd   :  { %v2346_v5 = vpop.f32.mrb[85].mxu0  ;;  %v4445_v60 = vpop.f32.mrb[91].mxu1  ;;  %4918 = vrcp.f32 %v2606_v4  ;;  %v6331_v63 = vadd.f32 %v6281_v52, %v2447_v15 }
 0xace   :  { %v4911_v12 = vpop.eup %4910  ;;  %4920 = vrcp.f32 %v2546_v44  ;;  %v6334_v4 = vadd.f32 %v6285_v50, %v2346_v5 }
 0xacf   :  { %v4913_v7 = vpop.eup %4912  ;;  %v2607_v16 = vadd.f32 1.0, %v4911_v12  ;;  %v3977_v15 = vmul.f32 -1.442695, %v6331_v63 }
 0xad0   :  { %v6328_v46 = vpop.f32.mrb[86].mxu0  ;;  %v2452_v58 = vpop.f32.mrb[92].mxu1  ;;  %v2547_v51 = vadd.f32 1.0, %v4913_v7  ;;  %v3970_v5 = vmul.f32 -1.442695, %v6334_v4 }
 0xad1   :  { %v2352_v3 = vpop.f32.mrb[87].mxu0  ;;  %v4448_v18 = vpop.f32.mrb[93].mxu1  ;;  %4922 = vrcp.f32 %v2607_v16  ;;  %v6341_v16 = vadd.f32 %v6281_v52, %v2452_v58 }
 0xad2   :  { %v4915_v10 = vpop.eup %4914  ;;  %4924 = vrcp.f32 %v2547_v51  ;;  %v6345_v51 = vadd.f32 %v6285_v50, %v2352_v3 }
 0xad3   :  { %v4917_v44 = vpop.eup %4916  ;;  %v2608_v60 = vadd.f32 1.0, %v4915_v10  ;;  %4926 = vpow2.f32 %v3976_v1 }
 0xad4   :  { %v6337_v12 = vpop.f32.mrb[88].mxu0  ;;  %v2457_v17 = vpop.f32.mrb[94].mxu1  ;;  %v2548_v7 = vadd.f32 1.0, %v4917_v44  ;;  %v3971_v3 = vmul.f32 -1.442695, %v6345_v51 }
 0xad5   :  { %v2358_v57 = vpop.f32.mrb[89].mxu0  ;;  %v4451_v18 = vpop.f32.mrb[95].mxu1  ;;  %4928 = vrcp.f32 %v2608_v60  ;;  %v3978_v60 = vmul.f32 -1.442695, %v6341_v16 }
 0xad6   :  { %4930 = vrcp.f32 %v2548_v7  ;;  %v6351_v18 = vadd.f32 %v6281_v52, %v2457_v17 }
 0xad7   :  { %v4919_v1 = vpop.eup %4918  ;;  %4932 = vpow2.f32 %v3969_v11  ;;  %v6361_v11 = vadd.f32 %v6285_v50, %v2358_v57 }
 0xad8   :  { %v4921_v10 = vpop.eup %4920  ;;  %v2627_v34 = vmul.f32 %v4919_v1, %v6290_v28  ;;  %4934 = vpow2.f32 %v3977_v15 }
 0xad9   :  { %v2567_v44 = vmul.f32 %v4921_v10, %v6293_v13  ;;  %4936 = vpow2.f32 %v3970_v5  ;;  %v3972_v7 = vmul.f32 -1.442695, %v6361_v11 }
 0xada   :  { %4490 = vmatmul.mubr.msk.f32.vlgmr.msra.gmra.mrb[96].mxu1 %vm83_vm0, %v2627_v34  ;;  %4938 = vpow2.f32 %v3978_v60  ;;  %v3979_v34 = vmul.f32 -1.442695, %v6351_v18 }
 0xadb   :  { %v4923_v28 = vpop.eup %4922  ;;  %4461 = vmatmul.mubr.msk.f32.vlgmr.msra.gmra.mrb[90].mxu0 %vm83_vm0, %v2567_v44  ;;  %4492 = vmatprep.mubr.msk.f32.mxu1 %vm5061_vm2, %v6209_v14  ;;  %4940 = vpow2.f32 %v3971_v3 }
 0xadc   :  { %v4925_v17 = vpop.eup %4924  ;;  %v2628_v52 = vmul.f32 %v4923_v28, %v6300_v8  ;;  %4714 = vmatpush3.bf16.xpose.msk.msra.mxu0 %vm6355_vm9, %v5636_v45  ;;  %4463 = vmatprep.mubr.msk.f32.mxu0 %vm5061_vm2, %v6209_v14 }
 0xadd   :  { %v4927_v57 = vpop.eup %4926  ;;  %v2568_v50 = vmul.f32 %v4925_v17, %v6303_v33  ;;  %4715 = vmatprep.subr.bf16.mxu0 %v6810_v54 }
 0xade   :  { %v2609_v13 = vadd.f32 1.0, %v4927_v57  ;;  %4493 = vmatmul.mubr.msk.f32.gmra.mrb[98].mxu1 %vm83_vm0, %v2628_v52 }
 0xadf   :  { %v4929_v8 = vpop.eup %4928  ;;  %4464 = vmatmul.mubr.msk.f32.gmra.mrb[92].mxu0 %vm83_vm0, %v2568_v50  ;;  %4495 = vmatprep.mubr.msk.f32.mxu1 %vm5061_vm2, %v6209_v14 }
 0xae0   :  { %v4931_v45 = vpop.eup %4930  ;;  %v2629_v33 = vmul.f32 %v4929_v8, %v6310_v21  ;;  %4942 = vrcp.f32 %v2609_v13  ;;  %4466 = vmatprep.mubr.msk.f32.mxu0 %vm5061_vm2, %v6209_v14 }
 0xae1   :  { %v4933_v15 = vpop.eup %4932  ;;  %v2569_v5 = vmul.f32 %v4931_v45, %v6313_v39  ;;  %4944 = vpow2.f32 %v3979_v34 }
 0xae2   :  { %v2549_v1 = vadd.f32 1.0, %v4933_v15  ;;  %4946 = vpow2.f32 %v3972_v7  ;;  %4496 = vmatmul.mubr.msk.f32.gmra.mrb[100].mxu1 %vm83_vm0, %v2629_v33  ;;  %v4935_v10 = vpop.eup %4934 }
 0xae3   :  { %4467 = vmatmul.mubr.msk.f32.gmra.mrb[94].mxu0 %vm83_vm0, %v2569_v5  ;;  %4498 = vmatprep.mubr.msk.f32.mxu1 %vm5061_vm2, %v6209_v14  ;;  %v4937_v44 = vpop.eup %4936  ;;  %v2610_v21 = vadd.f32 1.0, %v4935_v10 }
 0xae4   :  { %4948 = vrcp.f32 %v2549_v1  ;;  %4718 = vmatpush3.bf16.xpose.msk.msra.mxu0 %vm6355_vm9, %v5651_v49  ;;  %4469 = vmatprep.mubr.msk.f32.mxu0 %vm5061_vm2, %v6209_v14  ;;  %v2550_v39 = vadd.f32 1.0, %v4937_v44  ;;  %v4939_v60 = vpop.eup %4938 }
 0xae5   :  { %4719 = vmatprep.subr.bf16.mxu0 %v6810_v54  ;;  %4950 = vrcp.f32 %v2610_v21  ;;  %v4941_v3 = vpop.eup %4940  ;;  %v2611_v28 = vadd.f32 1.0, %v4939_v60 }
 0xae6   :  { %4952 = vrcp.f32 %v2550_v39  ;;  %v2551_v17 = vadd.f32 1.0, %v4941_v3 }
 0xae7   :  { %4954 = vrcp.f32 %v2611_v28  ;;  %v6817_v28 = vsub.s32 7, %v5178_v24 }
 0xae8   :  { %4956 = vrcp.f32 %v2551_v17 }
 0xae9   :  { %v6483_v17 = vrot.slane %v6276_v0, %v6817_v28 }
 0xaea   :  { %v4943_v52 = vpop.eup %4942 }
 0xaeb   :  { %v4945_v57 = vpop.eup %4944  ;;  %v2630_v50 = vmul.f32 %v4943_v52, %v6320_v43 }
 0xaec   :  { %v4947_v34 = vpop.eup %4946  ;;  %v2612_v49 = vadd.f32 1.0, %v4945_v57  ;;  %4722 = vmatpush3.bf16.xpose.msk.msra.mxu0 %vm6355_vm9, %v5667_v32 }
 0xaed   :  { %v2552_v13 = vadd.f32 1.0, %v4947_v34  ;;  %4499 = vmatmul.mubr.msk.f32.gmra.mrb[102].mxu1 %vm83_vm0, %v2630_v50  ;;  %4723 = vmatprep.subr.bf16.mxu0 %v6810_v54 }
 0xaee   :  { %v4949_v7 = vpop.eup %4948  ;;  %4958 = vrcp.f32 %v2612_v49  ;;  %4501 = vmatprep.mubr.msk.f32.mxu1 %vm5061_vm2, %v6209_v14 }
 0xaef   :  { %v2570_v8 = vmul.f32 %v4949_v7, %v6326_v47  ;;  %4960 = vrcp.f32 %v2552_v13  ;;  %v4951_v43 = vpop.eup %4950 }
 0xaf0   :  { %v4953_v45 = vpop.eup %4952  ;;  %v2631_v33 = vmul.f32 %v4951_v43, %v6331_v63 }
 0xaf1   :  { %4470 = vmatmul.mubr.msk.f32.gmra.mrb[96].mxu0 %vm83_vm0, %v2570_v8  ;;  %v2571_v32 = vmul.f32 %v4953_v45, %v6334_v4  ;;  %v4955_v15 = vpop.eup %4954 }
 0xaf2   :  { %4472 = vmatprep.mubr.msk.f32.mxu0 %vm5061_vm2, %v6209_v14  ;;  %4502 = vmatmul.mubr.msk.f32.gmra.mrb[104].mxu1 %vm83_vm0, %v2631_v33  ;;  %v4957_v47 = vpop.eup %4956  ;;  %v2632_v63 = vmul.f32 %v4955_v15, %v6341_v16 }
 0xaf3   :  { %4504 = vmatprep.mubr.msk.f32.mxu1 %vm5061_vm2, %v6209_v14  ;;  %v2572_v4 = vmul.f32 %v4957_v47, %v6345_v51 }
 0xaf4   :  { %4726 = vmatpush3.bf16.xpose.msk.msra.mxu0 %vm6355_vm9, %v5677_v38 }
 0xaf5   :  { %4473 = vmatmul.mubr.msk.f32.gmra.mrb[98].mxu0 %vm83_vm0, %v2571_v32  ;;  %4736 = vmatprep.subr.bf16.mxu0 %v6810_v54 }
 0xaf6   :  { %4475 = vmatprep.mubr.msk.f32.mxu0 %vm5061_vm2, %v6209_v14  ;;  %4505 = vmatmul.mubr.msk.f32.gmra.mrb[106].mxu1 %vm83_vm0, %v2632_v63 }
 0xaf7   :  { %4507 = vmatprep.mubr.msk.f32.mxu1 %vm5061_vm2, %v6209_v14 }
 0xaf8   :  { %v4959_v5 = vpop.eup %4958 }
 0xaf9   :  { %v4961_v58 = vpop.eup %4960  ;;  %v2633_v38 = vmul.f32 %v4959_v5, %v6351_v18  ;;  %4476 = vmatmul.mubr.msk.f32.gmra.mrb[100].mxu0 %vm83_vm0, %v2572_v4 }
 0xafa   :  { %v2573_v16 = vmul.f32 %v4961_v58, %v6361_v11  ;;  %4478 = vmatprep.mubr.msk.f32.mxu0 %vm5061_vm2, %v6209_v14 }
 0xafb   :  { %4508 = vmatmul.mubr.msk.f32.gmra.mrb[108].mxu1 %vm83_vm0, %v2633_v38 }
 0xafc   :  { %4561 = vmatprep.mubr.msk.f32.mxu1 %vm5061_vm2, %v6209_v14 }
 0xafd   :  { %4479 = vmatmul.mubr.msk.f32.gmra.mrb[102].mxu0 %vm83_vm0, %v2573_v16 }
 0xafe   :  { %4526 = vmatprep.mubr.msk.f32.mxu0 %vm5061_vm2, %v6209_v14 }
 0xb01   :  { %4527 = vmatmul.mubr.msk.f32.vlgmr.msra.gmra.mrb[104].mxu0 %vm1587_vm5, %v5961_v37  ;;  %v6816_v37 = vld [vmem:[#allocation16_spill] sm:$0xff] }
 0xb02   :  { %4529 = vmatprep.mubr.msk.f32.mxu0 %vm5061_vm2, %v6209_v14 }
 0xb05   :  { %4530 = vmatmul.mubr.msk.f32.gmra.mrb[106].mxu0 %vm1587_vm5, %v5966_v53  ;;  %v2464_v53 = vrot.slane %v6276_v0, %v6816_v37 }
 0xb06   :  { %4532 = vmatprep.mubr.msk.f32.mxu0 %vm5061_vm2, %v6209_v14 }
 0xb07   :  { %v2468_v10 = vadd.f32 %v2464_v53, %v6317_v42  ;;  %v2470_v42 = vadd.f32 %v2464_v53, %v6328_v46  ;;  %v2471_v34 = vadd.f32 %v2464_v53, %v6337_v12 }
 0xb09   :  { %4533 = vmatmul.mubr.msk.f32.gmra.mrb[108].mxu0 %vm1587_vm5, %v5971_v59  ;;  %v2465_v59 = vadd.f32 %v2464_v53, %v6287_v26  ;;  %v3962_v39 = vmul.f32 -1.442695, %v2468_v10  ;;  %v2469_v26 = vadd.f32 %v2464_v53, %v6322_v6  ;;  %v3965_v33 = vmul.f32 -1.442695, %v2471_v34 }
 0xb0a   :  { %4535 = vmatprep.mubr.msk.f32.mxu0 %vm5061_vm2, %v6209_v14 }
 0xb0b   :  { %v3963_v3 = vmul.f32 -1.442695, %v2469_v26 }
 0xb0d   :  { %4536 = vmatmul.mubr.msk.f32.gmra.mrb[110].mxu0 %vm1587_vm5, %v5976_v29  ;;  %v3959_v29 = vmul.f32 -1.442695, %v2465_v59 }
 0xb0e   :  { %4538 = vmatprep.mubr.msk.f32.mxu0 %vm5061_vm2, %v6209_v14 }
 0xb0f   :  { %4962 = vpow2.f32 %v3959_v29 }
 0xb11   :  { %4539 = vmatmul.mubr.msk.f32.gmra.mrb[112].mxu0 %vm1587_vm5, %v5981_v61  ;;  %v2466_v61 = vadd.f32 %v2464_v53, %v6297_v62  ;;  %v6473_v62 = vld [vmem:[%s6779_s11 + $0x20] sm:$0xff] }
 0xb12   :  { %4541 = vmatprep.mubr.msk.f32.mxu0 %vm5061_vm2, %v6209_v14 }
 0xb13   :  { %v3960_v51 = vmul.f32 -1.442695, %v2466_v61 }
 0xb15   :  { %4542 = vmatmul.mubr.msk.f32.gmra.mrb[114].mxu0 %vm1587_vm5, %v5986_v2  ;;  %v2467_v2 = vadd.f32 %v2464_v53, %v6307_v30  ;;  %4964 = vpow2.f32 %v3960_v51  ;;  %v6477_v30 = vrot.slane %v6473_v62, %v5181_v25  ;;  %v3964_v25 = vmul.f32 -1.442695, %v2470_v42 }
 0xb16   :  { %4544 = vmatprep.mubr.msk.f32.mxu0 %vm5061_vm2, %v6209_v14 }
 0xb17   :  { %v3961_v18 = vmul.f32 -1.442695, %v2467_v2 }
 0xb19   :  { %4545 = vmatmul.mubr.msk.f32.gmra.mrb[116].mxu0 %vm1587_vm5, %v5991_v35  ;;  %4966 = vpow2.f32 %v3961_v18  ;;  %v4963_v11 = vpop.eup %4962 }
 0xb1a   :  { %4578 = vmatprep.mubr.msk.f32.mxu0 %vm5061_vm2, %v6209_v14  ;;  %v2493_v35 = vadd.f32 1.0, %v4963_v11 }
 0xb1c   :  { %4968 = vrcp.f32 %v2493_v35 }
 0xb1f   :  { %v4965_v1 = vpop.eup %4964 }
 0xb20   :  { %v2494_v44 = vadd.f32 1.0, %v4965_v1 }
 0xb22   :  { %4970 = vrcp.f32 %v2494_v44 }
 0xb23   :  { %v4967_v21 = vpop.eup %4966  ;;  %4972 = vpow2.f32 %v3962_v39 }
 0xb24   :  { %v2495_v60 = vadd.f32 1.0, %v4967_v21 }
 0xb26   :  { %4974 = vrcp.f32 %v2495_v60  ;;  %v4969_v7 = vpop.eup %4968 }
 0xb27   :  { %4976 = vpow2.f32 %v3963_v3 }
 0xb28   :  { %4978 = vpow2.f32 %v3964_v25 }
 0xb29   :  { %4980 = vpow2.f32 %v3965_v33 }
 0xb2c   :  { %v4971_v47 = vpop.eup %4970 }
 0xb2d   :  { %v4973_v63 = vpop.eup %4972 }
 0xb2e   :  { %v2496_v51 = vadd.f32 1.0, %v4973_v63 }
 0xb30   :  { %v4975_v61 = vpop.eup %4974  ;;  %4982 = vrcp.f32 %v2496_v51 }
 0xb31   :  { %v4977_v18 = vpop.eup %4976 }
 0xb32   :  { %v2497_v1 = vadd.f32 1.0, %v4977_v18  ;;  %v4979_v10 = vpop.eup %4978 }
 0xb33   :  { %v2498_v21 = vadd.f32 1.0, %v4979_v10  ;;  %v4981_v26 = vpop.eup %4980 }
 0xb34   :  { %4984 = vrcp.f32 %v2497_v1  ;;  %v2499_v28 = vadd.f32 1.0, %v4981_v26 }
 0xb35   :  { %4986 = vrcp.f32 %v2498_v21 }
 0xb36   :  { %4988 = vrcp.f32 %v2499_v28 }
 0xbad   :  { %v2858_v6 = vpop.f32.mrb[96].mxu1 }
 0xbae   :  { %v2859_v52 = vadd.f32 %v2858_v6, %v6477_v30  ;;  %v2729_v57 = vpop.f32.mrb[90].mxu0  ;;  %v4491_v50 = vpop.f32.mrb[97].mxu1 }
 0xbaf   :  { %v2730_v49 = vadd.f32 %v2729_v57, %v6483_v17  ;;  %v4462_v13 = vpop.f32.mrb[91].mxu0  ;;  %v4983_v50 = vpop.eup %4982 }
 0xbb0   :  { %v2920_v46 = vsel %vm1587_vm5, %v2859_v52, 0.0 }
 0xbb1   :  { %2921 = vadd.xlane.f32.xlu0 %v2920_v46  ;;  %v2863_v24 = vpop.f32.mrb[98].mxu1  ;;  %v2892_v0 = vmul.f32 %v4969_v7, %v2730_v49 }
 0xbb2   :  { %v2864_v8 = vadd.f32 %v2863_v24, %v6477_v30  ;;  %v2734_v43 = vpop.f32.mrb[92].mxu0  ;;  %v4494_v45 = vpop.f32.mrb[99].mxu1 }
 0xbb3   :  { %v2735_v32 = vadd.f32 %v2734_v43, %v6483_v17  ;;  %v4465_v15 = vpop.f32.mrb[93].mxu0  ;;  %v2899_v12 = vsel %vm1587_vm5, %v2892_v0, 0.0 }
 0xbb4   :  { %v2923_v2 = vsel %vm1587_vm5, %v2864_v8, 0.0  ;;  %v4985_v8 = vpop.eup %4984 }
 0xbb5   :  { %v2893_v4 = vmul.f32 %v4971_v47, %v2735_v32  ;;  %v2868_v5 = vpop.f32.mrb[100].mxu1  ;;  %2900 = vadd.xlane.f32.xlu0 %v2899_v12 }
 0xbb6   :  { %v2869_v58 = vadd.f32 %v2868_v5, %v6477_v30  ;;  %v2739_v38 = vpop.f32.mrb[94].mxu0  ;;  %v4497_v16 = vpop.f32.mrb[101].mxu1 }
 0xbb7   :  { %v2740_v53 = vadd.f32 %v2739_v38, %v6483_v17  ;;  %v4468_v59 = vpop.f32.mrb[95].mxu0  ;;  %v2902_v29 = vsel %vm1587_vm5, %v2893_v4, 0.0  ;;  %v4987_v5 = vpop.eup %4986 }
 0xbb8   :  { %2903 = vadd.xlane.f32.xlu1 %v2902_v29  ;;  %v2926_v35 = vsel %vm1587_vm5, %v2869_v58, 0.0  ;;  %v2953_v29 = vpop.permute.xlu0 %2952 }
 0xbb9   :  { %v2894_v11 = vmul.f32 %v4975_v61, %v2740_v53  ;;  %2924 = vadd.xlane.f32.xlu0 %v2923_v2 }
 0xbbb   :  { %v2905_v44 = vsel %vm1587_vm5, %v2894_v11, 0.0  ;;  %v4989_v11 = vpop.eup %4988 }
 0xbbc   :  { %2927 = vadd.xlane.f32.xlu1 %v2926_v35  ;;  %v3107_v10 = vpop.permute.xlu0 %3106 }
 0xbc0   :  { %v2873_v39 = vpop.f32.mrb[102].mxu1  ;;  %2906 = vadd.xlane.f32.xlu1 %v2905_v44 }
 0xbc1   :  { %v2874_v60 = vadd.f32 %v2873_v39, %v6477_v30  ;;  %v4500_v3 = vpop.f32.mrb[103].mxu1 }
 0xbc3   :  { %v2929_v42 = vsel %vm1587_vm5, %v2874_v60, 0.0  ;;  %v6819_v60 = vld [vmem:[#allocation10_spill] sm:$0xff] }
 0xbc4   :  { %v2744_v6 = vpop.f32.mrb[96].mxu0  ;;  %2930 = vadd.xlane.f32.xlu0 %v2929_v42  ;;  %v2957_v42 = vpop.permute.xlu0 %2956 }
 0xbc5   :  { %v2745_v52 = vadd.f32 %v2744_v6, %v6483_v17  ;;  %v4471_v57 = vpop.f32.mrb[97].mxu0  ;;  %v2878_v25 = vpop.f32.mrb[104].mxu1 }
 0xbc6   :  { %v2879_v49 = vadd.f32 %v2878_v25, %v6477_v30  ;;  %v4503_v13 = vpop.f32.mrb[105].mxu1  ;;  %v3016_v6 = vpop.permute.xlu1 %3015  ;;  %v6820_v57 = vld [vmem:[#allocation11_spill] sm:$0xff] }
 0xbc7   :  { %v2895_v34 = vmul.f32 %v4983_v50, %v2745_v52 }
 0xbc8   :  { %v2749_v7 = vpop.f32.mrb[98].mxu0  ;;  %v2932_v4 = vsel %vm1587_vm5, %v2879_v49, 0.0  ;;  %v6821_v49 = vld [vmem:[#allocation12_spill] sm:$0xff] }
 0xbc9   :  { %v2750_v46 = vadd.f32 %v2749_v7, %v6483_v17  ;;  %v4474_v24 = vpop.f32.mrb[99].mxu0  ;;  %v2908_v0 = vsel %vm1587_vm5, %v2895_v34, 0.0  ;;  %v2883_v43 = vpop.f32.mrb[106].mxu1 }
 0xbca   :  { %2909 = vadd.xlane.f32.xlu0 %v2908_v0  ;;  %v2884_v33 = vadd.f32 %v2883_v43, %v6477_v30  ;;  %v4506_v32 = vpop.f32.mrb[107].mxu1  ;;  %v3018_v24 = vpop.permute.xlu1 %3017  ;;  %v2972_v0 = vmul.f32 %v6198_v56, %v5383_v36 }
 0xbcb   :  { %v2896_v45 = vmul.f32 %v4985_v8, %v2750_v46  ;;  %v3048_v46 = vpop.permute.xlu0 %3047  ;;  %v6822_v32 = vld [vmem:[#allocation13_spill] sm:$0xff] }
 0xbcc   :  { %v2754_v15 = vpop.f32.mrb[100].mxu0  ;;  %v2935_v63 = vsel %vm1587_vm5, %v2884_v33, 0.0  ;;  %v6524_v33 = vsub.f32 %v2972_v0, %v3018_v24 }
 0xbcd   :  { %v2755_v12 = vadd.f32 %v2754_v15, %v6483_v17  ;;  %v4477_v47 = vpop.f32.mrb[101].mxu0  ;;  %2936 = vadd.xlane.f32.xlu1 %v2935_v63  ;;  %v2911_v2 = vsel %vm1587_vm5, %v2896_v45, 0.0  ;;  %v3062_v45 = vmul.f32 %v6200_v41, %v5378_v31 }
 0xbce   :  { %v2888_v58 = vpop.f32.mrb[108].mxu1  ;;  %2933 = vadd.xlane.f32.xlu0 %v2932_v4 }
 0xbcf   :  { %v2897_v38 = vmul.f32 %v4987_v5, %v2755_v12  ;;  %v6509_v16 = vadd.f32 %v2888_v58, %v6477_v30  ;;  %v4509_v53 = vpop.f32.mrb[109].mxu1  ;;  %v6818_v30 = vld [vmem:[#allocation9_spill] sm:$0xff]  ;;  %v3020_v47 = vpop.permute.xlu0 %3019  ;;  %v3125_v4 = vsub.f32 %v3062_v45, %v3107_v10  ;;  %v2971_v58 = vmul.f32 %v2953_v29, %v5378_v31  ;;  %v6824_v29 = vld [vmem:[#allocation18_spill] sm:$0xff] }
 0xbd0   :  { %v2759_v59 = vpop.f32.mrb[102].mxu0 }
 0xbd1   :  { %v2760_v61 = vadd.f32 %v2759_v59, %v6483_v17  ;;  %v4480_v51 = vpop.f32.mrb[103].mxu0  ;;  %v2914_v18 = vsel %vm1587_vm5, %v2897_v38, 0.0  ;;  %v6533_v53 = vsub.f32 %v2971_v58, %v3016_v6  ;;  %v6823_v59 = vld [vmem:[#allocation14_spill] sm:$0xff] }
 0xbd2   :  { %2912 = vadd.xlane.f32.xlu0 %v2911_v2  ;;  %2915 = vadd.xlane.f32.xlu1 %v2914_v18  ;;  %v2973_v18 = vmul.f32 %v2957_v42, %v5388_v40  ;;  %v3540_v42 = vld [vmem:[%s6777_s9 + $0x20] sm:$0xff] }
 0xbd3   :  { %v2898_v35 = vmul.f32 %v4989_v11, %v2760_v61  ;;  %v3111_v2 = vpop.permute.xlu0 %3110  ;;  %v3064_v11 = vmul.f32 %v3048_v46, %v5388_v40 }
 0xbd4   :  { %v3355_v1 = vpop.f32.mrb[104].mxu0 }
 0xbd5   :  { %v2917_v44 = vsel %vm1587_vm5, %v2898_v35, 0.0  ;;  %v3389_v21 = vmul.f32 %v3355_v1, %v6818_v30  ;;  %v4528_v39 = vpop.f32.mrb[105].mxu0  ;;  %v3127_v1 = vsub.f32 %v3064_v11, %v3111_v2 }
 0xbd6   :  { %2918 = vadd.xlane.f32.xlu1 %v2917_v44  ;;  %v3537_v39 = vld [vmem:[%s6777_s9 + $0x8] sm:$0xff] }
 0xbd7   :  { %v2961_v35 = vpop.permute.xlu0 %2960 }
 0xbd8   :  { %v3360_v26 = vpop.f32.mrb[106].mxu0  ;;  %v2975_v44 = vmul.f32 %v2961_v35, %v5398_v55 }
 0xbd9   :  { %v3390_v17 = vmul.f32 %v3360_v26, %v6819_v60  ;;  %v4531_v3 = vpop.f32.mrb[107].mxu0  ;;  %v3538_v26 = vld [vmem:[%s6777_s9 + $0x10] sm:$0xff] }
 0xbdb   :  { %v4728_v28 = vpack.c.bf16 %v3390_v17, %v3389_v21  ;;  %v3024_v10 = vpop.permute.xlu0 %3023  ;;  %v3536_v21 = vld [vmem:[%s6777_s9] sm:$0xff]  ;;  %v3539_v17 = vld [vmem:[%s6777_s9 + $0x18] sm:$0xff] }
 0xbdc   :  { %v3365_v52 = vpop.f32.mrb[108].mxu0  ;;  %v6550_v30 = vsub.f32 %v2975_v44, %v3024_v10  ;;  %v4746_v60 = vpack.c.bf16 %v3537_v39, %v3536_v21  ;;  %v4749_v3 = vpack.c.bf16 %v3539_v17, %v3538_v26 }
 0xbdd   :  { %v3391_v50 = vmul.f32 %v3365_v52, %v6820_v57  ;;  %v4534_v25 = vpop.f32.mrb[109].mxu0  ;;  %4729 = vmatpush3.bf16.msra.mxu1 %v4728_v28  ;;  %v3541_v28 = vld [vmem:[%s6777_s9 + $0x28] sm:$0xff]  ;;  %v3542_v52 = vld [vmem:[%s6777_s9 + $0x30] sm:$0xff]  ;;  %v3543_v57 = vld [vmem:[%s6777_s9 + $0x38] sm:$0xff] }
 0xbde   :  { %4730 = vmatprep.subr.bf16.mxu1 %v6810_v54  ;;  %v4752_v6 = vpack.c.bf16 %v3541_v28, %v3540_v42  ;;  %v3109_v25 = vpop.permute.xlu1 %3108  ;;  %v3547_v42 = vrot.slane %v6473_v62, %v5189_v27 }
 0xbdf   :  { %v6582_v0 = vpop.permute.xlu0 %3137  ;;  %v3126_v27 = vsub.f32 %v6203_v20, %v3109_v25 }
 0xbe0   :  { %v3370_v34 = vpop.f32.mrb[110].mxu0 }
 0xbe1   :  { %v3392_v13 = vmul.f32 %v3370_v34, %v6821_v49  ;;  %v4537_v7 = vpop.f32.mrb[111].mxu0 }
 0xbe2   :  { %v2959_v34 = vpop.permute.xlu1 %2958 }
 0xbe3   :  { %v4731_v8 = vpack.c.bf16 %v3392_v13, %v3391_v50  ;;  %v4755_v50 = vpack.c.bf16 %v3543_v57, %v3542_v52  ;;  %v5008_v57 = vld [vmem:[#allocation2] sm:$0xff] }
 0xbe4   :  { %v3375_v43 = vpop.f32.mrb[112].mxu0 }
 0xbe5   :  { %v3393_v15 = vmul.f32 %v3375_v43, %v6822_v32  ;;  %v4540_v12 = vpop.f32.mrb[113].mxu0  ;;  %4732 = vmatpush3.bf16.msra.mxu1 %v4731_v8  ;;  %v6586_v43 = vpop.permute.xlu0 %3167 }
 0xbe6   :  { %4733 = vmatprep.subr.bf16.mxu1 %v6810_v54  ;;  %v3050_v49 = vpop.permute.xlu1 %3049 }
 0xbe7   :  { %3143 = vrot.lane.b32.xlu1 %v6524_v33, %s5068_s27 }
 0xbe8   :  { %v3380_v63 = vpop.f32.mrb[114].mxu0 }
 0xbe9   :  { %v3394_v56 = vmul.f32 %v3380_v63, %v5417_v22  ;;  %v4543_v5 = vpop.f32.mrb[115].mxu0  ;;  %v3036_v22 = vsub.f32 %v2973_v18, %v3020_v47 }
 0xbea   :  { %v3022_v13 = vpop.permute.xlu1 %3021 }
 0xbeb   :  { %v4734_v41 = vpack.c.bf16 %v3394_v56, %v3393_v15  ;;  %3169 = vrot.lane.b32.xlu1 %v3125_v4, %s5068_s27 }
 0xbec   :  { %v3385_v38 = vpop.f32.mrb[116].mxu0 }
 0xbed   :  { %v3395_v61 = vmul.f32 %v3385_v38, %v6823_v59  ;;  %v4546_v51 = vpop.f32.mrb[117].mxu0  ;;  %4735 = vmatpush3.bf16.msra.mxu1 %v4734_v41 }
 0xbee   :  { %4559 = vmatprep.subr.mxu1 %v6209_v14  ;;  %v3113_v7 = vpop.permute.xlu1 %3112 }
 0xbef   :  { %3190 = vrot.lane.b32.xlu1 %v6533_v53, %s5069_s14 }
 0xbf1   :  { %4560 = vmatpush3.msra.mxu1 %v3395_v61 }
 0xbf2   :  { %4562 = vmatmul.mubr.msk.f32.vlgmr.msra.gmra.mrb[110].mxu1 %vm1660_vm7, %v6824_v29  ;;  %4745 = vmatprep.subr.bf16.mxu1 %v6810_v54  ;;  %v3052_v46 = vpop.permute.xlu1 %3051 }
 0xbf3   :  { %3145 = vrot.lane.b32.xlu1 %v3036_v22, %s5068_s27  ;;  %4597 = vmatprep.mubr.msk.f32.mxu1 %vm5061_vm2, %v6209_v14 }
 0xbf4   :  { %4747 = vmatpush3.bf16.msra.mxu1 %v4746_v60 }
 0xbf5   :  { %4748 = vmatprep.subr.bf16.mxu1 %v6810_v54 }
 0xbf6   :  { %v3115_v24 = vpop.permute.xlu1 %3114 }
 0xbf7   :  { %3173 = vrot.lane.b32.xlu1 %v3127_v1, %s5068_s27 }
 0xbf8   :  { %4750 = vmatpush3.bf16.msra.mxu1 %v4749_v3 }
 0xbf9   :  { %4751 = vmatprep.subr.bf16.mxu1 %v6810_v54 }
 0xbfa   :  { %v6584_v8 = vpop.permute.xlu1 %3139 }
 0xbfb   :  { %3194 = vrot.lane.b32.xlu1 %v3036_v22, %s5069_s14 }
 0xbfc   :  { %4753 = vmatpush3.bf16.msra.mxu1 %v4752_v6 }
 0xbfd   :  { %4754 = vmatprep.subr.bf16.mxu1 %v6810_v54 }
 0xbfe   :  { %v6588_v45 = vpop.permute.xlu1 %3165 }
 0xbff   :  { %3149 = vrot.lane.b32.xlu1 %v6550_v30, %s5068_s27 }
 0xc00   :  { %4756 = vmatpush3.bf16.msra.mxu1 %v4755_v50 }
 0xc01   :  { %4763 = vmatprep.subr.bf16.mxu1 %v6810_v54 }
 0xc02   :  { %v6592_v15 = vpop.permute.xlu1 %3186 }
 0xc3e   :  { %v6590_v32 = vpop.xlane.xlu0 %2921 }
 0xc42   :  { %v2901_v12 = vpop.xlane.xlu0 %2900 }
 0xc45   :  { %v6594_v47 = vpop.xlane.xlu1 %2903 }
 0xc46   :  { %v6596_v63 = vpop.xlane.xlu0 %2924 }
 0xc49   :  { %v6598_v4 = vpop.xlane.xlu1 %2927 }
 0xc4d   :  { %v6602_v5 = vpop.xlane.xlu1 %2906 }
 0xc51   :  { %v6600_v56 = vpop.xlane.xlu0 %2930 }
 0xc57   :  { %v2910_v58 = vpop.xlane.xlu0 %2909 }
 0xc58   :  { %v6605_v41 = vmul.f32 %v2910_v58, %v5383_v36  ;;  %v2938_v58 = vsel %vm1587_vm5, %v6509_v16, 0.0  ;;  %v3066_v16 = vmul.f32 %v3052_v46, %v5398_v55 }
 0xc5a   :  { %v6607_v38 = vpop.xlane.xlu1 %2936  ;;  %v3129_v20 = vsub.f32 %v3066_v16, %v3115_v24 }
 0xc5b   :  { %v2934_v35 = vpop.xlane.xlu0 %2933 }
 0xc5f   :  { %v6609_v59 = vpop.xlane.xlu1 %2915  ;;  %v2913_v36 = vpop.xlane.xlu0 %2912 }
 0xc60   :  { %v3227_v39 = vmul.f32 %v2913_v36, %v5388_v40 }
 0xc63   :  { %v2919_v61 = vpop.xlane.xlu1 %2918 }
 0xc64   :  { %v6612_v51 = vmul.f32 %v2919_v61, %v5398_v55  ;;  %v3223_v55 = vmul.f32 %v2901_v12, %v5368_v19 }
 0xc67   :  { %v6614_v2 = vpop.permute.xlu1 %3143 }
 0xc6b   :  { %v6616_v18 = vpop.permute.xlu1 %3169 }
 0xc6f   :  { %v6618_v22 = vpop.permute.xlu1 %3190 }
 0xc73   :  { %v3146_v11 = vpop.permute.xlu1 %3145 }
 0xc77   :  { %v3174_v1 = vpop.permute.xlu1 %3173 }
 0xc78   :  { %v3212_v10 = vsel %vm3207_vm10, %v3146_v11, %v3174_v1  ;;  %v3065_v11 = vmul.f32 %v3050_v49, %v5393_v48  ;;  %v3209_v49 = vsel %vm3207_vm10, %v6584_v8, %v6586_v43 }
 0xc7b   :  { %v3195_v44 = vpop.permute.xlu1 %3194 }
 0xc7c   :  { %v3220_v21 = vsel %vm3215_vm11, %v3212_v10, %v3195_v44 }
 0xc7d   :  { %v3234_v26 = vmul.f32 %v3220_v21, %v2934_v35 }
 0xc7f   :  { %v6623_v60 = vadd.f32 %v3234_v26, %v3227_v39 }
 0xcc5   :  { %v3462_v17 = vpop.f32.mrb[110].mxu1 }
 0xcc6   :  { %v4563_v3 = vpop.f32.mrb[111].mxu1  ;;  %4598 = vmatmul.mubr.msk.f32.vlgmr.msra.gmra.mrb[112].mxu1 %vm1395_vm4, %v3462_v17 }
 0xcc7   :  { %4627 = vmatprep.mubr.msk.f32.mxu1 %vm5061_vm2, %v6209_v14  ;;  %v2974_v14 = vmul.f32 %v2959_v34, %v5393_v48 }
 0xcc9   :  { %v3037_v61 = vsub.f32 %v2974_v14, %v3022_v13 }
 0xd99   :  { %v3617_v28 = vpop.f32.mrb[112].mxu1 }
 0xd9a   :  { %v3618_v6 = vadd.f32 %v3617_v28, %v3547_v42  ;;  %v4599_v52 = vpop.f32.mrb[113].mxu1  ;;  %v3228_v42 = vmul.f32 %v6609_v59, %v5393_v48  ;;  %v3150_v28 = vpop.permute.xlu1 %3149  ;;  %v3646_v48 = vld [vmem:[%s6775_s7 + $0x10] sm:$0xff] }
 0xd9c   :  { %v6630_v50 = vadd.f32 %v5008_v57, %v3618_v6 }
 0xd9e   :  { %v3623_v40 = vsel %vm83_vm0, %v6630_v50, 0.0 }
 0xd9f   :  { %3624 = vadd.xlane.f32.xlu0 %v3623_v40 }
 0xdb5   :  { %3188 = vrot.lane.b32.xlu0 %v6189_v9, %s5069_s14  ;;  %v3128_v9 = vsub.f32 %v3065_v11, %v3113_v7  ;;  %v3648_v11 = vld [vmem:[%s6775_s7 + $0x40] sm:$0xff] }
 0xdd4   :  { %2939 = vadd.xlane.f32.xlu0 %v2938_v58 }
 0xdea   :  { %3141 = vrot.lane.b32.xlu0 %v6533_v53, %s5068_s27 }
 0xdee   :  { %3171 = vrot.lane.b32.xlu0 %v3126_v27, %s5068_s27 }
 0xdf2   :  { %3192 = vrot.lane.b32.xlu0 %v6524_v33, %s5069_s14  ;;  %v3208_v33 = vsel %vm3207_vm10, %v6582_v0, %v6588_v45  ;;  %v3224_v0 = vmul.f32 %v6594_v47, %v5373_v23 }
 0xdf3   :  { %v3216_v7 = vsel %vm3215_vm11, %v3208_v33, %v6592_v15  ;;  %v6826_v33 = vld [vmem:[#allocation15_spill] sm:$0xff] }
 0xdf4   :  { %v3230_v35 = vmul.f32 %v3216_v7, %v6590_v32  ;;  %v3735_v7 = vld [vmem:[%s6778_s10 + $0x8] sm:$0xff] }
 0xdf6   :  { %3147 = vrot.lane.b32.xlu0 %v3037_v61, %s5068_s27  ;;  %v3237_v43 = vadd.f32 %v3230_v35, %v3223_v55 }
 0xdfa   :  { %3175 = vrot.lane.b32.xlu0 %v3128_v9, %s5068_s27  ;;  %v3649_v9 = vld [vmem:[%s6775_s7 + $0x58] sm:$0xff] }
 0xdfb   :  { %v4761_v16 = vpack.c.bf16 %v3649_v9, %v3648_v11 }
 0xdfe   :  { %3196 = vrot.lane.b32.xlu0 %v3037_v61, %s5069_s14 }
 0xe02   :  { %3177 = vrot.lane.b32.xlu0 %v3129_v20, %s5068_s27 }
 0xe2c   :  { %v3625_v53 = vpop.xlane.xlu0 %3624 }
 0xe2d   :  { %v3626_v25 = vmul.f32 0.03125, %v3625_v53 }
 0xe2f   :  { %v6652_v34 = vsub.f32 %v6630_v50, %v3626_v25 }
 0xe30   :  { %v3189_v13 = vpop.permute.xlu0 %3188 }
 0xe31   :  { %v3217_v46 = vsel %vm3215_vm11, %v3209_v49, %v3189_v13  ;;  %v3628_v24 = vmul.f32 %v6652_v34, %v6652_v34  ;;  %v3644_v49 = vrot.slane %v6473_v62, %v6826_v33  ;;  %v3734_v13 = vld [vmem:[%s6778_s10] sm:$0xff] }
 0xe32   :  { %v3231_v45 = vmul.f32 %v3217_v46, %v6596_v63  ;;  %v4764_v46 = vpack.c.bf16 %v3735_v7, %v3734_v13 }
 0xe33   :  { %v3629_v8 = vsel %vm83_vm0, %v3628_v24, 0.0  ;;  %v3737_v24 = vld [vmem:[%s6778_s10 + $0x18] sm:$0xff] }
 0xe34   :  { %v3238_v19 = vadd.f32 %v3231_v45, %v3224_v0  ;;  %3630 = vadd.xlane.f32.xlu1 %v3629_v8  ;;  %4765 = vmatpush3.bf16.msra.mxu1 %v4764_v46  ;;  %v3738_v0 = vld [vmem:[%s6778_s10 + $0x20] sm:$0xff]  ;;  %v3739_v45 = vld [vmem:[%s6778_s10 + $0x28] sm:$0xff] }
 0xe35   :  { %4766 = vmatprep.subr.bf16.mxu1 %v6810_v54  ;;  %v4770_v8 = vpack.c.bf16 %v3739_v45, %v3738_v0 }
 0xe36   :  { %v4737_v12 = vpack.c.bf16 %v3238_v19, %v3237_v43  ;;  %v3740_v43 = vld [vmem:[%s6778_s10 + $0x30] sm:$0xff]  ;;  %v3741_v19 = vld [vmem:[%s6778_s10 + $0x38] sm:$0xff] }
 0xe38   :  { %4738 = vmatpush3.bf16.msra.mxu0 %v4737_v12  ;;  %v4773_v12 = vpack.c.bf16 %v3741_v19, %v3740_v43 }
 0xe39   :  { %4739 = vmatprep.subr.bf16.mxu0 %v6810_v54 }
 0xe45   :  { %3198 = vrot.lane.b32.xlu1 %v6550_v30, %s5069_s14  ;;  %v3225_v30 = vmul.f32 %v6602_v5, %v5378_v31 }
 0xe61   :  { %v2940_v15 = vpop.xlane.xlu0 %2939 }
 0xe65   :  { %v3142_v1 = vpop.permute.xlu0 %3141 }
 0xe66   :  { %v3210_v32 = vsel %vm3207_vm10, %v3142_v1, %v6616_v18  ;;  %v5010_v1 = vld [vmem:[%s6769_s1] sm:$0xff]  ;;  %s5071_s1 = smov [#allocation5]  }
 0xe67   :  { %v3218_v47 = vsel %vm3215_vm11, %v3210_v32, %v6618_v22 }
 0xe68   :  { %v3232_v63 = vmul.f32 %v3218_v47, %v6598_v4 }
 0xe69   :  { %v3172_v23 = vpop.permute.xlu0 %3171 }
 0xe6a   :  { %v3211_v36 = vsel %vm3207_vm10, %v6614_v2, %v3172_v23  ;;  %v3239_v39 = vadd.f32 %v3232_v63, %v3225_v30 }
 0xe6d   :  { %v3193_v10 = vpop.permute.xlu0 %3192 }
 0xe6e   :  { %v3219_v44 = vsel %vm3215_vm11, %v3211_v36, %v3193_v10 }
 0xe6f   :  { %v3233_v21 = vmul.f32 %v3219_v44, %v6600_v56 }
 0xe71   :  { %v3240_v18 = vadd.f32 %v3233_v21, %v6605_v41  ;;  %v3148_v26 = vpop.permute.xlu0 %3147  ;;  %v5009_v41 = vld [vmem:[#allocation5] sm:$0xff] }
 0xe73   :  { %v4740_v17 = vpack.c.bf16 %v3240_v18, %v3239_v39  ;;  %v6827_v18 = vld [vmem:[#allocation17_spill] sm:$0xff] }
 0xe75   :  { %4741 = vmatpush3.bf16.msra.mxu0 %v4740_v17  ;;  %v3176_v22 = vpop.permute.xlu0 %3175 }
 0xe76   :  { %4742 = vmatprep.subr.bf16.mxu0 %v6810_v54  ;;  %v3213_v4 = vsel %vm3207_vm10, %v3148_v26, %v3176_v22  ;;  %v3819_v26 = vrot.slane %v6473_v62, %v6827_v18 }
 0xe79   :  { %v3197_v2 = vpop.permute.xlu0 %3196 }
 0xe7a   :  { %v3221_v3 = vsel %vm3215_vm11, %v3213_v4, %v3197_v2 }
 0xe7b   :  { %v3235_v31 = vmul.f32 %v3221_v3, %v6607_v38  ;;  %v3647_v38 = vld [vmem:[%s6775_s7 + $0x28] sm:$0xff] }
 0xe7c   :  { %v4758_v61 = vpack.c.bf16 %v3647_v38, %v3646_v48 }
 0xe7d   :  { %v3242_v56 = vadd.f32 %v3235_v31, %v3228_v42  ;;  %v3178_v52 = vpop.permute.xlu0 %3177 }
 0xe7e   :  { %v3214_v58 = vsel %vm3207_vm10, %v3150_v28, %v3178_v52 }
 0xe7f   :  { %v4743_v5 = vpack.c.bf16 %v3242_v56, %v6623_v60 }
 0xe81   :  { %4744 = vmatpush3.bf16.msra.mxu0 %v4743_v5 }
 0xe82   :  { %4576 = vmatprep.subr.mxu0 %v5009_v41 }
 0xec1   :  { %v3631_v6 = vpop.xlane.xlu1 %3630 }
 0xec2   :  { %v3632_v57 = vmul.f32 0.03125, %v3631_v6 }
 0xec4   :  { %v3633_v40 = vadd.f32 1e-05, %v3632_v57 }
 0xec5   :  { %v3199_v27 = vpop.permute.xlu1 %3198 }
 0xec6   :  { %4990 = vrsqrt.f32 %v3633_v40  ;;  %v3222_v14 = vsel %vm3215_vm11, %v3214_v58, %v3199_v27 }
 0xec7   :  { %v3236_v59 = vmul.f32 %v3222_v14, %v2940_v15 }
 0xec9   :  { %v3243_v60 = vadd.f32 %v3236_v59, %v6612_v51  ;;  %v6825_v51 = vld [vmem:[#allocation8_spill] sm:$0xff] }
 0xeca   :  { %v3639_v20 = vrot.slane %v6473_v62, %v6825_v51 }
 0xecb   :  { %4577 = vmatpush3.msra.mxu0 %v3243_v60 }
 0xecc   :  { %4579 = vmatmul.mubr.msk.f32.vlgmr.msra.gmra.mrb[118].mxu0 %vm1660_vm7, %v6824_v29  ;;  %4757 = vmatprep.subr.bf16.mxu0 %v6810_v54 }
 0xecd   :  { %4759 = vmatpush3.bf16.msra.mxu0 %v4758_v61  ;;  %4608 = vmatprep.mubr.msk.f32.mxu0 %vm5061_vm2, %v5009_v41 }
 0xece   :  { %4760 = vmatprep.subr.bf16.mxu0 %v6810_v54 }
 0xed0   :  { %v4991_v53 = vpop.eup %4990 }
 0xed1   :  { %v3635_v25 = vmul.f32 %v4991_v53, %v6652_v34  ;;  %4762 = vmatpush3.bf16.msra.mxu0 %v4761_v16  ;;  %v3736_v34 = vld [vmem:[%s6778_s10 + $0x10] sm:$0xff]  ;;  %s3835_s10 = sshll.u32 %s5071_s1, 4  ;;  %s3836_s10 = int_to_ptr.vmem [resolvable:$true] %s3835_s10 }
 0xed2   :  { %v4767_v35 = vpack.c.bf16 %v3737_v24, %v3736_v34  ;;  %s5033_s5 = scalar_lea.vmem %s3836_s10, 128  ;;  %p5038_p9 = scmp.lt.s32.totalorder %s3836_s10, %s3836_s10 }
 0xed3   :  { %v3640_v55 = vmul.f32 %v3639_v20, %v3635_v25  ;;  %p5034_p8 = scmp.ne.s32.totalorder %s3836_s10, %s5033_s5  ;;  %p5039_p10 = scmp.lt.s32.totalorder %s5033_s5, %s5033_s5 }
 0xed4   :  { %4768 = vmatpush3.bf16.msra.mxu1 %v4767_v35 }
 0xed5   :  { %v3645_v29 = vadd.f32 %v3644_v49, %v3640_v55  ;;  %4769 = vmatprep.subr.bf16.mxu1 %v6810_v54  ;;  %p5040_p11 = por %p5039_p10, %p5038_p9 }
 0xed7   :  { %4609 = vmatmul.mubr.msk.f32.vlgmr.msra.gmra.mrb[120].mxu0 %vm83_vm0, %v3645_v29  ;;  %p5041_p12 = pnand %p5040_p11, %p5034_p8 }
 0xed8   :  { %4771 = vmatpush3.bf16.msra.mxu1 %v4770_v8 }
 0xed9   :  { %4772 = vmatprep.subr.bf16.mxu1 %v6810_v54  ;;  %v3653_v54 = vrot.slane %v6473_v62, %v6816_v37 }
 0xedc   :  { %4774 = vmatpush3.bf16.msra.mxu1 %v4773_v12 }
 0xf9f   :  { %v3532_v15 = vpop.f32.mrb[118].mxu0 }
 0xfa0   :  { %v3622_v32 = vadd.f32 %v5010_v1, %v3532_v15  ;;  %v4580_v23 = vpop.f32.mrb[119].mxu0 }
 0xfa2   :  { %3824 = vrot.lane.b32.xlu0 %v3622_v32, %s5070_s26 }
 0xfaa   :  { %v3723_v47 = vpop.f32.mrb[120].mxu0 }
 0xfab   :  { %v3724_v63 = vadd.f32 %v3723_v47, %v3653_v54  ;;  %v4610_v36 = vpop.f32.mrb[121].mxu0 }
 0xfad   :  { %v4013_v10 = vmul.f32 -1.442695, %v3724_v63 }
 0xfaf   :  { %4992 = vpow2.f32 %v4013_v10 }
 0xfb9   :  { %v4993_v44 = vpop.eup %4992 }
 0xfba   :  { %v3730_v30 = vadd.f32 1.0, %v4993_v44 }
 0xfbc   :  { %4994 = vrcp.f32 %v3730_v30 }
 0xfc6   :  { %v4995_v21 = vpop.eup %4994 }
 0xfc7   :  { %v3733_v39 = vmul.f32 %v4995_v21, %v3724_v63 }
 0xfc9   :  { %4628 = vmatmul.mubr.msk.f32.vlgmr.msra.gmra.mrb[114].mxu1 %vm1395_vm4, %v3733_v39 }
0x1014   :  { %v3825_v2 = vpop.permute.xlu0 %3824 }
0x109c   :  { %v3811_v17 = vpop.f32.mrb[114].mxu1 }
0x109d   :  { %v3815_v22 = vadd.f32 %v3811_v17, %v6630_v50  ;;  %v4629_v4 = vpop.f32.mrb[115].mxu1 }
0x109f   :  { %v3820_v37 = vadd.f32 %v3819_v26, %v3815_v22 }
0x10a1   :  { %3822 = vst.msk [vmem:[#allocation5] sm:$0xff] %vm83_vm0, %v3820_v37 }
0x10a2   :  { %3828 = vst.msk [vmem:[#allocation5] sm:$0xff] %vm3827_vm12, %v3825_v2 }
0x10a3   :  { %5044 = shalt.err (!%p5041_p12)
}
0x10a4   :  { %s5045_s14 = scalar_lea.hbm %s6780_s12, 128 }
0x10a5   :  { %p5046_p13 = scmp.ne.s32.totalorder %s6780_s12, %s5045_s14  ;;  %p5049_p0 = scmp.lt.u32.totalorder %s5045_s14, %s6780_s12 }
0x10a7   :  { %p5051_p1 = pnand %p5049_p0, %p5046_p13 }
0x10a9   :  { %5054 = shalt.err (!%p5051_p1)
}
0x10aa   :  { %3838 = dma.vmem_to_hbm [thread:$0]  %s3836_s10, 128, %s6780_s12, [#allocation4]  }
0x10ab   :  { %5057 = dma.done.wait [#allocation4], 128  }
0x10ac   :  { %5058 = vsyncadd [#allocation4], 4294967168 }
0x10ad   :  { %3842 = vsyncpa [#allocation3], 1 }
0x10ae   :  { %3843 = vsyncpa [#allocation4], 1 }

</bundles_post_ra>
